<compile_context>
chip_gen: v7x
topology: tpu7x:2x2x1
jax: 0.10.0
libtpu: 0.0.40
codegen_flags: <defaults>
</compile_context>

<pallas_src>
import functools

import jax
import jax.numpy as jnp
from jax.experimental import pallas as pl
from jax.experimental.pallas import tpu as pltpu

BN_EPS = 1e-5


# --------------------------------------------------------------------------- #
# Fused kernel: grid = (phase, image)
#   phase 0: in-kernel halo pad -> per-tap implicit GEMM -> Welford stat partials
#   phase 1: fold stats into scale/shift -> BN FMA -> Mish -> single HBM write
# --------------------------------------------------------------------------- #
def _fused_conv_bn_mish_kernel(x_ref, w_ref, g_ref, b_ref, o_ref,
                               xp_ref, y_ref, mean_ref, m2_ref,
                               *, H, W, Cin, Cp, KH, KW, eps, inv_count):
    # x_ref : (1, H, W, Cin)        bf16 NHWC image (unpadded; halo pad done in-kernel)
    # w_ref : (KH*KW, Cin, Cp)      bf16 tap-major weights (Cout zero-padded to Cp)
    # g_ref, b_ref : (1, Cp)        f32 gamma / beta (zero-padded)
    # o_ref : (1, H, W, Cp)         bf16 output block (lane-dense, written once)
    # xp_ref: (H+2ph, W+2pw, Cin)   f32 VMEM scratch — halo-padded copy of the image
    # y_ref : (N, H*W, Cp)          f32 VMEM scratch — conv output, resident across phases
    # mean_ref, m2_ref : (1, Cp)    f32 running Chan/Welford batch statistics
    phase = pl.program_id(0)
    n = pl.program_id(1)
    M = H * W
    ph, pw = (KH - 1) // 2, (KW - 1) // 2

    @pl.when(phase == 0)
    def _conv_and_stats():
        @pl.when(n == 0)
        def _init():
            xp_ref[...] = jnp.zeros_like(xp_ref)        # halo border stays 0 for all images
            mean_ref[...] = jnp.zeros_like(mean_ref)
            m2_ref[...] = jnp.zeros_like(m2_ref)

        # In-kernel halo padding: drop this image into the interior of the padded
        # scratch (f32 scratch -> 32-bit masked stores at any sublane offset).
        xp_ref[pl.ds(ph, H), pl.ds(pw, W), :] = x_ref[0].astype(jnp.float32)

        # Implicit GEMM: one MXU matmul per tap, f32 accumulation, write y once.
        acc = None
        for kh in range(KH):
            for kw in range(KW):
                xs = xp_ref[pl.ds(kh, H), pl.ds(kw, W), :].reshape(M, Cin)
                part = jnp.dot(xs.astype(jnp.bfloat16), w_ref[kh * KW + kw],
                               preferred_element_type=jnp.float32)
                acc = part if acc is None else acc + part
        y_ref[n] = acc                                   # stays in VMEM — no HBM round-trip

        # Per-image (mean, M2) partials, Chan-combined across images (numerically
        # stable).  Previous count = n*M, this image's count = M.
        m_n = jnp.sum(acc, axis=0, keepdims=True) * (1.0 / M)         # (1, Cp)
        d = acc - m_n
        m2_n = jnp.sum(d * d, axis=0, keepdims=True)                   # (1, Cp)
        nf = n.astype(jnp.float32)
        delta = m_n - mean_ref[...]
        mean_ref[...] = mean_ref[...] + delta * (1.0 / (nf + 1.0))
        m2_ref[...] = m2_ref[...] + m2_n + delta * delta * (M * nf / (nf + 1.0))

    @pl.when(phase == 1)
    def _bn_mish():
        # Fold batch stats with gamma/beta into one per-channel FMA (tiny (1,Cp) math).
        var = m2_ref[...] * inv_count
        scale = g_ref[...] * jax.lax.rsqrt(var + eps)
        shift = b_ref[...] - mean_ref[...] * scale
        y = y_ref[n] * scale + shift                     # (M, Cp) f32

        # Mish: y * tanh(softplus(y)), softplus threshold 20 (PyTorch semantics).
        # tanh(log1p(e^y)) == ((1+e^y)^2 - 1) / ((1+e^y)^2 + 1): one exp + one EUP recip.
        e = jnp.exp(jnp.minimum(y, 20.0))
        t2 = (1.0 + e) * (1.0 + e)
        tanh_sp = (t2 - 1.0) * pl.reciprocal(t2 + 1.0, approx=True)
        out = jnp.where(y > 20.0, y, y * tanh_sp)
        o_ref[...] = out.reshape(1, H, W, Cp).astype(o_ref.dtype)


# --------------------------------------------------------------------------- #
# Parameter prep (hoisted out of the per-layer hot path — done once per layer)
# --------------------------------------------------------------------------- #
def prepare_conv_bn_params(weight, bias, gamma, beta):
    """Tap-major HWIO weight relayout, Cout zero-padded to a lane-dense multiple of
    128, bf16 cast; gamma/beta pad + f32 cast.  The conv bias is accepted for
    nn.Conv2d API parity but cancels exactly under training-mode BatchNorm."""
    del bias
    Cout, Cin, KH, KW = weight.shape
    assert KH % 2 == 1 and KW % 2 == 1, "CRDecoder's ConvBN uses odd kernel sizes"
    Cp = ((Cout + 127) // 128) * 128
    w = jnp.transpose(weight, (2, 3, 1, 0)).reshape(KH * KW, Cin, Cout)
    w = jnp.pad(w, ((0, 0), (0, 0), (0, Cp - Cout))).astype(jnp.bfloat16)
    g = jnp.pad(gamma.astype(jnp.float32), (0, Cp - Cout)).reshape(1, Cp)
    b = jnp.pad(beta.astype(jnp.float32), (0, Cp - Cout)).reshape(1, Cp)
    return dict(w=w, gamma=g, beta=b, KH=KH, KW=KW, Cin=Cin, Cout=Cout, Cp=Cp)


# --------------------------------------------------------------------------- #
# Layer-to-layer entry point: NHWC bf16 in, NHWC bf16 (Cp channels) out
# --------------------------------------------------------------------------- #
def conv_bn_mish_nhwc(x_nhwc, params, *, eps=BN_EPS, out_dtype=jnp.bfloat16):
    N, H, W, Cin = x_nhwc.shape
    assert Cin == params["Cin"], (Cin, params["Cin"])
    KH, KW, Cp = params["KH"], params["KW"], params["Cp"]
    ph, pw = (KH - 1) // 2, (KW - 1) // 2
    M = H * W

    # Whole-batch conv output stays resident in VMEM across the two phases.
    assert N * M * Cp * 4 <= 24 * (1 << 20), (
        "fused VMEM-resident ConvBN: batch too large for one call; chunk the batch")

    kernel = functools.partial(
        _fused_conv_bn_mish_kernel,
        H=H, W=W, Cin=Cin, Cp=Cp, KH=KH, KW=KW, eps=eps, inv_count=1.0 / (N * M))

    return pl.pallas_call(
        kernel,
        out_shape=jax.ShapeDtypeStruct((N, H, W, Cp), out_dtype),
        grid_spec=pltpu.PrefetchScalarGridSpec(
            num_scalar_prefetch=0,
            # Phase axis outer (0 = conv+stats over all images, 1 = BN+Mish+write),
            # image axis inner.  Both "arbitrary": phase 1 depends on every image's stats.
            grid=(2, N),
            in_specs=[
                # Image n during phase 0; pinned to block 0 during phase 1 (unused there).
                pl.BlockSpec((1, H, W, Cin), lambda p, n: (n * (1 - p), 0, 0, 0)),
                pl.BlockSpec((KH * KW, Cin, Cp), lambda p, n: (0, 0, 0)),
                pl.BlockSpec((1, Cp), lambda p, n: (0, 0)),
                pl.BlockSpec((1, Cp), lambda p, n: (0, 0)),
            ],
            # Output block index frozen at 0 during phase 0 (never written there), so
            # each image's block is written back to HBM exactly once, after phase 1.
            out_specs=pl.BlockSpec((1, H, W, Cp), lambda p, n: (n * p, 0, 0, 0)),
            scratch_shapes=[
                pltpu.VMEM((H + 2 * ph, W + 2 * pw, Cin), jnp.float32),  # halo-padded x
                pltpu.VMEM((N, M, Cp), jnp.float32),                     # resident conv out
                pltpu.VMEM((1, Cp), jnp.float32),                        # running mean
                pltpu.VMEM((1, Cp), jnp.float32),                        # running M2
            ],
        ),
        compiler_params=pltpu.CompilerParams(
            dimension_semantics=("arbitrary", "arbitrary")),
    )(x_nhwc.astype(jnp.bfloat16), params["w"], params["gamma"], params["beta"])


# --------------------------------------------------------------------------- #
# PyTorch-layout convenience wrapper (decoder-boundary conversion only)
# --------------------------------------------------------------------------- #
def conv_bn_mish(x_nchw, weight, bias, gamma, beta, *, eps=BN_EPS):
    """NCHW f32 in / out.  In the chained decoder, prepare_conv_bn_params is hoisted to
    parameter-prep time and layers pass NHWC-bf16-Cp activations directly; this wrapper
    exists so a single layer can be checked against the PyTorch-layout reference."""
    params = prepare_conv_bn_params(weight, bias, gamma, beta)
    x = jnp.transpose(x_nchw, (0, 2, 3, 1))
    y = conv_bn_mish_nhwc(x, params, eps=eps)
    return jnp.transpose(y[..., :params["Cout"]].astype(jnp.float32), (0, 3, 1, 2))


# --------------------------------------------------------------------------- #
# Pure-JAX reference (same bf16 operand quantization, f32 accumulation)
# --------------------------------------------------------------------------- #
def _reference(x, weight, bias, gamma, beta, eps=BN_EPS):
    _, _, KH, KW = weight.shape
    ph, pw = (KH - 1) // 2, (KW - 1) // 2
    xb = jnp.transpose(x, (0, 2, 3, 1)).astype(jnp.bfloat16)
    wb = jnp.transpose(weight, (2, 3, 1, 0)).astype(jnp.bfloat16)
    y = jax.lax.conv_general_dilated(
        xb, wb, (1, 1), ((ph, ph), (pw, pw)),
        dimension_numbers=("NHWC", "HWIO", "NHWC"),
        preferred_element_type=jnp.float32) + bias      # bias added, cancels in BN
    mean = jnp.mean(y, axis=(0, 1, 2), keepdims=True)
    var = jnp.mean(jnp.square(y - mean), axis=(0, 1, 2), keepdims=True)
    yn = (y - mean) * jax.lax.rsqrt(var + eps) * gamma + beta
    sp = jnp.where(yn > 20.0, yn, jnp.log1p(jnp.exp(jnp.minimum(yn, 20.0))))
    return jnp.transpose(yn * jnp.tanh(sp), (0, 3, 1, 2))


if __name__ == "__main__":
    key = jax.random.PRNGKey(0)

    cases = []
    # CRDecoder: fc output reshapes to (N, 4, dim1=24, dim2=16); first ConvBN is 4->64 (3,3).
    k1, k2, k3, key = jax.random.split(key, 4)
    cases.append(dict(
        x=jax.random.normal(k1, (2, 4, 24, 16), jnp.float32),
        w=jax.random.normal(k2, (64, 4, 3, 3), jnp.float32) * 0.15,
        b=jax.random.normal(k3, (64,), jnp.float32) * 0.1,
        g=jnp.ones((64,), jnp.float32),      # fresh nn.BatchNorm2d weight
        bt=jnp.zeros((64,), jnp.float32),    # fresh nn.BatchNorm2d bias
    ))
    # Non-square (1,5) ConvBN as used inside CRBlock.dec2 (channel count kept small).
    k1, k2, k3, k4, k5, key = jax.random.split(key, 6)
    cases.append(dict(
        x=jax.random.normal(k1, (2, 64, 24, 16), jnp.float32),
        w=jax.random.normal(k2, (64, 64, 1, 5), jnp.float32) * 0.06,
        b=jax.random.normal(k3, (64,), jnp.float32) * 0.1,
        g=1.0 + 0.1 * jax.random.normal(k4, (64,), jnp.float32),
        bt=0.1 * jax.random.normal(k5, (64,), jnp.float32),
    ))
    # 1x1 ConvBN at 128 channels (ConvBlock.conv1 third layer inside CRBlock.dec1):
    # exercises ph=pw=0 and Cout == Cp (no channel padding).
    k1, k2, k3, k4, k5, key = jax.random.split(key, 6)
    cases.append(dict(
        x=jax.random.normal(k1, (2, 128, 24, 16), jnp.float32),
        w=jax.random.normal(k2, (128, 128, 1, 1), jnp.float32) * 0.06,
        b=jax.random.normal(k3, (128,), jnp.float32) * 0.1,
        g=1.0 + 0.1 * jax.random.normal(k4, (128,), jnp.float32),
        bt=0.1 * jax.random.normal(k5, (128,), jnp.float32),
    ))

    for i, c in enumerate(cases):
        out = jax.block_until_ready(conv_bn_mish(c["x"], c["w"], c["b"], c["g"], c["bt"]))
        ref = jax.block_until_ready(_reference(c["x"], c["w"], c["b"], c["g"], c["bt"]))
        assert out.shape == ref.shape, (out.shape, ref.shape)
        # Tolerance covers bf16 matmul operands, the bf16 output cast, and the
        # hardware-approx reciprocal in Mish; structural errors (wrong windows / stats)
        # would be orders of magnitude larger.
        ok = bool(jnp.allclose(out, ref, atol=5e-3, rtol=1e-2))
        assert ok, f"case {i}: max abs err {float(jnp.max(jnp.abs(out - ref)))}"

    # TODO(synk): the remaining CRDecoder pieces (fc Linear+Mish+Dropout, residual adds,
    # channel concat, and the final bias-only Conv2d) compose around this fused ConvBN
    # primitive (chained in NHWC-bf16-Cp form) and are not included here.
    print("KERNEL_OK")
</pallas_src>

<mosaic_0001>
module attributes {stable_mosaic.version = 11 : i64} {
  func.func @_fused_conv_bn_mish_kernel(%arg0: i32, %arg1: i32, %arg2: memref<1x24x16x4xbf16, #tpu.memory_space<vmem>>, %arg3: memref<9x4x128xbf16, #tpu.memory_space<vmem>>, %arg4: memref<1x128xf32, #tpu.memory_space<vmem>>, %arg5: memref<1x128xf32, #tpu.memory_space<vmem>>, %arg6: memref<1x24x16x128xbf16, #tpu.memory_space<vmem>>, %arg7: memref<26x18x4xf32, #tpu.memory_space<vmem>>, %arg8: memref<2x384x128xf32, #tpu.memory_space<vmem>>, %arg9: memref<1x128xf32, #tpu.memory_space<vmem>>, %arg10: memref<1x128xf32, #tpu.memory_space<vmem>>) attributes {dimension_semantics = [#tpu.dimension_semantics<arbitrary>, #tpu.dimension_semantics<arbitrary>], iteration_bounds = array<i64: 2, 2>, scalar_prefetch = 0 : i64, scratch_operands = 4 : i64, tpu.core_type = #tpu.core_type<tc>, window_params = [{transform_indices = @transform_0, window_bounds = array<i64: 1, 24, 16, 4>}, {pipeline_mode = #tpu.pipeline_mode<synchronous>, transform_indices = @transform_1, window_bounds = array<i64: 9, 4, 128>}, {pipeline_mode = #tpu.pipeline_mode<synchronous>, transform_indices = @transform_2, window_bounds = array<i64: 1, 128>}, {pipeline_mode = #tpu.pipeline_mode<synchronous>, transform_indices = @transform_3, window_bounds = array<i64: 1, 128>}, {transform_indices = @transform_4, window_bounds = array<i64: 1, 24, 16, 128>}]} {
    %c0_i32 = arith.constant 0 : i32
    %0 = arith.cmpi eq, %arg0, %c0_i32 : i32
    %1 = arith.extui %0 : i1 to i32
    %c0_i32_0 = arith.constant 0 : i32
    %2 = arith.cmpi ne, %1, %c0_i32_0 : i32
    scf.if %2 {
      %c0_i32_2 = arith.constant 0 : i32
      %6 = arith.cmpi eq, %arg1, %c0_i32_2 : i32
      %7 = arith.extui %6 : i1 to i32
      %c0_i32_3 = arith.constant 0 : i32
      %8 = arith.cmpi ne, %7, %c0_i32_3 : i32
      scf.if %8 {
        %cst_83 = arith.constant 0.000000e+00 : f32
        %108 = vector.broadcast %cst_83 : f32 to vector<26x18x4xf32>
        %c0_84 = arith.constant 0 : index
        %c0_85 = arith.constant 0 : index
        %c0_86 = arith.constant 0 : index
        %109 = vector.load %arg7[%c0_84, %c0_85, %c0_86] : memref<26x18x4xf32, #tpu.memory_space<vmem>>, vector<26x18x4xf32>
        tpu.vector_store %arg7[%c0_84, %c0_85, %c0_86], %108 {strides = array<i32>} : memref<26x18x4xf32, #tpu.memory_space<vmem>>, vector<26x18x4xf32>,
        %cst_87 = arith.constant 0.000000e+00 : f32
        %110 = vector.broadcast %cst_87 : f32 to vector<1x128xf32>
        %c0_88 = arith.constant 0 : index
        %c0_89 = arith.constant 0 : index
        %111 = vector.load %arg9[%c0_88, %c0_89] : memref<1x128xf32, #tpu.memory_space<vmem>>, vector<1x128xf32>
        tpu.vector_store %arg9[%c0_88, %c0_89], %110 {strides = array<i32>} : memref<1x128xf32, #tpu.memory_space<vmem>>, vector<1x128xf32>,
        %cst_90 = arith.constant 0.000000e+00 : f32
        %112 = vector.broadcast %cst_90 : f32 to vector<1x128xf32>
        %c0_91 = arith.constant 0 : index
        %c0_92 = arith.constant 0 : index
        %113 = vector.load %arg10[%c0_91, %c0_92] : memref<1x128xf32, #tpu.memory_space<vmem>>, vector<1x128xf32>
        tpu.vector_store %arg10[%c0_91, %c0_92], %112 {strides = array<i32>} : memref<1x128xf32, #tpu.memory_space<vmem>>, vector<1x128xf32>,
      } else {
      }
      %c0 = arith.constant 0 : index
      %c0_4 = arith.constant 0 : index
      %c0_5 = arith.constant 0 : index
      %c0_6 = arith.constant 0 : index
      %9 = vector.load %arg2[%c0, %c0_4, %c0_5, %c0_6] : memref<1x24x16x4xbf16, #tpu.memory_space<vmem>>, vector<1x24x16x4xbf16>
      %10 = vector.shape_cast %9 : vector<1x24x16x4xbf16> to vector<24x16x4xbf16>
      %11 = arith.extf %10 : vector<24x16x4xbf16> to vector<24x16x4xf32>
      %c1 = arith.constant 1 : index
      %c1_7 = arith.constant 1 : index
      %c0_8 = arith.constant 0 : index
      %12 = vector.load %arg7[%c1, %c1_7, %c0_8] : memref<26x18x4xf32, #tpu.memory_space<vmem>>, vector<24x16x4xf32>
      tpu.vector_store %arg7[%c1, %c1_7, %c0_8], %11 {strides = array<i32>} : memref<26x18x4xf32, #tpu.memory_space<vmem>>, vector<24x16x4xf32>,
      %c0_9 = arith.constant 0 : index
      %c0_10 = arith.constant 0 : index
      %c0_11 = arith.constant 0 : index
      %13 = vector.load %arg7[%c0_9, %c0_10, %c0_11] : memref<26x18x4xf32, #tpu.memory_space<vmem>>, vector<24x16x4xf32>
      %14 = vector.shape_cast %13 : vector<24x16x4xf32> to vector<384x4xf32>
      %15 = arith.truncf %14 : vector<384x4xf32> to vector<384x4xbf16>
      %c0_12 = arith.constant 0 : index
      %c0_13 = arith.constant 0 : index
      %c0_14 = arith.constant 0 : index
      %16 = vector.load %arg3[%c0_12, %c0_13, %c0_14] : memref<9x4x128xbf16, #tpu.memory_space<vmem>>, vector<1x4x128xbf16>
      %17 = vector.shape_cast %16 : vector<1x4x128xbf16> to vector<4x128xbf16>
      %cst = arith.constant dense<0.000000e+00> : vector<384x128xf32>
      %18 = tpu.matmul %15, %17, %cst {dimension_numbers = #tpu.dot_dimension_numbers<[1], [0], [0], [1], [0, 0, 1, 1], [], []>} : vector<384x4xbf16>, vector<4x128xbf16>, vector<384x128xf32> -> vector<384x128xf32>
      %c0_15 = arith.constant 0 : index
      %c1_16 = arith.constant 1 : index
      %c0_17 = arith.constant 0 : index
      %19 = vector.load %arg7[%c0_15, %c1_16, %c0_17] : memref<26x18x4xf32, #tpu.memory_space<vmem>>, vector<24x16x4xf32>
      %20 = vector.shape_cast %19 : vector<24x16x4xf32> to vector<384x4xf32>
      %21 = arith.truncf %20 : vector<384x4xf32> to vector<384x4xbf16>
      %c1_18 = arith.constant 1 : index
      %c0_19 = arith.constant 0 : index
      %c0_20 = arith.constant 0 : index
      %22 = vector.load %arg3[%c1_18, %c0_19, %c0_20] : memref<9x4x128xbf16, #tpu.memory_space<vmem>>, vector<1x4x128xbf16>
      %23 = vector.shape_cast %22 : vector<1x4x128xbf16> to vector<4x128xbf16>
      %cst_21 = arith.constant dense<0.000000e+00> : vector<384x128xf32>
      %24 = tpu.matmul %21, %23, %cst_21 {dimension_numbers = #tpu.dot_dimension_numbers<[1], [0], [0], [1], [0, 0, 1, 1], [], []>} : vector<384x4xbf16>, vector<4x128xbf16>, vector<384x128xf32> -> vector<384x128xf32>
      %25 = arith.addf %18, %24 : vector<384x128xf32>
      %c0_22 = arith.constant 0 : index
      %c2 = arith.constant 2 : index
      %c0_23 = arith.constant 0 : index
      %26 = vector.load %arg7[%c0_22, %c2, %c0_23] : memref<26x18x4xf32, #tpu.memory_space<vmem>>, vector<24x16x4xf32>
      %27 = vector.shape_cast %26 : vector<24x16x4xf32> to vector<384x4xf32>
      %28 = arith.truncf %27 : vector<384x4xf32> to vector<384x4xbf16>
      %c2_24 = arith.constant 2 : index
      %c0_25 = arith.constant 0 : index
      %c0_26 = arith.constant 0 : index
      %29 = vector.load %arg3[%c2_24, %c0_25, %c0_26] : memref<9x4x128xbf16, #tpu.memory_space<vmem>>, vector<1x4x128xbf16>
      %30 = vector.shape_cast %29 : vector<1x4x128xbf16> to vector<4x128xbf16>
      %cst_27 = arith.constant dense<0.000000e+00> : vector<384x128xf32>
      %31 = tpu.matmul %28, %30, %cst_27 {dimension_numbers = #tpu.dot_dimension_numbers<[1], [0], [0], [1], [0, 0, 1, 1], [], []>} : vector<384x4xbf16>, vector<4x128xbf16>, vector<384x128xf32> -> vector<384x128xf32>
      %32 = arith.addf %25, %31 : vector<384x128xf32>
      %c1_28 = arith.constant 1 : index
      %c0_29 = arith.constant 0 : index
      %c0_30 = arith.constant 0 : index
      %33 = vector.load %arg7[%c1_28, %c0_29, %c0_30] : memref<26x18x4xf32, #tpu.memory_space<vmem>>, vector<24x16x4xf32>
      %34 = vector.shape_cast %33 : vector<24x16x4xf32> to vector<384x4xf32>
      %35 = arith.truncf %34 : vector<384x4xf32> to vector<384x4xbf16>
      %c3 = arith.constant 3 : index
      %c0_31 = arith.constant 0 : index
      %c0_32 = arith.constant 0 : index
      %36 = vector.load %arg3[%c3, %c0_31, %c0_32] : memref<9x4x128xbf16, #tpu.memory_space<vmem>>, vector<1x4x128xbf16>
      %37 = vector.shape_cast %36 : vector<1x4x128xbf16> to vector<4x128xbf16>
      %cst_33 = arith.constant dense<0.000000e+00> : vector<384x128xf32>
      %38 = tpu.matmul %35, %37, %cst_33 {dimension_numbers = #tpu.dot_dimension_numbers<[1], [0], [0], [1], [0, 0, 1, 1], [], []>} : vector<384x4xbf16>, vector<4x128xbf16>, vector<384x128xf32> -> vector<384x128xf32>
      %39 = arith.addf %32, %38 : vector<384x128xf32>
      %c1_34 = arith.constant 1 : index
      %c1_35 = arith.constant 1 : index
      %c0_36 = arith.constant 0 : index
      %40 = vector.load %arg7[%c1_34, %c1_35, %c0_36] : memref<26x18x4xf32, #tpu.memory_space<vmem>>, vector<24x16x4xf32>
      %41 = vector.shape_cast %40 : vector<24x16x4xf32> to vector<384x4xf32>
      %42 = arith.truncf %41 : vector<384x4xf32> to vector<384x4xbf16>
      %c4 = arith.constant 4 : index
      %c0_37 = arith.constant 0 : index
      %c0_38 = arith.constant 0 : index
      %43 = vector.load %arg3[%c4, %c0_37, %c0_38] : memref<9x4x128xbf16, #tpu.memory_space<vmem>>, vector<1x4x128xbf16>
      %44 = vector.shape_cast %43 : vector<1x4x128xbf16> to vector<4x128xbf16>
      %cst_39 = arith.constant dense<0.000000e+00> : vector<384x128xf32>
      %45 = tpu.matmul %42, %44, %cst_39 {dimension_numbers = #tpu.dot_dimension_numbers<[1], [0], [0], [1], [0, 0, 1, 1], [], []>} : vector<384x4xbf16>, vector<4x128xbf16>, vector<384x128xf32> -> vector<384x128xf32>
      %46 = arith.addf %39, %45 : vector<384x128xf32>
      %c1_40 = arith.constant 1 : index
      %c2_41 = arith.constant 2 : index
      %c0_42 = arith.constant 0 : index
      %47 = vector.load %arg7[%c1_40, %c2_41, %c0_42] : memref<26x18x4xf32, #tpu.memory_space<vmem>>, vector<24x16x4xf32>
      %48 = vector.shape_cast %47 : vector<24x16x4xf32> to vector<384x4xf32>
      %49 = arith.truncf %48 : vector<384x4xf32> to vector<384x4xbf16>
      %c5 = arith.constant 5 : index
      %c0_43 = arith.constant 0 : index
      %c0_44 = arith.constant 0 : index
      %50 = vector.load %arg3[%c5, %c0_43, %c0_44] : memref<9x4x128xbf16, #tpu.memory_space<vmem>>, vector<1x4x128xbf16>
      %51 = vector.shape_cast %50 : vector<1x4x128xbf16> to vector<4x128xbf16>
      %cst_45 = arith.constant dense<0.000000e+00> : vector<384x128xf32>
      %52 = tpu.matmul %49, %51, %cst_45 {dimension_numbers = #tpu.dot_dimension_numbers<[1], [0], [0], [1], [0, 0, 1, 1], [], []>} : vector<384x4xbf16>, vector<4x128xbf16>, vector<384x128xf32> -> vector<384x128xf32>
      %53 = arith.addf %46, %52 : vector<384x128xf32>
      %c2_46 = arith.constant 2 : index
      %c0_47 = arith.constant 0 : index
      %c0_48 = arith.constant 0 : index
      %54 = vector.load %arg7[%c2_46, %c0_47, %c0_48] : memref<26x18x4xf32, #tpu.memory_space<vmem>>, vector<24x16x4xf32>
      %55 = vector.shape_cast %54 : vector<24x16x4xf32> to vector<384x4xf32>
      %56 = arith.truncf %55 : vector<384x4xf32> to vector<384x4xbf16>
      %c6 = arith.constant 6 : index
      %c0_49 = arith.constant 0 : index
      %c0_50 = arith.constant 0 : index
      %57 = vector.load %arg3[%c6, %c0_49, %c0_50] : memref<9x4x128xbf16, #tpu.memory_space<vmem>>, vector<1x4x128xbf16>
      %58 = vector.shape_cast %57 : vector<1x4x128xbf16> to vector<4x128xbf16>
      %cst_51 = arith.constant dense<0.000000e+00> : vector<384x128xf32>
      %59 = tpu.matmul %56, %58, %cst_51 {dimension_numbers = #tpu.dot_dimension_numbers<[1], [0], [0], [1], [0, 0, 1, 1], [], []>} : vector<384x4xbf16>, vector<4x128xbf16>, vector<384x128xf32> -> vector<384x128xf32>
      %60 = arith.addf %53, %59 : vector<384x128xf32>
      %c2_52 = arith.constant 2 : index
      %c1_53 = arith.constant 1 : index
      %c0_54 = arith.constant 0 : index
      %61 = vector.load %arg7[%c2_52, %c1_53, %c0_54] : memref<26x18x4xf32, #tpu.memory_space<vmem>>, vector<24x16x4xf32>
      %62 = vector.shape_cast %61 : vector<24x16x4xf32> to vector<384x4xf32>
      %63 = arith.truncf %62 : vector<384x4xf32> to vector<384x4xbf16>
      %c7 = arith.constant 7 : index
      %c0_55 = arith.constant 0 : index
      %c0_56 = arith.constant 0 : index
      %64 = vector.load %arg3[%c7, %c0_55, %c0_56] : memref<9x4x128xbf16, #tpu.memory_space<vmem>>, vector<1x4x128xbf16>
      %65 = vector.shape_cast %64 : vector<1x4x128xbf16> to vector<4x128xbf16>
      %cst_57 = arith.constant dense<0.000000e+00> : vector<384x128xf32>
      %66 = tpu.matmul %63, %65, %cst_57 {dimension_numbers = #tpu.dot_dimension_numbers<[1], [0], [0], [1], [0, 0, 1, 1], [], []>} : vector<384x4xbf16>, vector<4x128xbf16>, vector<384x128xf32> -> vector<384x128xf32>
      %67 = arith.addf %60, %66 : vector<384x128xf32>
      %c2_58 = arith.constant 2 : index
      %c2_59 = arith.constant 2 : index
      %c0_60 = arith.constant 0 : index
      %68 = vector.load %arg7[%c2_58, %c2_59, %c0_60] : memref<26x18x4xf32, #tpu.memory_space<vmem>>, vector<24x16x4xf32>
      %69 = vector.shape_cast %68 : vector<24x16x4xf32> to vector<384x4xf32>
      %70 = arith.truncf %69 : vector<384x4xf32> to vector<384x4xbf16>
      %c8 = arith.constant 8 : index
      %c0_61 = arith.constant 0 : index
      %c0_62 = arith.constant 0 : index
      %71 = vector.load %arg3[%c8, %c0_61, %c0_62] : memref<9x4x128xbf16, #tpu.memory_space<vmem>>, vector<1x4x128xbf16>
      %72 = vector.shape_cast %71 : vector<1x4x128xbf16> to vector<4x128xbf16>
      %cst_63 = arith.constant dense<0.000000e+00> : vector<384x128xf32>
      %73 = tpu.matmul %70, %72, %cst_63 {dimension_numbers = #tpu.dot_dimension_numbers<[1], [0], [0], [1], [0, 0, 1, 1], [], []>} : vector<384x4xbf16>, vector<4x128xbf16>, vector<384x128xf32> -> vector<384x128xf32>
      %74 = arith.addf %67, %73 : vector<384x128xf32>
      %75 = arith.index_cast %arg1 : i32 to index
      %c0_64 = arith.constant 0 : index
      %c0_65 = arith.constant 0 : index
      %76 = vector.load %arg8[%75, %c0_64, %c0_65] : memref<2x384x128xf32, #tpu.memory_space<vmem>>, vector<1x384x128xf32>
      %77 = vector.shape_cast %76 : vector<1x384x128xf32> to vector<384x128xf32>
      %78 = vector.shape_cast %74 : vector<384x128xf32> to vector<1x384x128xf32>
      tpu.vector_store %arg8[%75, %c0_64, %c0_65], %78 {strides = array<i32>} : memref<2x384x128xf32, #tpu.memory_space<vmem>>, vector<1x384x128xf32>,
      %cst_66 = arith.constant dense<0.000000e+00> : vector<128xf32>
      %79 = vector.multi_reduction <add>, %74, %cst_66 [0] : vector<384x128xf32> to vector<128xf32>
      %80 = vector.shape_cast %79 : vector<128xf32> to vector<1x128xf32>
      %cst_67 = arith.constant 0.00260416674 : f32
      %81 = vector.broadcast %cst_67 : f32 to vector<1x128xf32>
      %82 = arith.mulf %80, %81 : vector<1x128xf32>
      %83 = vector.broadcast %82 : vector<1x128xf32> to vector<384x128xf32>
      %84 = arith.subf %74, %83 : vector<384x128xf32>
      %85 = arith.mulf %84, %84 : vector<384x128xf32>
      %cst_68 = arith.constant dense<0.000000e+00> : vector<128xf32>
      %86 = vector.multi_reduction <add>, %85, %cst_68 [0] : vector<384x128xf32> to vector<128xf32>
      %87 = vector.shape_cast %86 : vector<128xf32> to vector<1x128xf32>
      %88 = arith.sitofp %arg1 : i32 to f32
      %c0_69 = arith.constant 0 : index
      %c0_70 = arith.constant 0 : index
      %89 = vector.load %arg9[%c0_69, %c0_70] : memref<1x128xf32, #tpu.memory_space<vmem>>, vector<1x128xf32>
      %90 = arith.subf %82, %89 : vector<1x128xf32>
      %c0_71 = arith.constant 0 : index
      %c0_72 = arith.constant 0 : index
      %91 = vector.load %arg9[%c0_71, %c0_72] : memref<1x128xf32, #tpu.memory_space<vmem>>, vector<1x128xf32>
      %cst_73 = arith.constant 1.000000e+00 : f32
      %92 = arith.addf %88, %cst_73 : f32
      %cst_74 = arith.constant 1.000000e+00 : f32
      %93 = arith.divf %cst_74, %92 : f32
      %94 = vector.broadcast %93 : f32 to vector<1x128xf32>
      %95 = arith.mulf %90, %94 : vector<1x128xf32>
      %96 = arith.addf %91, %95 : vector<1x128xf32>
      %c0_75 = arith.constant 0 : index
      %c0_76 = arith.constant 0 : index
      %97 = vector.load %arg9[%c0_75, %c0_76] : memref<1x128xf32, #tpu.memory_space<vmem>>, vector<1x128xf32>
      tpu.vector_store %arg9[%c0_75, %c0_76], %96 {strides = array<i32>} : memref<1x128xf32, #tpu.memory_space<vmem>>, vector<1x128xf32>,
      %c0_77 = arith.constant 0 : index
      %c0_78 = arith.constant 0 : index
      %98 = vector.load %arg10[%c0_77, %c0_78] : memref<1x128xf32, #tpu.memory_space<vmem>>, vector<1x128xf32>
      %99 = arith.addf %98, %87 : vector<1x128xf32>
      %100 = arith.mulf %90, %90 : vector<1x128xf32>
      %cst_79 = arith.constant 3.840000e+02 : f32
      %101 = arith.mulf %cst_79, %88 : f32
      %cst_80 = arith.constant 1.000000e+00 : f32
      %102 = arith.addf %88, %cst_80 : f32
      %103 = arith.divf %101, %102 : f32
      %104 = vector.broadcast %103 : f32 to vector<1x128xf32>
      %105 = arith.mulf %100, %104 : vector<1x128xf32>
      %106 = arith.addf %99, %105 : vector<1x128xf32>
      %c0_81 = arith.constant 0 : index
      %c0_82 = arith.constant 0 : index
      %107 = vector.load %arg10[%c0_81, %c0_82] : memref<1x128xf32, #tpu.memory_space<vmem>>, vector<1x128xf32>
      tpu.vector_store %arg10[%c0_81, %c0_82], %106 {strides = array<i32>} : memref<1x128xf32, #tpu.memory_space<vmem>>, vector<1x128xf32>,
    } else {
    }
    %c1_i32 = arith.constant 1 : i32
    %3 = arith.cmpi eq, %arg0, %c1_i32 : i32
    %4 = arith.extui %3 : i1 to i32
    %c0_i32_1 = arith.constant 0 : i32
    %5 = arith.cmpi ne, %4, %c0_i32_1 : i32
    scf.if %5 {
      %c0 = arith.constant 0 : index
      %c0_2 = arith.constant 0 : index
      %6 = vector.load %arg10[%c0, %c0_2] : memref<1x128xf32, #tpu.memory_space<vmem>>, vector<1x128xf32>
      %cst = arith.constant 0.00130208337 : f32
      %7 = vector.broadcast %cst : f32 to vector<1x128xf32>
      %8 = arith.mulf %6, %7 : vector<1x128xf32>
      %c0_3 = arith.constant 0 : index
      %c0_4 = arith.constant 0 : index
      %9 = vector.load %arg4[%c0_3, %c0_4] : memref<1x128xf32, #tpu.memory_space<vmem>>, vector<1x128xf32>
      %cst_5 = arith.constant 9.99999974E-6 : f32
      %10 = vector.broadcast %cst_5 : f32 to vector<1x128xf32>
      %11 = arith.addf %8, %10 : vector<1x128xf32>
      %12 = math.rsqrt %11 : vector<1x128xf32>
      %13 = arith.mulf %9, %12 : vector<1x128xf32>
      %c0_6 = arith.constant 0 : index
      %c0_7 = arith.constant 0 : index
      %14 = vector.load %arg5[%c0_6, %c0_7] : memref<1x128xf32, #tpu.memory_space<vmem>>, vector<1x128xf32>
      %c0_8 = arith.constant 0 : index
      %c0_9 = arith.constant 0 : index
      %15 = vector.load %arg9[%c0_8, %c0_9] : memref<1x128xf32, #tpu.memory_space<vmem>>, vector<1x128xf32>
      %16 = arith.mulf %15, %13 : vector<1x128xf32>
      %17 = arith.subf %14, %16 : vector<1x128xf32>
      %18 = arith.index_cast %arg1 : i32 to index
      %c0_10 = arith.constant 0 : index
      %c0_11 = arith.constant 0 : index
      %19 = vector.load %arg8[%18, %c0_10, %c0_11] : memref<2x384x128xf32, #tpu.memory_space<vmem>>, vector<1x384x128xf32>
      %20 = vector.shape_cast %19 : vector<1x384x128xf32> to vector<384x128xf32>
      %21 = vector.broadcast %13 : vector<1x128xf32> to vector<384x128xf32>
      %22 = arith.mulf %20, %21 : vector<384x128xf32>
      %23 = vector.broadcast %17 : vector<1x128xf32> to vector<384x128xf32>
      %24 = arith.addf %22, %23 : vector<384x128xf32>
      %cst_12 = arith.constant 2.000000e+01 : f32
      %25 = vector.broadcast %cst_12 : f32 to vector<384x128xf32>
      %26 = arith.minimumf %24, %25 : vector<384x128xf32>
      %27 = math.exp %26 : vector<384x128xf32>
      %cst_13 = arith.constant 1.000000e+00 : f32
      %28 = vector.broadcast %cst_13 : f32 to vector<384x128xf32>
      %29 = arith.addf %28, %27 : vector<384x128xf32>
      %cst_14 = arith.constant 1.000000e+00 : f32
      %30 = vector.broadcast %cst_14 : f32 to vector<384x128xf32>
      %31 = arith.addf %30, %27 : vector<384x128xf32>
      %32 = arith.mulf %29, %31 : vector<384x128xf32>
      %cst_15 = arith.constant 1.000000e+00 : f32
      %33 = vector.broadcast %cst_15 : f32 to vector<384x128xf32>
      %34 = arith.subf %32, %33 : vector<384x128xf32>
      %cst_16 = arith.constant 1.000000e+00 : f32
      %35 = vector.broadcast %cst_16 : f32 to vector<384x128xf32>
      %36 = arith.addf %32, %35 : vector<384x128xf32>
      %37 = tpu.reciprocal %36 {approx = true} : vector<384x128xf32> -> vector<384x128xf32>
      %38 = arith.mulf %34, %37 : vector<384x128xf32>
      %cst_17 = arith.constant 2.000000e+01 : f32
      %39 = vector.broadcast %cst_17 : f32 to vector<384x128xf32>
      %40 = arith.cmpf ogt, %24, %39 : vector<384x128xf32>
      %41 = arith.mulf %24, %38 : vector<384x128xf32>
      %42 = arith.select %40, %24, %41 : vector<384x128xi1>, vector<384x128xf32>
      %43 = vector.shape_cast %42 : vector<384x128xf32> to vector<1x24x16x128xf32>
      %44 = arith.truncf %43 : vector<1x24x16x128xf32> to vector<1x24x16x128xbf16>
      %c0_18 = arith.constant 0 : index
      %c0_19 = arith.constant 0 : index
      %c0_20 = arith.constant 0 : index
      %c0_21 = arith.constant 0 : index
      %45 = vector.load %arg6[%c0_18, %c0_19, %c0_20, %c0_21] : memref<1x24x16x128xbf16, #tpu.memory_space<vmem>>, vector<1x24x16x128xbf16>
      tpu.vector_store %arg6[%c0_18, %c0_19, %c0_20, %c0_21], %44 {strides = array<i32>} : memref<1x24x16x128xbf16, #tpu.memory_space<vmem>>, vector<1x24x16x128xbf16>,
    } else {
    }
    return
  }
  func.func @transform_0(%arg0: i32, %arg1: i32) -> (i32, i32, i32, i32) {
    %c1_i32 = arith.constant 1 : i32
    %0 = arith.subi %c1_i32, %arg0 : i32
    %1 = arith.muli %arg1, %0 : i32
    %c0_i32 = arith.constant 0 : i32
    %c0_i32_0 = arith.constant 0 : i32
    %c0_i32_1 = arith.constant 0 : i32
    %c0_i32_2 = arith.constant 0 : i32
    return %1, %c0_i32, %c0_i32_0, %c0_i32_1 : i32, i32, i32, i32
  }
  func.func @transform_1(%arg0: i32, %arg1: i32) -> (i32, i32, i32) {
    %c0_i32 = arith.constant 0 : i32
    %c0_i32_0 = arith.constant 0 : i32
    %c0_i32_1 = arith.constant 0 : i32
    %c0_i32_2 = arith.constant 0 : i32
    return %c0_i32, %c0_i32_0, %c0_i32_1 : i32, i32, i32
  }
  func.func @transform_2(%arg0: i32, %arg1: i32) -> (i32, i32) {
    %c0_i32 = arith.constant 0 : i32
    %c0_i32_0 = arith.constant 0 : i32
    %c0_i32_1 = arith.constant 0 : i32
    return %c0_i32, %c0_i32_0 : i32, i32
  }
  func.func @transform_3(%arg0: i32, %arg1: i32) -> (i32, i32) {
    %c0_i32 = arith.constant 0 : i32
    %c0_i32_0 = arith.constant 0 : i32
    %c0_i32_1 = arith.constant 0 : i32
    return %c0_i32, %c0_i32_0 : i32, i32
  }
  func.func @transform_4(%arg0: i32, %arg1: i32) -> (i32, i32, i32, i32) {
    %0 = arith.muli %arg1, %arg0 : i32
    %c0_i32 = arith.constant 0 : i32
    %c0_i32_0 = arith.constant 0 : i32
    %c0_i32_1 = arith.constant 0 : i32
    %c0_i32_2 = arith.constant 0 : i32
    return %0, %c0_i32, %c0_i32_0, %c0_i32_1 : i32, i32, i32, i32
  }
}

</mosaic_0001>

<bundles_post_ra>
// kernel: tpu_custom_call.1
= control target key start
LH: loop header
LB: loop body
LE: loop exit
PB: predicated region body
PF: predicated region fallthrough
CT: control target
= control target key end

     0   :  { %9 = vsyncpa [#allocation7], 0  ;;  %s9554_s0 = inlined_call_operand.vmem [shape: bf16[2,24,16,4], index: 0, kind: input, shape index: {}]   ;;  %s9555_s1 = inlined_call_operand.vmem [shape: bf16[9,4,128], index: 1, kind: input, shape index: {}]   ;;  %s9556_s2 = inlined_call_operand.vmem [shape: f32[1,128], index: 2, kind: input, shape index: {}]   ;;  %s9557_s3 = inlined_call_operand.vmem [shape: f32[1,128], index: 3, kind: input, shape index: {}]   ;;  %s9558_s4 = inlined_call_operand.hbm [shape: bf16[2,24,16,128], index: 4, kind: output, shape index: {}]  }
   0x1   :  { %11 = vsyncpa [#allocation7 + $0x1], 0  ;;  %s7634_s15 = smov 0   ;;  %s7636_s16 = smov 0  }
   0x2   :  { %s7638_s17 = smov 0   ;;  %s7640_s18 = smov 0  }
   0x3   :  { %s7642_s19 = smov 0   ;;  %s7644_s20 = smov 0  }
   0x4   :  { %s7646_s21 = smov 0   ;;  %s7648_s22 = smov 0  }
   0x5 LB: > { %s5521_s23 = sadd.s32 4294967295, %s7603_s22   ;;  %s5522_s24 = sadd.s32 4294967294, %s7603_s22   ;;  %s7603_s22 = sphi %s7648_s22, %s17_s22   ;;  %s7599_s21 = sphi %s7646_s21, %s9572_s21   ;;  %s7595_s20 = sphi %s7644_s20, %s9571_s20   ;;  %s7591_s19 = sphi %s7642_s19, %s9570_s19   ;;  %s7587_s18 = sphi %s7640_s18, %s9569_s18   ;;  %s7583_s17 = sphi %s7638_s17, %s9568_s17   ;;  %s7579_s16 = sphi %s7636_s16, %s9567_s16   ;;  %s7575_s15 = sphi %s7634_s15, %s9566_s15  }
   0x6   : > { %s26_s25 = sadd.s32 1, %s7595_s20  ;;  %s29_s26 = sadd.s32 1, %s7599_s21 }
   0x7   : > { %p27_p0 = scmp.ge.s32.totalorder %s26_s25, 2  ;;  %s126_s27 = smul.u32 %s7595_s20, %s7599_s21 }
   0x8   : > { %p141_p1 = scmp.ne.s32.totalorder %s7583_s17, %s7579_s16  ;;  %p142_p2 = scmp.eq.s32.totalorder %s5521_s23, 3 }
   0x9   : > { %s9574_s25 = smov (%p27_p0, %s26_s25), 0  ;;  %s9576_s26 = smov (!%p27_p0, %s29_s26), %s7599_s21 }
   0xa   : > { %p147_p3 = scmp.ne.s32.totalorder %s7579_s16, %s7575_s15  ;;  %p31_p4 = scmp.ge.s32.totalorder %s9576_s26, 2 }
   0xb   : > { %p148_p5 = scmp.eq.s32.totalorder %s5522_s24, 3  ;;  %p7687_p6 = por %p142_p2, %p141_p1 }
   0xc   : > { %p5525_p7 = scmp.ge.s32.totalorder %s7603_s22, 1  ;;  %s9578_s26 = smov (%p31_p4, %s9576_s26), 0 }
   0xd   : > { %p7694_p8 = por %p148_p5, %p147_p3  ;;  %p187_p9 = scmp.lt.s32.totalorder %s7603_s22, 5 }
   0xe   : > { %s127_s30 = smul.u32 %s9578_s26, %s9574_s25  ;;  %s131_s6 = sadd.s32 1, %s7583_s17 }
   0xf   : > { %p188_p10 = pnand %p5525_p7, %p187_p9 }
  0x10   : > { %s128_s5 = ssub.s32 %s126_s27, %s127_s30  ;;  %s212_s8 = sand.u32 (!%p188_p10), 1, %s7579_s16  }
  0x11   : > { %p129_p11 = scmp.eq.s32.totalorder %s128_s5, 0  ;;  %191 = sbr.rel (%p188_p10) target bundleno = 1118 (0x45e), region = 36 }
  0x12   : > { %s215_s9 = ssub.s32 (!%p188_p10), 1, %s7591_s19  ;;  %s7234_s10 = smul.u32 (!%p188_p10), 192, %s212_s8 }
  0x13   : > { %s7703_s7 = scalar_select %p129_p11, %s7583_s17, %s131_s6  }
  0x14   : > { %s216_s11 = smul.u32 (!%p188_p10), %s7587_s18, %s215_s9  ;;  %s7715_s24 = scalar_lea.vmem (!%p188_p10), [#allocation6], %s7234_s10 }
  0x15   : > { %p5527_p13 = scmp.ne.s32.totalorder (!%p188_p10), %s7591_s19, 0 }
  0x16   : > { %p217_p12 = scmp.lt.s32.totalorder (!%p188_p10), %s216_s11, 1 }
  0x18   : > { %s9580_s11 = smov (!%p217_p12, %s216_s11), 1  ;;  %229 = sbr.rel (%p5527_p13) target bundleno = 870 (0x366), region = 40 }
  0x19   : > { %s7235_s12 = smul.u32 192, %s9580_s11 }
  0x1b   : > { %s7713_s23 = scalar_lea.vmem %s9554_s0, %s7235_s12 }
  0x1f   : > { %p5528_p0 = scmp.ne.s32.totalorder %s7587_s18, 0 }
  0x20   : > { %vm234_vm0 = vcmask (!%p5528_p0), 31744   ;;  %vm237_vm1 = vcmask (!%p5528_p0), 25600   ;;  %v7605_v0 = vmov (!%p5528_p0), 0.0  }
  0x21   : > { %233 = sbr.rel (%p5528_p0) target bundleno = 73 (0x49), region = 44  ;;  %235 = vst.msk [vmem:[#allocation2] sm:$0xff] (!%p5528_p0), %vm234_vm0, %v7605_v0  ;;  %236 = vst.msk [vmem:[#allocation2 + $0x8] sm:$0xff] (!%p5528_p0), %vm234_vm0, %v7605_v0 }
  0x22   : > { %239 = vst.msk [vmem:[#allocation2 + $0x18] sm:$0xff] (!%p5528_p0), %vm234_vm0, %v7605_v0  ;;  %240 = vst.msk [vmem:[#allocation2 + $0x20] sm:$0xff] (!%p5528_p0), %vm234_vm0, %v7605_v0 }
  0x23   : > { %242 = vst.msk [vmem:[#allocation2 + $0x30] sm:$0xff] (!%p5528_p0), %vm234_vm0, %v7605_v0  ;;  %243 = vst.msk [vmem:[#allocation2 + $0x38] sm:$0xff] (!%p5528_p0), %vm234_vm0, %v7605_v0 }
  0x24   : > { %245 = vst.msk [vmem:[#allocation2 + $0x48] sm:$0xff] (!%p5528_p0), %vm234_vm0, %v7605_v0  ;;  %246 = vst.msk [vmem:[#allocation2 + $0x50] sm:$0xff] (!%p5528_p0), %vm234_vm0, %v7605_v0 }
  0x25   : > { %248 = vst.msk [vmem:[#allocation2 + $0x60] sm:$0xff] (!%p5528_p0), %vm234_vm0, %v7605_v0  ;;  %249 = vst.msk [vmem:[#allocation2 + $0x68] sm:$0xff] (!%p5528_p0), %vm234_vm0, %v7605_v0 }
  0x26   : > { %251 = vst.msk [vmem:[#allocation2 + $0x78] sm:$0xff] (!%p5528_p0), %vm234_vm0, %v7605_v0  ;;  %252 = vst.msk [vmem:[#allocation2 + $0x80] sm:$0xff] (!%p5528_p0), %vm234_vm0, %v7605_v0 }
  0x27   : > { %254 = vst.msk [vmem:[#allocation2 + $0x90] sm:$0xff] (!%p5528_p0), %vm234_vm0, %v7605_v0  ;;  %255 = vst.msk [vmem:[#allocation2 + $0x98] sm:$0xff] (!%p5528_p0), %vm234_vm0, %v7605_v0 }
  0x28   : > { %257 = vst.msk [vmem:[#allocation2 + $0xa8] sm:$0xff] %vm234_vm0, %v7605_v0  ;;  %258 = vst.msk [vmem:[#allocation2 + $0xb0] sm:$0xff] %vm234_vm0, %v7605_v0 }
  0x29   : > { %260 = vst.msk [vmem:[#allocation2 + $0xc0] sm:$0xff] %vm234_vm0, %v7605_v0  ;;  %261 = vst.msk [vmem:[#allocation2 + $0xc8] sm:$0xff] %vm234_vm0, %v7605_v0 }
  0x2a   : > { %263 = vst.msk [vmem:[#allocation2 + $0xd8] sm:$0xff] %vm234_vm0, %v7605_v0  ;;  %264 = vst.msk [vmem:[#allocation2 + $0xe0] sm:$0xff] %vm234_vm0, %v7605_v0 }
  0x2b   : > { %266 = vst.msk [vmem:[#allocation2 + $0xf0] sm:$0xff] %vm234_vm0, %v7605_v0  ;;  %267 = vst.msk [vmem:[#allocation2 + $0xf8] sm:$0xff] %vm234_vm0, %v7605_v0 }
  0x2c   : > { %269 = vst.msk [vmem:[#allocation2 + $0x108] sm:$0xff] %vm234_vm0, %v7605_v0  ;;  %270 = vst.msk [vmem:[#allocation2 + $0x110] sm:$0xff] %vm234_vm0, %v7605_v0 }
  0x2d   : > { %272 = vst.msk [vmem:[#allocation2 + $0x120] sm:$0xff] %vm234_vm0, %v7605_v0  ;;  %273 = vst.msk [vmem:[#allocation2 + $0x128] sm:$0xff] %vm234_vm0, %v7605_v0 }
  0x2e   : > { %275 = vst.msk [vmem:[#allocation2 + $0x138] sm:$0xff] %vm234_vm0, %v7605_v0  ;;  %276 = vst.msk [vmem:[#allocation2 + $0x140] sm:$0xff] %vm234_vm0, %v7605_v0 }
  0x2f   : > { %278 = vst.msk [vmem:[#allocation2 + $0x150] sm:$0xff] %vm234_vm0, %v7605_v0  ;;  %279 = vst.msk [vmem:[#allocation2 + $0x158] sm:$0xff] %vm234_vm0, %v7605_v0 }
  0x30   : > { %281 = vst.msk [vmem:[#allocation2 + $0x168] sm:$0xff] %vm234_vm0, %v7605_v0  ;;  %282 = vst.msk [vmem:[#allocation2 + $0x170] sm:$0xff] %vm234_vm0, %v7605_v0 }
  0x31   : > { %284 = vst.msk [vmem:[#allocation2 + $0x180] sm:$0xff] %vm234_vm0, %v7605_v0  ;;  %285 = vst.msk [vmem:[#allocation2 + $0x188] sm:$0xff] %vm234_vm0, %v7605_v0 }
  0x32   : > { %287 = vst.msk [vmem:[#allocation2 + $0x198] sm:$0xff] %vm234_vm0, %v7605_v0  ;;  %288 = vst.msk [vmem:[#allocation2 + $0x1a0] sm:$0xff] %vm234_vm0, %v7605_v0 }
  0x33   : > { %290 = vst.msk [vmem:[#allocation2 + $0x1b0] sm:$0xff] %vm234_vm0, %v7605_v0  ;;  %291 = vst.msk [vmem:[#allocation2 + $0x1b8] sm:$0xff] %vm234_vm0, %v7605_v0 }
  0x34   : > { %293 = vst.msk [vmem:[#allocation2 + $0x1c8] sm:$0xff] %vm234_vm0, %v7605_v0  ;;  %294 = vst.msk [vmem:[#allocation2 + $0x1d0] sm:$0xff] %vm234_vm0, %v7605_v0 }
  0x35   : > { %296 = vst.msk [vmem:[#allocation2 + $0x1e0] sm:$0xff] %vm234_vm0, %v7605_v0  ;;  %297 = vst.msk [vmem:[#allocation2 + $0x1e8] sm:$0xff] %vm234_vm0, %v7605_v0 }
  0x36   : > { %299 = vst.msk [vmem:[#allocation2 + $0x1f8] sm:$0xff] %vm234_vm0, %v7605_v0  ;;  %300 = vst.msk [vmem:[#allocation2 + $0x200] sm:$0xff] %vm234_vm0, %v7605_v0 }
  0x37   : > { %302 = vst.msk [vmem:[#allocation2 + $0x210] sm:$0xff] %vm234_vm0, %v7605_v0  ;;  %303 = vst.msk [vmem:[#allocation2 + $0x218] sm:$0xff] %vm234_vm0, %v7605_v0 }
  0x38   : > { %305 = vst.msk [vmem:[#allocation2 + $0x228] sm:$0xff] %vm234_vm0, %v7605_v0  ;;  %306 = vst.msk [vmem:[#allocation2 + $0x230] sm:$0xff] %vm234_vm0, %v7605_v0 }
  0x39   : > { %308 = vst.msk [vmem:[#allocation2 + $0x240] sm:$0xff] %vm234_vm0, %v7605_v0  ;;  %309 = vst.msk [vmem:[#allocation2 + $0x248] sm:$0xff] %vm234_vm0, %v7605_v0 }
  0x3a   : > { %311 = vst.msk [vmem:[#allocation2 + $0x258] sm:$0xff] %vm234_vm0, %v7605_v0  ;;  %312 = vst.msk [vmem:[#allocation2 + $0x260] sm:$0xff] %vm234_vm0, %v7605_v0 }
  0x3b   : > { %314 = vst [vmem:[#allocation4] sm:$0x1] %v7605_v0  ;;  %315 = vst [vmem:[#allocation5] sm:$0x1] %v7605_v0 }
  0x3c   : > { %238 = vst.msk [vmem:[#allocation2 + $0x10] sm:$0x3] %vm237_vm1, %v7605_v0  ;;  %241 = vst.msk [vmem:[#allocation2 + $0x28] sm:$0x3] %vm237_vm1, %v7605_v0 }
  0x3d   : > { %244 = vst.msk [vmem:[#allocation2 + $0x40] sm:$0x3] %vm237_vm1, %v7605_v0  ;;  %247 = vst.msk [vmem:[#allocation2 + $0x58] sm:$0x3] %vm237_vm1, %v7605_v0 }
  0x3e   : > { %250 = vst.msk [vmem:[#allocation2 + $0x70] sm:$0x3] %vm237_vm1, %v7605_v0  ;;  %253 = vst.msk [vmem:[#allocation2 + $0x88] sm:$0x3] %vm237_vm1, %v7605_v0 }
  0x3f   : > { %256 = vst.msk [vmem:[#allocation2 + $0xa0] sm:$0x3] %vm237_vm1, %v7605_v0  ;;  %259 = vst.msk [vmem:[#allocation2 + $0xb8] sm:$0x3] %vm237_vm1, %v7605_v0 }
  0x40   : > { %262 = vst.msk [vmem:[#allocation2 + $0xd0] sm:$0x3] %vm237_vm1, %v7605_v0  ;;  %265 = vst.msk [vmem:[#allocation2 + $0xe8] sm:$0x3] %vm237_vm1, %v7605_v0 }
  0x41   : > { %268 = vst.msk [vmem:[#allocation2 + $0x100] sm:$0x3] %vm237_vm1, %v7605_v0  ;;  %271 = vst.msk [vmem:[#allocation2 + $0x118] sm:$0x3] %vm237_vm1, %v7605_v0 }
  0x42   : > { %274 = vst.msk [vmem:[#allocation2 + $0x130] sm:$0x3] %vm237_vm1, %v7605_v0  ;;  %277 = vst.msk [vmem:[#allocation2 + $0x148] sm:$0x3] %vm237_vm1, %v7605_v0 }
  0x43   : > { %280 = vst.msk [vmem:[#allocation2 + $0x160] sm:$0x3] %vm237_vm1, %v7605_v0  ;;  %283 = vst.msk [vmem:[#allocation2 + $0x178] sm:$0x3] %vm237_vm1, %v7605_v0 }
  0x44   : > { %286 = vst.msk [vmem:[#allocation2 + $0x190] sm:$0x3] %vm237_vm1, %v7605_v0  ;;  %289 = vst.msk [vmem:[#allocation2 + $0x1a8] sm:$0x3] %vm237_vm1, %v7605_v0 }
  0x45   : > { %292 = vst.msk [vmem:[#allocation2 + $0x1c0] sm:$0x3] %vm237_vm1, %v7605_v0  ;;  %295 = vst.msk [vmem:[#allocation2 + $0x1d8] sm:$0x3] %vm237_vm1, %v7605_v0 }
  0x46   : > { %298 = vst.msk [vmem:[#allocation2 + $0x1f0] sm:$0x3] %vm237_vm1, %v7605_v0  ;;  %301 = vst.msk [vmem:[#allocation2 + $0x208] sm:$0x3] %vm237_vm1, %v7605_v0 }
  0x47   : > { %304 = vst.msk [vmem:[#allocation2 + $0x220] sm:$0x3] %vm237_vm1, %v7605_v0  ;;  %307 = vst.msk [vmem:[#allocation2 + $0x238] sm:$0x3] %vm237_vm1, %v7605_v0 }
  0x48   : > { %310 = vst.msk [vmem:[#allocation2 + $0x250] sm:$0x3] %vm237_vm1, %v7605_v0  ;;  %313 = vst.msk [vmem:[#allocation2 + $0x268] sm:$0x3] %vm237_vm1, %v7605_v0 }
  0x49 PF: > { %v5529_v1 = vld [vmem:[%s9555_s1 + $0x2] sm:$0x3]  ;;  %vm681_vm2 = vcmask 1041408   ;;  %v7883_v2 = vld [vmem:[%s9555_s1 + $0x8] sm:$0x3]  ;;  %vm413_vm3 = vcmask 31744   ;;  %s4418_s12 = scvt.s32.f32 %s7587_s18 }
  0x4a   : > { %7224 = vmatprep.subr.msk.bf16.mxu1 %vm681_vm2, %v5529_v1  ;;  %7228 = vmatprep.subr.msk.bf16.mxu0 %vm681_vm2, %v7883_v2  ;;  %v683_v3 = vsel %vm681_vm2, %v5529_v1, 0  ;;  %v7891_v4 = vsel %vm681_vm2, %v7883_v2, 0  ;;  %v535_v5 = vld [vmem:[#allocation2 + $0x1] sm:$0xff]  ;;  %v536_v6 = vld [vmem:[#allocation2 + $0x9] sm:$0xff]  ;;  %v6119_v17 = vld [vmem:[%s7713_s23 + $0x18] sm:$0xff]   ;;  %s4165_s14 = smul.u32 384, %s7587_s18 }
  0x4b   : > { %v5902_v7 = vld [vmem:[%s7713_s23] sm:$0xff]   ;;  %6389 = vmatpush3.bf16.msra.mxu1 %v683_v3  ;;  %6589 = vmatpush3.bf16.msra.mxu0 %v7891_v4  ;;  %v583_v8 = vpack.c.bf16 %v536_v6, %v535_v5  ;;  %v7901_v12 = vld [vmem:[%s9555_s1 + $0xa] sm:$0x3]  ;;  %v6118_v16 = vld [vmem:[%s7713_s23 + $0x10] sm:$0xff]   ;;  %v5915_v21 = vunpack.c.l.bf16 %v6119_v17  ;;  %v5916_v22 = vunpack.c.h.bf16 %v6119_v17  ;;  %s4421_s13 = sadd.f32 1.0, %s4418_s12  ;;  %s4432_s30 = smul.f32 384.0, %s4418_s12 }
  0x4c   : > { %v5903_v9 = vunpack.c.l.bf16 %v5902_v7  ;;  %v5904_v10 = vunpack.c.h.bf16 %v5902_v7  ;;  %v534_v11 = vld [vmem:[%s9555_s1] sm:$0x3]  ;;  %v6117_v13 = vld [vmem:[%s7713_s23 + $0x8] sm:$0xff]   ;;  %7230 = vmatprep.subr.msk.bf16.mxu0 %vm681_vm2, %v7901_v12  ;;  %v5911_v19 = vunpack.c.l.bf16 %v6118_v16  ;;  %v5912_v20 = vunpack.c.h.bf16 %v6118_v16  ;;  %v6122_v24 = vld [vmem:[%s7713_s23 + $0x30] sm:$0xff]   ;;  %s8530_s27 = scalar_lea.vmem [#allocation3], %s4165_s14 }
  0x4d   : > { %7225 = vmatprep.subr.msk.bf16.mxu1 %vm681_vm2, %v534_v11  ;;  %v5907_v14 = vunpack.c.l.bf16 %v6117_v13  ;;  %v5908_v15 = vunpack.c.h.bf16 %v6117_v13  ;;  %v6120_v18 = vld [vmem:[%s7713_s23 + $0x20] sm:$0xff]   ;;  %6390 = vmatprep.mubr.msk.bf16.mxu1 %vm413_vm3, %v583_v8  ;;  %v6121_v23 = vld [vmem:[%s7713_s23 + $0x28] sm:$0xff]   ;;  %v6123_v25 = vld [vmem:[%s7713_s23 + $0x38] sm:$0xff]   ;;  %420 = vst.msk [vmem:[#allocation2 + $0x61] sm:$0xff] %vm413_vm3, %v5915_v21  ;;  %v5927_v33 = vunpack.c.l.bf16 %v6122_v24  ;;  %v5928_v34 = vunpack.c.h.bf16 %v6122_v24 }
  0x4e   : > { %414 = vst.msk [vmem:[#allocation2 + $0x19] sm:$0xff] %vm413_vm3, %v5903_v9  ;;  %415 = vst.msk [vmem:[#allocation2 + $0x21] sm:$0xff] %vm413_vm3, %v5904_v10  ;;  %v5919_v26 = vunpack.c.l.bf16 %v6120_v18  ;;  %v5920_v27 = vunpack.c.h.bf16 %v6120_v18  ;;  %v5923_v28 = vunpack.c.l.bf16 %v6121_v23  ;;  %v5924_v29 = vunpack.c.h.bf16 %v6121_v23  ;;  %v6124_v30 = vld [vmem:[%s7713_s23 + $0x40] sm:$0xff]   ;;  %v6125_v31 = vld [vmem:[%s7713_s23 + $0x48] sm:$0xff]  }
  0x4f   : > { %416 = vst.msk [vmem:[#allocation2 + $0x31] sm:$0xff] %vm413_vm3, %v5907_v14  ;;  %417 = vst.msk [vmem:[#allocation2 + $0x39] sm:$0xff] %vm413_vm3, %v5908_v15  ;;  %v6126_v32 = vld [vmem:[%s7713_s23 + $0x50] sm:$0xff]   ;;  %v5931_v35 = vunpack.c.l.bf16 %v6123_v25  ;;  %v5932_v36 = vunpack.c.h.bf16 %v6123_v25  ;;  %v6127_v37 = vld [vmem:[%s7713_s23 + $0x58] sm:$0xff]   ;;  %v5935_v39 = vunpack.c.l.bf16 %v6124_v30  ;;  %v5936_v40 = vunpack.c.h.bf16 %v6124_v30 }
  0x50   : > { %418 = vst.msk [vmem:[#allocation2 + $0x49] sm:$0xff] %vm413_vm3, %v5911_v19  ;;  %419 = vst.msk [vmem:[#allocation2 + $0x51] sm:$0xff] %vm413_vm3, %v5912_v20  ;;  %v6128_v38 = vld [vmem:[%s7713_s23 + $0x60] sm:$0xff]   ;;  %v5939_v41 = vunpack.c.l.bf16 %v6125_v31  ;;  %v5940_v42 = vunpack.c.h.bf16 %v6125_v31  ;;  %v6129_v43 = vld [vmem:[%s7713_s23 + $0x68] sm:$0xff]   ;;  %v5943_v46 = vunpack.c.l.bf16 %v6126_v32  ;;  %v5944_v47 = vunpack.c.h.bf16 %v6126_v32 }
  0x51   : > { %421 = vst.msk [vmem:[#allocation2 + $0x69] sm:$0xff] %vm413_vm3, %v5916_v22  ;;  %422 = vst.msk [vmem:[#allocation2 + $0x79] sm:$0xff] %vm413_vm3, %v5919_v26  ;;  %v6130_v44 = vld [vmem:[%s7713_s23 + $0x70] sm:$0xff]   ;;  %v6131_v45 = vld [vmem:[%s7713_s23 + $0x78] sm:$0xff]   ;;  %v5947_v48 = vunpack.c.l.bf16 %v6127_v37  ;;  %v5948_v49 = vunpack.c.h.bf16 %v6127_v37  ;;  %v983_v52 = vsel %vm681_vm2, %v534_v11, 0  ;;  %v5951_v53 = vunpack.c.l.bf16 %v6128_v38 }
  0x52   : > { %423 = vst.msk [vmem:[#allocation2 + $0x81] sm:$0xff] %vm413_vm3, %v5920_v27  ;;  %424 = vst.msk [vmem:[#allocation2 + $0x91] sm:$0xff] %vm413_vm3, %v5923_v28  ;;  %v6132_v50 = vld [vmem:[%s7713_s23 + $0x80] sm:$0xff]   ;;  %v6133_v51 = vld [vmem:[%s7713_s23 + $0x88] sm:$0xff]   ;;  %v5952_v54 = vunpack.c.h.bf16 %v6128_v38  ;;  %v5955_v55 = vunpack.c.l.bf16 %v6129_v43  ;;  %v5956_v57 = vunpack.c.h.bf16 %v6129_v43  ;;  %v5959_v58 = vunpack.c.l.bf16 %v6130_v44 }
  0x53   : > { %425 = vst.msk [vmem:[#allocation2 + $0x99] sm:$0xff] %vm413_vm3, %v5924_v29  ;;  %426 = vst.msk [vmem:[#allocation2 + $0xa9] sm:$0xff] %vm413_vm3, %v5927_v33  ;;  %v6134_v56 = vld [vmem:[%s7713_s23 + $0x90] sm:$0xff]   ;;  %v5960_v59 = vunpack.c.h.bf16 %v6130_v44  ;;  %v5963_v60 = vunpack.c.l.bf16 %v6131_v45  ;;  %v6135_v61 = vld [vmem:[%s7713_s23 + $0x98] sm:$0xff]   ;;  %v5964_v1 = vunpack.c.h.bf16 %v6131_v45  ;;  %v5967_v3 = vunpack.c.l.bf16 %v6132_v50 }
  0x54   : > { %427 = vst.msk [vmem:[#allocation2 + $0xb1] sm:$0xff] %vm413_vm3, %v5928_v34  ;;  %428 = vst.msk [vmem:[#allocation2 + $0xc1] sm:$0xff] %vm413_vm3, %v5931_v35  ;;  %v6136_v62 = vld [vmem:[%s7713_s23 + $0xa0] sm:$0xff]   ;;  %v5968_v5 = vunpack.c.h.bf16 %v6132_v50  ;;  %v5971_v6 = vunpack.c.l.bf16 %v6133_v51  ;;  %v6137_v7 = vld [vmem:[%s7713_s23 + $0xa8] sm:$0xff]   ;;  %v5972_v11 = vunpack.c.h.bf16 %v6133_v51  ;;  %v5975_v13 = vunpack.c.l.bf16 %v6134_v56 }
  0x55   : > { %429 = vst.msk [vmem:[#allocation2 + $0xc9] sm:$0xff] %vm413_vm3, %v5932_v36  ;;  %430 = vst.msk [vmem:[#allocation2 + $0xd9] sm:$0xff] %vm413_vm3, %v5935_v39  ;;  %v537_v63 = vld [vmem:[#allocation2 + $0x19] sm:$0xff]  ;;  %v538_v0 = vld [vmem:[#allocation2 + $0x21] sm:$0xff]  ;;  %v5976_v14 = vunpack.c.h.bf16 %v6134_v56  ;;  %v2623_v17 = vsel %vm681_vm2, %v7901_v12, 0  ;;  %v5979_v20 = vunpack.c.l.bf16 %v6135_v61  ;;  %v5980_v21 = vunpack.c.h.bf16 %v6135_v61 }
  0x56   : > { %431 = vst.msk [vmem:[#allocation2 + $0xe1] sm:$0xff] %vm413_vm3, %v5936_v40  ;;  %432 = vst.msk [vmem:[#allocation2 + $0xf1] sm:$0xff] %vm413_vm3, %v5939_v41  ;;  %v584_v8 = vpack.c.bf16 %v538_v0, %v537_v63  ;;  %v2056_v9 = vld [vmem:[#allocation2 + $0x31] sm:$0xff]  ;;  %v2057_v10 = vld [vmem:[#allocation2 + $0x39] sm:$0xff]  ;;  %v5983_v23 = vunpack.c.l.bf16 %v6136_v62  ;;  %v5984_v24 = vunpack.c.h.bf16 %v6136_v62  ;;  %v5987_v25 = vunpack.c.l.bf16 %v6137_v7 }
  0x57   : > { %433 = vst.msk [vmem:[#allocation2 + $0xf9] sm:$0xff] %vm413_vm3, %v5940_v42  ;;  %434 = vst.msk [vmem:[#allocation2 + $0x109] sm:$0xff] %vm413_vm3, %v5943_v46  ;;  %v6138_v15 = vld [vmem:[%s7713_s23 + $0xb0] sm:$0xff]   ;;  %v2103_v16 = vpack.c.bf16 %v2057_v10, %v2056_v9  ;;  %v7972_v12 = vld [vmem:[%s9555_s1 + $0xc] sm:$0x3]  ;;  %v5988_v26 = vunpack.c.h.bf16 %v6137_v7 }
  0x58   : > { %435 = vst.msk [vmem:[#allocation2 + $0x111] sm:$0xff] %vm413_vm3, %v5944_v47  ;;  %436 = vst.msk [vmem:[#allocation2 + $0x121] sm:$0xff] %vm413_vm3, %v5947_v48  ;;  %v541_v18 = vld [vmem:[#allocation2 + $0x49] sm:$0xff]  ;;  %v542_v19 = vld [vmem:[#allocation2 + $0x51] sm:$0xff]  ;;  %6391 = vmatmul.mubr.msk.bf16.vlgmr.msra.gmra.mrb[0].mxu1 %vm413_vm3, %v584_v8  ;;  %6590 = vmatprep.mubr.msk.bf16.mxu0 %vm413_vm3, %v584_v8  ;;  %v5991_v27 = vunpack.c.l.bf16 %v6138_v15  ;;  %v5992_v30 = vunpack.c.h.bf16 %v6138_v15 }
  0x59   : > { %437 = vst.msk [vmem:[#allocation2 + $0x129] sm:$0xff] %vm413_vm3, %v5948_v49  ;;  %438 = vst.msk [vmem:[#allocation2 + $0x139] sm:$0xff] %vm413_vm3, %v5951_v53  ;;  %v586_v22 = vpack.c.bf16 %v542_v19, %v541_v18  ;;  %6439 = vmatpush3.bf16.msra.mxu1 %v983_v52  ;;  %6591 = vmatmul.mubr.msk.bf16.vlgmr.msra.gmra.mrb[0].mxu0 %vm413_vm3, %v2103_v16  ;;  %v2060_v28 = vld [vmem:[#allocation2 + $0x61] sm:$0xff]  ;;  %v2061_v29 = vld [vmem:[#allocation2 + $0x69] sm:$0xff] }
  0x5a   : > { %439 = vst.msk [vmem:[#allocation2 + $0x141] sm:$0xff] %vm413_vm3, %v5952_v54  ;;  %440 = vst.msk [vmem:[#allocation2 + $0x151] sm:$0xff] %vm413_vm3, %v5955_v55  ;;  %6639 = vmatpush3.bf16.msra.mxu0 %v2623_v17  ;;  %6394 = vmatprep.mubr.msk.bf16.mxu1 %vm413_vm3, %v2103_v16  ;;  %v545_v31 = vld [vmem:[#allocation2 + $0x79] sm:$0xff]  ;;  %v546_v32 = vld [vmem:[#allocation2 + $0x81] sm:$0xff]  ;;  %v2105_v33 = vpack.c.bf16 %v2061_v29, %v2060_v28 }
  0x5b   : > { %441 = vst.msk [vmem:[#allocation2 + $0x159] sm:$0xff] %vm413_vm3, %v5956_v57  ;;  %442 = vst.msk [vmem:[#allocation2 + $0x169] sm:$0xff] %vm413_vm3, %v5959_v58  ;;  %6594 = vmatprep.mubr.msk.bf16.mxu0 %vm413_vm3, %v586_v22  ;;  %7231 = vmatprep.subr.msk.bf16.mxu0 %vm681_vm2, %v7972_v12  ;;  %v588_v34 = vpack.c.bf16 %v546_v32, %v545_v31  ;;  %v2064_v35 = vld [vmem:[#allocation2 + $0x91] sm:$0xff]  ;;  %v2065_v36 = vld [vmem:[#allocation2 + $0x99] sm:$0xff] }
  0x5c   : > { %443 = vst.msk [vmem:[#allocation2 + $0x171] sm:$0xff] %vm413_vm3, %v5960_v59  ;;  %444 = vst.msk [vmem:[#allocation2 + $0x181] sm:$0xff] %vm413_vm3, %v5963_v60  ;;  %v549_v37 = vld [vmem:[#allocation2 + $0xa9] sm:$0xff]  ;;  %v550_v38 = vld [vmem:[#allocation2 + $0xb1] sm:$0xff]  ;;  %v2107_v39 = vpack.c.bf16 %v2065_v36, %v2064_v35 }
  0x5d   : > { %445 = vst.msk [vmem:[#allocation2 + $0x189] sm:$0xff] %vm413_vm3, %v5964_v1  ;;  %446 = vst.msk [vmem:[#allocation2 + $0x199] sm:$0xff] %vm413_vm3, %v5967_v3  ;;  %v590_v40 = vpack.c.bf16 %v550_v38, %v549_v37  ;;  %v2068_v41 = vld [vmem:[#allocation2 + $0xc1] sm:$0xff]  ;;  %v2069_v42 = vld [vmem:[#allocation2 + $0xc9] sm:$0xff] }
  0x5e   : > { %447 = vst.msk [vmem:[#allocation2 + $0x1a1] sm:$0xff] %vm413_vm3, %v5968_v5  ;;  %448 = vst.msk [vmem:[#allocation2 + $0x1b1] sm:$0xff] %vm413_vm3, %v5971_v6  ;;  %v553_v43 = vld [vmem:[#allocation2 + $0xd9] sm:$0xff]  ;;  %v554_v44 = vld [vmem:[#allocation2 + $0xe1] sm:$0xff]  ;;  %v2109_v45 = vpack.c.bf16 %v2069_v42, %v2068_v41 }
  0x5f   : > { %449 = vst.msk [vmem:[#allocation2 + $0x1b9] sm:$0xff] %vm413_vm3, %v5972_v11  ;;  %450 = vst.msk [vmem:[#allocation2 + $0x1c9] sm:$0xff] %vm413_vm3, %v5975_v13  ;;  %v8001_v46 = vld [vmem:[%s9555_s1 + $0x4] sm:$0x3]  ;;  %v592_v47 = vpack.c.bf16 %v554_v44, %v553_v43  ;;  %v2072_v48 = vld [vmem:[#allocation2 + $0xf1] sm:$0xff] }
  0x60   : > { %451 = vst.msk [vmem:[#allocation2 + $0x1d1] sm:$0xff] %vm413_vm3, %v5976_v14  ;;  %452 = vst.msk [vmem:[#allocation2 + $0x1e1] sm:$0xff] %vm413_vm3, %v5979_v20  ;;  %6395 = vmatmul.mubr.msk.bf16.gmra.mrb[4].mxu1 %vm413_vm3, %v586_v22  ;;  %7226 = vmatprep.subr.msk.bf16.mxu1 %vm681_vm2, %v8001_v46  ;;  %v2073_v49 = vld [vmem:[#allocation2 + $0xf9] sm:$0xff]  ;;  %v557_v50 = vld [vmem:[#allocation2 + $0x109] sm:$0xff]  ;;  %v3046_v14 = vsel %vm681_vm2, %v7972_v12, 0 }
  0x61   : > { %453 = vst.msk [vmem:[#allocation2 + $0x1e9] sm:$0xff] %vm413_vm3, %v5980_v21  ;;  %454 = vst.msk [vmem:[#allocation2 + $0x1f9] sm:$0xff] %vm413_vm3, %v5983_v23  ;;  %6595 = vmatmul.mubr.msk.bf16.gmra.mrb[4].mxu0 %vm413_vm3, %v2105_v33  ;;  %6398 = vmatprep.mubr.msk.bf16.mxu1 %vm413_vm3, %v2105_v33  ;;  %v558_v51 = vld [vmem:[#allocation2 + $0x111] sm:$0xff]  ;;  %v2111_v52 = vpack.c.bf16 %v2073_v49, %v2072_v48  ;;  %v2076_v54 = vld [vmem:[#allocation2 + $0x121] sm:$0xff] }
  0x62   : > { %455 = vst.msk [vmem:[#allocation2 + $0x201] sm:$0xff] %vm413_vm3, %v5984_v24  ;;  %456 = vst.msk [vmem:[#allocation2 + $0x211] sm:$0xff] %vm413_vm3, %v5987_v25  ;;  %6598 = vmatprep.mubr.msk.bf16.mxu0 %vm413_vm3, %v588_v34  ;;  %v594_v53 = vpack.c.bf16 %v558_v51, %v557_v50  ;;  %v2077_v55 = vld [vmem:[#allocation2 + $0x129] sm:$0xff]  ;;  %v2476_v56 = vld [vmem:[#allocation2 + $0x1a] sm:$0xff] }
  0x63   : > { %457 = vst.msk [vmem:[#allocation2 + $0x219] sm:$0xff] %vm413_vm3, %v5988_v26  ;;  %458 = vst.msk [vmem:[#allocation2 + $0x229] sm:$0xff] %vm413_vm3, %v5991_v27  ;;  %v2477_v57 = vld [vmem:[#allocation2 + $0x22] sm:$0xff]  ;;  %v6139_v58 = vld [vmem:[%s7713_s23 + $0xb8] sm:$0xff]   ;;  %v2113_v61 = vpack.c.bf16 %v2077_v55, %v2076_v54 }
  0x64   : > { %459 = vst.msk [vmem:[#allocation2 + $0x231] sm:$0xff] %vm413_vm3, %v5992_v30  ;;  %v5995_v59 = vunpack.c.l.bf16 %v6139_v58  ;;  %v5996_v60 = vunpack.c.h.bf16 %v6139_v58  ;;  %v8014_v62 = vpack.c.bf16 %v2477_v57, %v2476_v56  ;;  %v561_v63 = vld [vmem:[#allocation2 + $0x139] sm:$0xff]  ;;  %v562_v0 = vld [vmem:[#allocation2 + $0x141] sm:$0xff]  ;;  %v563_v5 = vld [vmem:[#allocation2 + $0x151] sm:$0xff] }
  0x65   : > { %v2478_v1 = vld [vmem:[#allocation2 + $0x32] sm:$0xff]  ;;  %v2479_v3 = vld [vmem:[#allocation2 + $0x3a] sm:$0xff]  ;;  %v2480_v7 = vld [vmem:[#allocation2 + $0x4a] sm:$0xff]  ;;  %v596_v9 = vpack.c.bf16 %v562_v0, %v561_v63 }
  0x66   : > { %460 = vst.msk [vmem:[#allocation2 + $0x241] sm:$0xff] %vm413_vm3, %v5995_v59  ;;  %461 = vst.msk [vmem:[#allocation2 + $0x249] sm:$0xff] %vm413_vm3, %v5996_v60  ;;  %v564_v6 = vld [vmem:[#allocation2 + $0x159] sm:$0xff]  ;;  %v8023_v10 = vpack.c.bf16 %v2479_v3, %v2478_v1  ;;  %v8033_v15 = vld [vmem:[%s9555_s1 + $0xe] sm:$0x3] }
  0x67   : > { %v2481_v8 = vld [vmem:[#allocation2 + $0x52] sm:$0xff]  ;;  %v597_v11 = vpack.c.bf16 %v564_v6, %v563_v5  ;;  %v565_v16 = vld [vmem:[#allocation2 + $0x169] sm:$0xff]  ;;  %v567_v20 = vld [vmem:[#allocation2 + $0x181] sm:$0xff] }
  0x68   : > { %6399 = vmatmul.mubr.msk.bf16.gmra.mrb[8].mxu1 %vm413_vm3, %v588_v34  ;;  %v8025_v13 = vpack.c.bf16 %v2481_v8, %v2480_v7  ;;  %v566_v17 = vld [vmem:[#allocation2 + $0x171] sm:$0xff]  ;;  %v2482_v18 = vld [vmem:[#allocation2 + $0x62] sm:$0xff]  ;;  %v2484_v22 = vld [vmem:[#allocation2 + $0x7a] sm:$0xff] }
  0x69   : > { %6599 = vmatmul.mubr.msk.bf16.gmra.mrb[8].mxu0 %vm413_vm3, %v2107_v39  ;;  %6402 = vmatprep.mubr.msk.bf16.mxu1 %vm413_vm3, %v2107_v39  ;;  %v2483_v19 = vld [vmem:[#allocation2 + $0x6a] sm:$0xff]  ;;  %v2485_v12 = vld [vmem:[#allocation2 + $0x82] sm:$0xff]  ;;  %v598_v23 = vpack.c.bf16 %v566_v17, %v565_v16  ;;  %v569_v27 = vld [vmem:[#allocation2 + $0x199] sm:$0xff] }
  0x6a   : > { %6602 = vmatprep.mubr.msk.bf16.mxu0 %vm413_vm3, %v590_v40  ;;  %v568_v21 = vld [vmem:[#allocation2 + $0x189] sm:$0xff]  ;;  %v8042_v24 = vpack.c.bf16 %v2483_v19, %v2482_v18  ;;  %v8044_v26 = vpack.c.bf16 %v2485_v12, %v2484_v22  ;;  %v570_v28 = vld [vmem:[#allocation2 + $0x1a1] sm:$0xff]  ;;  %v2486_v29 = vld [vmem:[#allocation2 + $0x92] sm:$0xff] }
  0x6b   : > { %v599_v25 = vpack.c.bf16 %v568_v21, %v567_v20  ;;  %v2487_v30 = vld [vmem:[#allocation2 + $0x9a] sm:$0xff]  ;;  %v571_v31 = vld [vmem:[#allocation2 + $0x1b1] sm:$0xff]  ;;  %v600_v35 = vpack.c.bf16 %v570_v28, %v569_v27  ;;  %v573_v39 = vld [vmem:[#allocation2 + $0x1c9] sm:$0xff] }
  0x6c   : > { %v572_v32 = vld [vmem:[#allocation2 + $0x1b9] sm:$0xff]  ;;  %v2488_v33 = vld [vmem:[#allocation2 + $0xaa] sm:$0xff]  ;;  %v8052_v36 = vpack.c.bf16 %v2487_v30, %v2486_v29  ;;  %v2490_v41 = vld [vmem:[#allocation2 + $0xc2] sm:$0xff]  ;;  %v1357_v30 = vsel %vm681_vm2, %v8001_v46, 0 }
  0x6d   : > { %v2489_v34 = vld [vmem:[#allocation2 + $0xb2] sm:$0xff]  ;;  %v601_v37 = vpack.c.bf16 %v572_v32, %v571_v31  ;;  %v2491_v42 = vld [vmem:[#allocation2 + $0xca] sm:$0xff]  ;;  %v575_v43 = vld [vmem:[#allocation2 + $0x1e1] sm:$0xff] }
  0x6e   : > { %v8054_v38 = vpack.c.bf16 %v2489_v34, %v2488_v33  ;;  %v576_v44 = vld [vmem:[#allocation2 + $0x1e9] sm:$0xff]  ;;  %v8062_v49 = vpack.c.bf16 %v2491_v42, %v2490_v41  ;;  %v2494_v54 = vld [vmem:[#allocation2 + $0xf2] sm:$0xff]  ;;  %v2495_v55 = vld [vmem:[#allocation2 + $0xfa] sm:$0xff] }
  0x6f   : > { %v8064_v50 = vpack.c.bf16 %v576_v44, %v575_v43  ;;  %v579_v56 = vld [vmem:[#allocation2 + $0x211] sm:$0xff]  ;;  %v580_v57 = vld [vmem:[#allocation2 + $0x219] sm:$0xff]  ;;  %v581_v1 = vld [vmem:[#allocation2 + $0x229] sm:$0xff] }
  0x70   : > { %6403 = vmatmul.mubr.msk.bf16.gmra.mrb[12].mxu1 %vm413_vm3, %v590_v40  ;;  %v574_v40 = vld [vmem:[#allocation2 + $0x1d1] sm:$0xff]  ;;  %v8079_v63 = vpack.c.bf16 %v580_v57, %v579_v56  ;;  %v462_v5 = vld [vmem:[#allocation2] sm:$0xff]  ;;  %v463_v8 = vld [vmem:[#allocation2 + $0x8] sm:$0xff] }
  0x71   : > { %6603 = vmatmul.mubr.msk.bf16.gmra.mrb[12].mxu0 %vm413_vm3, %v2109_v45  ;;  %6406 = vmatprep.mubr.msk.bf16.mxu1 %vm413_vm3, %v2109_v45  ;;  %v2492_v45 = vld [vmem:[#allocation2 + $0xda] sm:$0xff]  ;;  %v602_v48 = vpack.c.bf16 %v574_v40, %v573_v39  ;;  %v2496_v58 = vld [vmem:[#allocation2 + $0x10a] sm:$0xff]  ;;  %v2497_v59 = vld [vmem:[#allocation2 + $0x112] sm:$0xff]  ;;  %v510_v17 = vpack.c.bf16 %v463_v8, %v462_v5 }
  0x72   : > { %6606 = vmatprep.mubr.msk.bf16.mxu0 %vm413_vm3, %v592_v47  ;;  %v8081_v0 = vpack.c.bf16 %v2497_v59, %v2496_v58  ;;  %v582_v3 = vld [vmem:[#allocation2 + $0x231] sm:$0xff]  ;;  %v2498_v6 = vld [vmem:[#allocation2 + $0x122] sm:$0xff]  ;;  %v2503_v22 = vld [vmem:[#allocation2 + $0x15a] sm:$0xff] }
  0x73   : > { %v2499_v7 = vld [vmem:[#allocation2 + $0x12a] sm:$0xff]  ;;  %v464_v19 = vld [vmem:[#allocation2 + $0x18] sm:$0xff]  ;;  %v465_v20 = vld [vmem:[#allocation2 + $0x20] sm:$0xff] }
  0x74   : > { %v8093_v16 = vpack.c.bf16 %v2499_v7, %v2498_v6  ;;  %v2502_v21 = vld [vmem:[#allocation2 + $0x152] sm:$0xff]  ;;  %v8104_v28 = vpack.c.bf16 %v465_v20, %v464_v19  ;;  %v8119_v33 = vld [vmem:[%s9555_s1 + $0x6] sm:$0x3]  ;;  %v468_v34 = vld [vmem:[#allocation2 + $0x48] sm:$0xff] }
  0x75   : > { %v466_v12 = vld [vmem:[#allocation2 + $0x30] sm:$0xff]  ;;  %v8106_v29 = vpack.c.bf16 %v2503_v22, %v2502_v21  ;;  %v470_v39 = vld [vmem:[#allocation2 + $0x60] sm:$0xff]  ;;  %v471_v40 = vld [vmem:[#allocation2 + $0x68] sm:$0xff] }
  0x76   : > { %v2505_v27 = vld [vmem:[#allocation2 + $0x172] sm:$0xff]  ;;  %v2507_v46 = vld [vmem:[#allocation2 + $0x18a] sm:$0xff]  ;;  %v2508_v41 = vld [vmem:[#allocation2 + $0x19a] sm:$0xff] }
  0x77   : > { %v2509_v42 = vld [vmem:[#allocation2 + $0x1a2] sm:$0xff]  ;;  %v475_v56 = vld [vmem:[#allocation2 + $0x98] sm:$0xff]  ;;  %v2512_v57 = vld [vmem:[#allocation2 + $0x1ca] sm:$0xff] }
  0x78   : > { %6407 = vmatmul.mubr.msk.bf16.gmra.mrb[16].mxu1 %vm413_vm3, %v592_v47  ;;  %v2493_v47 = vld [vmem:[#allocation2 + $0xe2] sm:$0xff]  ;;  %v2513_v58 = vld [vmem:[#allocation2 + $0x1d2] sm:$0xff]  ;;  %v2516_v19 = vld [vmem:[#allocation2 + $0x1fa] sm:$0xff] }
  0x79   : > { %6607 = vmatmul.mubr.msk.bf16.gmra.mrb[16].mxu0 %vm413_vm3, %v2111_v52  ;;  %6410 = vmatprep.mubr.msk.bf16.mxu1 %vm413_vm3, %v2111_v52  ;;  %v8066_v51 = vpack.c.bf16 %v2493_v47, %v2492_v45  ;;  %v577_v52 = vld [vmem:[#allocation2 + $0x1f9] sm:$0xff]  ;;  %v8133_v45 = vpack.c.bf16 %v471_v40, %v470_v39  ;;  %v8135_v47 = vpack.c.bf16 %v2509_v42, %v2508_v41  ;;  %v476_v6 = vld [vmem:[#allocation2 + $0xa8] sm:$0xff]  ;;  %v477_v7 = vld [vmem:[#allocation2 + $0xb0] sm:$0xff] }
  0x7a   : > { %6610 = vmatprep.mubr.msk.bf16.mxu0 %vm413_vm3, %v594_v53  ;;  %v8151_v5 = vpack.c.bf16 %v2513_v58, %v2512_v57  ;;  %v2514_v8 = vld [vmem:[#allocation2 + $0x1e2] sm:$0xff]  ;;  %v8161_v21 = vpack.c.bf16 %v477_v7, %v476_v6  ;;  %v2521_v39 = vld [vmem:[#allocation2 + $0x232] sm:$0xff] }
  0x7b   : > { %v2517_v20 = vld [vmem:[#allocation2 + $0x202] sm:$0xff] }
  0x7c   : > { %v487_v57 = vld [vmem:[#allocation2 + $0x128] sm:$0xff] }
  0x80   : > { %6411 = vmatmul.mubr.msk.bf16.gmra.mrb[20].mxu1 %vm413_vm3, %v594_v53  ;;  %v578_v53 = vld [vmem:[#allocation2 + $0x201] sm:$0xff] }
  0x81   : > { %6611 = vmatmul.mubr.msk.bf16.gmra.mrb[20].mxu0 %vm413_vm3, %v2113_v61  ;;  %6414 = vmatprep.mubr.msk.bf16.mxu1 %vm413_vm3, %v2113_v61  ;;  %v8075_v60 = vpack.c.bf16 %v578_v53, %v577_v52  ;;  %v8077_v61 = vpack.c.bf16 %v2495_v55, %v2494_v54  ;;  %v473_v52 = vld [vmem:[#allocation2 + $0x80] sm:$0xff]  ;;  %v2510_v53 = vld [vmem:[#allocation2 + $0x1b2] sm:$0xff] }
  0x82   : > { %6640 = vmatprep.mubr.msk.bf16.mxu0 %vm413_vm3, %v8014_v62  ;;  %v2511_v54 = vld [vmem:[#allocation2 + $0x1ba] sm:$0xff]  ;;  %v474_v55 = vld [vmem:[#allocation2 + $0x90] sm:$0xff] }
  0x88   : > { %6415 = vmatmul.mubr.msk.bf16.gmra.mrb[24].mxu1 %vm413_vm3, %v596_v9  ;;  %v2500_v9 = vld [vmem:[#allocation2 + $0x13a] sm:$0xff] }
  0x89   : > { %6641 = vmatmul.mubr.msk.bf16.vlgmr.msra.gmra.mrb[0].mxu0 %vm413_vm3, %v8023_v10  ;;  %6418 = vmatprep.mubr.msk.bf16.mxu1 %vm413_vm3, %v597_v11  ;;  %v2501_v11 = vld [vmem:[#allocation2 + $0x142] sm:$0xff] }
  0x8a   : > { %6689 = vmatpush3.bf16.msra.mxu0 %v3046_v14  ;;  %6644 = vmatprep.mubr.msk.bf16.mxu0 %vm413_vm3, %v8025_v13  ;;  %v8091_v14 = vpack.c.bf16 %v582_v3, %v581_v1  ;;  %v8095_v18 = vpack.c.bf16 %v2501_v11, %v2500_v9  ;;  %v8147_v1 = vpack.c.bf16 %v2511_v54, %v2510_v53  ;;  %v2515_v9 = vld [vmem:[#allocation2 + $0x1ea] sm:$0xff]  ;;  %v478_v11 = vld [vmem:[#allocation2 + $0xc0] sm:$0xff] }
  0x8b   : > { %7232 = vmatprep.subr.msk.bf16.mxu0 %vm681_vm2, %v8033_v15  ;;  %v8149_v3 = vpack.c.bf16 %v475_v56, %v474_v55  ;;  %v8163_v22 = vpack.c.bf16 %v2515_v9, %v2514_v8  ;;  %v485_v53 = vld [vmem:[#allocation2 + $0x110] sm:$0xff]  ;;  %v486_v54 = vld [vmem:[#allocation2 + $0x120] sm:$0xff]  ;;  %v488_v8 = vld [vmem:[#allocation2 + $0x138] sm:$0xff] }
  0x8c   : > { %v2522_v55 = vld [vmem:[#allocation2 + $0x242] sm:$0xff]  ;;  %v2523_v56 = vld [vmem:[#allocation2 + $0x24a] sm:$0xff]  ;;  %v8195_v7 = vpack.c.bf16 %v487_v57, %v486_v54  ;;  %v499_v54 = vld [vmem:[#allocation2 + $0x1b8] sm:$0xff] }
  0x8d   : > { %v2547_v6 = vpack.c.bf16 %v2523_v56, %v2522_v55  ;;  %v489_v9 = vld [vmem:[#allocation2 + $0x140] sm:$0xff]  ;;  %v500_v57 = vld [vmem:[#allocation2 + $0x1c8] sm:$0xff] }
  0x90   : > { %6419 = vmatmul.mubr.msk.bf16.gmra.mrb[28].mxu1 %vm413_vm3, %v598_v23  ;;  %v467_v23 = vld [vmem:[#allocation2 + $0x38] sm:$0xff] }
  0x91   : > { %6645 = vmatmul.mubr.msk.bf16.gmra.mrb[4].mxu0 %vm413_vm3, %v8042_v24  ;;  %6422 = vmatprep.mubr.msk.bf16.mxu1 %vm413_vm3, %v599_v25  ;;  %v2504_v25 = vld [vmem:[#allocation2 + $0x16a] sm:$0xff]  ;;  %v8110_v31 = vpack.c.bf16 %v467_v23, %v466_v12  ;;  %v8167_v23 = vpack.c.bf16 %v2517_v20, %v2516_v19  ;;  %v8204_v19 = vpack.c.bf16 %v489_v9, %v488_v8  ;;  %v502_v8 = vld [vmem:[#allocation2 + $0x1e0] sm:$0xff] }
  0x92   : > { %6648 = vmatprep.mubr.msk.bf16.mxu0 %vm413_vm3, %v8044_v26  ;;  %v8112_v32 = vpack.c.bf16 %v2505_v27, %v2504_v25  ;;  %v480_v25 = vld [vmem:[#allocation2 + $0xd8] sm:$0xff]  ;;  %v481_v27 = vld [vmem:[#allocation2 + $0xe0] sm:$0xff]  ;;  %v503_v9 = vld [vmem:[#allocation2 + $0x1e8] sm:$0xff] }
  0x93   : > { %v8177_v40 = vpack.c.bf16 %v481_v27, %v480_v25  ;;  %v3468_v25 = vsel %vm681_vm2, %v8033_v15, 0  ;;  %v8215_v27 = vld [vmem:[%s9555_s1 + $0x10] sm:$0x3]  ;;  %v494_v15 = vld [vmem:[#allocation2 + $0x180] sm:$0xff] }
  0x98   : > { %6423 = vmatmul.mubr.msk.bf16.gmra.mrb[32].mxu1 %vm413_vm3, %v600_v35  ;;  %v469_v35 = vld [vmem:[#allocation2 + $0x50] sm:$0xff] }
  0x99   : > { %6649 = vmatmul.mubr.msk.bf16.gmra.mrb[8].mxu0 %vm413_vm3, %v8052_v36  ;;  %6426 = vmatprep.mubr.msk.bf16.mxu1 %vm413_vm3, %v601_v37  ;;  %v2506_v37 = vld [vmem:[#allocation2 + $0x182] sm:$0xff]  ;;  %v8129_v43 = vpack.c.bf16 %v469_v35, %v468_v34  ;;  %v2519_v34 = vld [vmem:[#allocation2 + $0x21a] sm:$0xff]  ;;  %v482_v35 = vld [vmem:[#allocation2 + $0xf0] sm:$0xff] }
  0x9a   : > { %6652 = vmatprep.mubr.msk.bf16.mxu0 %vm413_vm3, %v8054_v38  ;;  %v8131_v44 = vpack.c.bf16 %v2507_v46, %v2506_v37  ;;  %v483_v37 = vld [vmem:[#allocation2 + $0xf8] sm:$0xff]  ;;  %v2520_v46 = vld [vmem:[#allocation2 + $0x22a] sm:$0xff] }
  0x9b   : > { %v8181_v42 = vpack.c.bf16 %v483_v37, %v482_v35  ;;  %v495_v35 = vld [vmem:[#allocation2 + $0x188] sm:$0xff] }
  0xa0   : > { %6427 = vmatmul.mubr.msk.bf16.gmra.mrb[36].mxu1 %vm413_vm3, %v602_v48  ;;  %v472_v48 = vld [vmem:[#allocation2 + $0x78] sm:$0xff] }
  0xa1   : > { %6653 = vmatmul.mubr.msk.bf16.gmra.mrb[12].mxu0 %vm413_vm3, %v8062_v49  ;;  %6430 = vmatprep.mubr.msk.bf16.mxu1 %vm413_vm3, %v8064_v50  ;;  %v8145_v59 = vpack.c.bf16 %v473_v52, %v472_v48  ;;  %v8183_v48 = vpack.c.bf16 %v2521_v39, %v2520_v46  ;;  %v484_v52 = vld [vmem:[#allocation2 + $0x108] sm:$0xff]  ;;  %v8227_v46 = vpack.c.bf16 %v495_v35, %v494_v15  ;;  %v496_v39 = vld [vmem:[#allocation2 + $0x198] sm:$0xff] }
  0xa2   : > { %6656 = vmatprep.mubr.msk.bf16.mxu0 %vm413_vm3, %v8066_v51  ;;  %v8193_v58 = vpack.c.bf16 %v485_v53, %v484_v52  ;;  %v497_v52 = vld [vmem:[#allocation2 + $0x1a0] sm:$0xff]  ;;  %v498_v53 = vld [vmem:[#allocation2 + $0x1b0] sm:$0xff]  ;;  %v507_v15 = vld [vmem:[#allocation2 + $0x218] sm:$0xff] }
  0xa3   : > { %v8237_v55 = vpack.c.bf16 %v497_v52, %v496_v39  ;;  %v8239_v56 = vpack.c.bf16 %v499_v54, %v498_v53  ;;  %v508_v52 = vld [vmem:[#allocation2 + $0x228] sm:$0xff]  ;;  %v509_v53 = vld [vmem:[#allocation2 + $0x230] sm:$0xff] }
  0xa4   : > { %v1210_v54 = vld [vmem:[#allocation2 + $0x2] sm:$0xff] }
  0xa8   : > { %6431 = vmatmul.mubr.msk.bf16.gmra.mrb[40].mxu1 %vm413_vm3, %v8075_v60 }
  0xa9   : > { %6657 = vmatmul.mubr.msk.bf16.gmra.mrb[16].mxu0 %vm413_vm3, %v8077_v61  ;;  %6434 = vmatprep.mubr.msk.bf16.mxu1 %vm413_vm3, %v8079_v63 }
  0xaa   : > { %6660 = vmatprep.mubr.msk.bf16.mxu0 %vm413_vm3, %v8081_v0 }
  0xb0   : > { %6435 = vmatmul.mubr.msk.bf16.gmra.mrb[44].mxu1 %vm413_vm3, %v8091_v14 }
  0xb1   : > { %6661 = vmatmul.mubr.msk.bf16.gmra.mrb[20].mxu0 %vm413_vm3, %v8093_v16  ;;  %6440 = vmatprep.mubr.msk.bf16.mxu1 %vm413_vm3, %v510_v17  ;;  %v479_v17 = vld [vmem:[#allocation2 + $0xc8] sm:$0xff] }
  0xb2   : > { %6664 = vmatprep.mubr.msk.bf16.mxu0 %vm413_vm3, %v8095_v18  ;;  %v8165_v12 = vpack.c.bf16 %v479_v17, %v478_v11  ;;  %v490_v11 = vld [vmem:[#allocation2 + $0x150] sm:$0xff]  ;;  %v491_v17 = vld [vmem:[#allocation2 + $0x158] sm:$0xff] }
  0xb3   : > { %v8206_v20 = vpack.c.bf16 %v491_v17, %v490_v11  ;;  %v8251_v17 = vpack.c.bf16 %v503_v9, %v502_v8  ;;  %v1779_v9 = vsel %vm681_vm2, %v8119_v33, 0 }
  0xb8   : > { %6441 = vmatmul.mubr.msk.bf16.vlgmr.msra.gmra.mrb[0].mxu1 %vm413_vm3, %v8104_v28 }
  0xb9   : > { %6489 = vmatpush3.bf16.msra.mxu1 %v1357_v30  ;;  %6665 = vmatmul.mubr.msk.bf16.gmra.mrb[24].mxu0 %vm413_vm3, %v8106_v29  ;;  %v2518_v30 = vld [vmem:[#allocation2 + $0x212] sm:$0xff] }
  0xba   : > { %6444 = vmatprep.mubr.msk.bf16.mxu1 %vm413_vm3, %v8110_v31  ;;  %6668 = vmatprep.mubr.msk.bf16.mxu0 %vm413_vm3, %v8112_v32  ;;  %v8179_v41 = vpack.c.bf16 %v2519_v34, %v2518_v30  ;;  %v492_v30 = vld [vmem:[#allocation2 + $0x168] sm:$0xff]  ;;  %v493_v34 = vld [vmem:[#allocation2 + $0x170] sm:$0xff] }
  0xbb   : > { %7227 = vmatprep.subr.msk.bf16.mxu1 %vm681_vm2, %v8119_v33  ;;  %v8225_v37 = vpack.c.bf16 %v493_v34, %v492_v30  ;;  %v505_v30 = vld [vmem:[#allocation2 + $0x200] sm:$0xff]  ;;  %v506_v34 = vld [vmem:[#allocation2 + $0x210] sm:$0xff] }
  0xbc   : > { %v8263_v39 = vpack.c.bf16 %v507_v15, %v506_v34  ;;  %v3325_v33 = vld [vmem:[#allocation2 + $0x61] sm:$0xff]  ;;  %v3890_v15 = vsel %vm681_vm2, %v8215_v27, 0 }
  0xc0   : > { %6445 = vmatmul.mubr.msk.bf16.gmra.mrb[4].mxu1 %vm413_vm3, %v8129_v43 }
  0xc1   : > { %6669 = vmatmul.mubr.msk.bf16.gmra.mrb[28].mxu0 %vm413_vm3, %v8131_v44  ;;  %6448 = vmatprep.mubr.msk.bf16.mxu1 %vm413_vm3, %v8133_v45 }
  0xc2   : > { %6672 = vmatprep.mubr.msk.bf16.mxu0 %vm413_vm3, %v8135_v47 }
  0xc8   : > { %6449 = vmatmul.mubr.msk.bf16.gmra.mrb[8].mxu1 %vm413_vm3, %v8145_v59 }
  0xc9   : > { %6673 = vmatmul.mubr.msk.bf16.gmra.mrb[32].mxu0 %vm413_vm3, %v8147_v1  ;;  %6452 = vmatprep.mubr.msk.bf16.mxu1 %vm413_vm3, %v8149_v3 }
  0xca   : > { %6676 = vmatprep.mubr.msk.bf16.mxu0 %vm413_vm3, %v8151_v5 }
  0xd0   : > { %6453 = vmatmul.mubr.msk.bf16.gmra.mrb[12].mxu1 %vm413_vm3, %v8161_v21 }
  0xd1   : > { %6677 = vmatmul.mubr.msk.bf16.gmra.mrb[36].mxu0 %vm413_vm3, %v8163_v22  ;;  %6456 = vmatprep.mubr.msk.bf16.mxu1 %vm413_vm3, %v8165_v12 }
  0xd2   : > { %6680 = vmatprep.mubr.msk.bf16.mxu0 %vm413_vm3, %v8167_v23 }
  0xd8   : > { %6457 = vmatmul.mubr.msk.bf16.gmra.mrb[16].mxu1 %vm413_vm3, %v8177_v40 }
  0xd9   : > { %6681 = vmatmul.mubr.msk.bf16.gmra.mrb[40].mxu0 %vm413_vm3, %v8179_v41  ;;  %6460 = vmatprep.mubr.msk.bf16.mxu1 %vm413_vm3, %v8181_v42 }
  0xda   : > { %6684 = vmatprep.mubr.msk.bf16.mxu0 %vm413_vm3, %v8183_v48 }
  0xe0   : > { %6461 = vmatmul.mubr.msk.bf16.gmra.mrb[20].mxu1 %vm413_vm3, %v8193_v58 }
  0xe1   : > { %6685 = vmatmul.mubr.msk.bf16.gmra.mrb[44].mxu0 %vm413_vm3, %v2547_v6  ;;  %6464 = vmatprep.mubr.msk.bf16.mxu1 %vm413_vm3, %v8195_v7  ;;  %v501_v6 = vld [vmem:[#allocation2 + $0x1d0] sm:$0xff] }
  0xe2   : > { %6690 = vmatprep.mubr.msk.bf16.mxu0 %vm413_vm3, %v8110_v31  ;;  %v8249_v11 = vpack.c.bf16 %v501_v6, %v500_v57  ;;  %v1211_v57 = vld [vmem:[#allocation2 + $0xa] sm:$0xff]  ;;  %v8273_v6 = vpack.c.bf16 %v509_v53, %v508_v52  ;;  %v3330_v53 = vld [vmem:[#allocation2 + $0x99] sm:$0xff] }
  0xe3   : > { %v1258_v8 = vpack.c.bf16 %v1211_v57, %v1210_v54  ;;  %v3329_v52 = vld [vmem:[#allocation2 + $0x91] sm:$0xff] }
  0xe4   : > { %v3373_v57 = vpack.c.bf16 %v3330_v53, %v3329_v52  ;;  %v3353_v52 = vld [vmem:[#allocation2 + $0x1b1] sm:$0xff]  ;;  %v3354_v53 = vld [vmem:[#allocation2 + $0x1b9] sm:$0xff] }
  0xe8   : > { %6465 = vmatmul.mubr.msk.bf16.gmra.mrb[24].mxu1 %vm413_vm3, %v8204_v19 }
  0xe9   : > { %6691 = vmatmul.mubr.msk.bf16.vlgmr.msra.gmra.mrb[0].mxu0 %vm413_vm3, %v8129_v43  ;;  %6468 = vmatprep.mubr.msk.bf16.mxu1 %vm413_vm3, %v8206_v20 }
  0xea   : > { %6739 = vmatpush3.bf16.msra.mxu0 %v3468_v25  ;;  %6694 = vmatprep.mubr.msk.bf16.mxu0 %vm413_vm3, %v8133_v45  ;;  %v504_v25 = vld [vmem:[#allocation2 + $0x1f8] sm:$0xff] }
  0xeb   : > { %7233 = vmatprep.subr.msk.bf16.mxu0 %vm681_vm2, %v8215_v27  ;;  %v8261_v35 = vpack.c.bf16 %v505_v30, %v504_v25  ;;  %v3326_v25 = vld [vmem:[#allocation2 + $0x69] sm:$0xff]  ;;  %v3333_v27 = vld [vmem:[#allocation2 + $0xc1] sm:$0xff] }
  0xec   : > { %v3371_v34 = vpack.c.bf16 %v3326_v25, %v3325_v33  ;;  %v3346_v33 = vld [vmem:[#allocation2 + $0x159] sm:$0xff] }
  0xf0   : > { %6469 = vmatmul.mubr.msk.bf16.gmra.mrb[28].mxu1 %vm413_vm3, %v8225_v37 }
  0xf1   : > { %6695 = vmatmul.mubr.msk.bf16.gmra.mrb[4].mxu0 %vm413_vm3, %v8145_v59  ;;  %6472 = vmatprep.mubr.msk.bf16.mxu1 %vm413_vm3, %v8227_v46 }
  0xf2   : > { %6698 = vmatprep.mubr.msk.bf16.mxu0 %vm413_vm3, %v8149_v3 }
  0xf8   : > { %6473 = vmatmul.mubr.msk.bf16.gmra.mrb[32].mxu1 %vm413_vm3, %v8237_v55 }
  0xf9   : > { %6699 = vmatmul.mubr.msk.bf16.gmra.mrb[8].mxu0 %vm413_vm3, %v8161_v21  ;;  %6476 = vmatprep.mubr.msk.bf16.mxu1 %vm413_vm3, %v8239_v56 }
  0xfa   : > { %6702 = vmatprep.mubr.msk.bf16.mxu0 %vm413_vm3, %v8165_v12 }
 0x100   : > { %6477 = vmatmul.mubr.msk.bf16.gmra.mrb[36].mxu1 %vm413_vm3, %v8249_v11 }
 0x101   : > { %6703 = vmatmul.mubr.msk.bf16.gmra.mrb[12].mxu0 %vm413_vm3, %v8177_v40  ;;  %6480 = vmatprep.mubr.msk.bf16.mxu1 %vm413_vm3, %v8251_v17 }
 0x102   : > { %6706 = vmatprep.mubr.msk.bf16.mxu0 %vm413_vm3, %v8181_v42 }
 0x108   : > { %6481 = vmatmul.mubr.msk.bf16.gmra.mrb[40].mxu1 %vm413_vm3, %v8261_v35 }
 0x109   : > { %6707 = vmatmul.mubr.msk.bf16.gmra.mrb[16].mxu0 %vm413_vm3, %v8193_v58  ;;  %6484 = vmatprep.mubr.msk.bf16.mxu1 %vm413_vm3, %v8263_v39 }
 0x10a   : > { %6710 = vmatprep.mubr.msk.bf16.mxu0 %vm413_vm3, %v8195_v7 }
 0x110   : > { %6485 = vmatmul.mubr.msk.bf16.gmra.mrb[44].mxu1 %vm413_vm3, %v8273_v6 }
 0x111   : > { %6711 = vmatmul.mubr.msk.bf16.gmra.mrb[20].mxu0 %vm413_vm3, %v8204_v19  ;;  %6490 = vmatprep.mubr.msk.bf16.mxu1 %vm413_vm3, %v1258_v8  ;;  %v3334_v8 = vld [vmem:[#allocation2 + $0xc9] sm:$0xff] }
 0x112   : > { %6714 = vmatprep.mubr.msk.bf16.mxu0 %vm413_vm3, %v8206_v20 }
 0x118   : > { %6491 = vmatmul.mubr.msk.bf16.vlgmr.msra.gmra.mrb[0].mxu1 %vm413_vm3, %v8014_v62  ;;  %v2944_v62 = vld [vmem:[#allocation2 + $0x248] sm:$0xff] }
 0x119   : > { %6539 = vmatpush3.bf16.msra.mxu1 %v1779_v9  ;;  %6715 = vmatmul.mubr.msk.bf16.gmra.mrb[24].mxu0 %vm413_vm3, %v8225_v37 }
 0x11a   : > { %6494 = vmatprep.mubr.msk.bf16.mxu1 %vm413_vm3, %v8023_v10  ;;  %6718 = vmatprep.mubr.msk.bf16.mxu0 %vm413_vm3, %v8227_v46 }
 0x11b   : > { %7229 = vmatprep.subr.msk.bf16.mxu1 %vm681_vm2, %v7883_v2  ;;  %v2943_v2 = vld [vmem:[#allocation2 + $0x240] sm:$0xff] }
 0x11c   : > { %v8318_v10 = vpack.c.bf16 %v2944_v62, %v2943_v2  ;;  %v3375_v2 = vpack.c.bf16 %v3334_v8, %v3333_v27  ;;  %v3337_v62 = vld [vmem:[#allocation2 + $0xf1] sm:$0xff] }
 0x11d   : > { %v3751_v8 = vld [vmem:[#allocation2 + $0x92] sm:$0xff] }
 0x120   : > { %6495 = vmatmul.mubr.msk.bf16.gmra.mrb[4].mxu1 %vm413_vm3, %v8025_v13  ;;  %v2945_v13 = vld [vmem:[#allocation2 + $0x258] sm:$0xff] }
 0x121   : > { %6719 = vmatmul.mubr.msk.bf16.gmra.mrb[28].mxu0 %vm413_vm3, %v8237_v55  ;;  %6498 = vmatprep.mubr.msk.bf16.mxu1 %vm413_vm3, %v8042_v24  ;;  %v2946_v24 = vld [vmem:[#allocation2 + $0x260] sm:$0xff] }
 0x122   : > { %6722 = vmatprep.mubr.msk.bf16.mxu0 %vm413_vm3, %v8239_v56 }
 0x128   : > { %6499 = vmatmul.mubr.msk.bf16.gmra.mrb[8].mxu1 %vm413_vm3, %v8044_v26  ;;  %v3321_v26 = vld [vmem:[#allocation2 + $0x31] sm:$0xff] }
 0x129   : > { %6723 = vmatmul.mubr.msk.bf16.gmra.mrb[32].mxu0 %vm413_vm3, %v8249_v11  ;;  %6502 = vmatprep.mubr.msk.bf16.mxu1 %vm413_vm3, %v8052_v36  ;;  %v3322_v36 = vld [vmem:[#allocation2 + $0x39] sm:$0xff] }
 0x12a   : > { %6726 = vmatprep.mubr.msk.bf16.mxu0 %vm413_vm3, %v8251_v17 }
 0x130   : > { %6503 = vmatmul.mubr.msk.bf16.gmra.mrb[12].mxu1 %vm413_vm3, %v8054_v38  ;;  %v2970_v38 = vpack.c.bf16 %v2946_v24, %v2945_v13  ;;  %v3338_v13 = vld [vmem:[#allocation2 + $0xf9] sm:$0xff] }
 0x131   : > { %6727 = vmatmul.mubr.msk.bf16.gmra.mrb[36].mxu0 %vm413_vm3, %v8261_v35  ;;  %6506 = vmatprep.mubr.msk.bf16.mxu1 %vm413_vm3, %v8062_v49  ;;  %v3369_v49 = vpack.c.bf16 %v3322_v36, %v3321_v26  ;;  %v3377_v26 = vpack.c.bf16 %v3338_v13, %v3337_v62  ;;  %v3341_v36 = vld [vmem:[#allocation2 + $0x121] sm:$0xff]  ;;  %v3756_v62 = vld [vmem:[#allocation2 + $0xca] sm:$0xff] }
 0x132   : > { %6730 = vmatprep.mubr.msk.bf16.mxu0 %vm413_vm3, %v8263_v39 }
 0x138   : > { %6507 = vmatmul.mubr.msk.bf16.gmra.mrb[16].mxu1 %vm413_vm3, %v8066_v51  ;;  %v3323_v51 = vld [vmem:[#allocation2 + $0x49] sm:$0xff] }
 0x139   : > { %6731 = vmatmul.mubr.msk.bf16.gmra.mrb[40].mxu0 %vm413_vm3, %v8273_v6  ;;  %6510 = vmatprep.mubr.msk.bf16.mxu1 %vm413_vm3, %v8077_v61  ;;  %v3324_v61 = vld [vmem:[#allocation2 + $0x51] sm:$0xff] }
 0x13a   : > { %6734 = vmatprep.mubr.msk.bf16.mxu0 %vm413_vm3, %v8318_v10  ;;  %v3370_v30 = vpack.c.bf16 %v3324_v61, %v3323_v51  ;;  %v3345_v61 = vld [vmem:[#allocation2 + $0x151] sm:$0xff] }
 0x140   : > { %6511 = vmatmul.mubr.msk.bf16.gmra.mrb[20].mxu1 %vm413_vm3, %v8081_v0  ;;  %v3327_v0 = vld [vmem:[#allocation2 + $0x79] sm:$0xff] }
 0x141   : > { %6735 = vmatmul.mubr.msk.bf16.gmra.mrb[44].mxu0 %vm413_vm3, %v2970_v38  ;;  %6514 = vmatprep.mubr.msk.bf16.mxu1 %vm413_vm3, %v8093_v16  ;;  %v3328_v16 = vld [vmem:[#allocation2 + $0x81] sm:$0xff]  ;;  %v3342_v38 = vld [vmem:[#allocation2 + $0x129] sm:$0xff] }
 0x142   : > { %6740 = vmatprep.mubr.msk.bf16.mxu0 %vm413_vm3, %v3369_v49  ;;  %v3372_v54 = vpack.c.bf16 %v3328_v16, %v3327_v0  ;;  %v3379_v51 = vpack.c.bf16 %v3342_v38, %v3341_v36  ;;  %v3763_v38 = vld [vmem:[#allocation2 + $0x122] sm:$0xff] }
 0x148   : > { %6515 = vmatmul.mubr.msk.bf16.gmra.mrb[24].mxu1 %vm413_vm3, %v8095_v18  ;;  %v3331_v18 = vld [vmem:[#allocation2 + $0xa9] sm:$0xff] }
 0x149   : > { %6741 = vmatmul.mubr.msk.bf16.vlgmr.msra.gmra.mrb[0].mxu0 %vm413_vm3, %v3370_v30  ;;  %6518 = vmatprep.mubr.msk.bf16.mxu1 %vm413_vm3, %v8106_v29  ;;  %v3332_v29 = vld [vmem:[#allocation2 + $0xb1] sm:$0xff]  ;;  %v8368_v30 = vpack.c.bf16 %v3346_v33, %v3345_v61  ;;  %v3768_v61 = vld [vmem:[#allocation2 + $0x15a] sm:$0xff] }
 0x14a   : > { %6789 = vmatpush3.bf16.msra.mxu0 %v3890_v15  ;;  %6744 = vmatprep.mubr.msk.bf16.mxu0 %vm413_vm3, %v3371_v34  ;;  %v3374_v9 = vpack.c.bf16 %v3332_v29, %v3331_v18  ;;  %v3349_v34 = vld [vmem:[#allocation2 + $0x181] sm:$0xff]  ;;  %v3350_v15 = vld [vmem:[#allocation2 + $0x189] sm:$0xff] }
 0x14b   : > { %v8380_v16 = vpack.c.bf16 %v3350_v15, %v3349_v34  ;;  %v3748_v18 = vld [vmem:[#allocation2 + $0x6a] sm:$0xff] }
 0x14c   : > { %v3772_v34 = vld [vmem:[#allocation2 + $0x18a] sm:$0xff] }
 0x150   : > { %6519 = vmatmul.mubr.msk.bf16.gmra.mrb[28].mxu1 %vm413_vm3, %v8112_v32  ;;  %v3335_v32 = vld [vmem:[#allocation2 + $0xd9] sm:$0xff] }
 0x151   : > { %6745 = vmatmul.mubr.msk.bf16.gmra.mrb[4].mxu0 %vm413_vm3, %v3372_v54  ;;  %6522 = vmatprep.mubr.msk.bf16.mxu1 %vm413_vm3, %v8131_v44  ;;  %v3336_v44 = vld [vmem:[#allocation2 + $0xe1] sm:$0xff] }
 0x152   : > { %6748 = vmatprep.mubr.msk.bf16.mxu0 %vm413_vm3, %v3373_v57  ;;  %v3376_v24 = vpack.c.bf16 %v3336_v44, %v3335_v32  ;;  %v8393_v57 = vpack.c.bf16 %v3354_v53, %v3353_v52  ;;  %v3755_v44 = vld [vmem:[#allocation2 + $0xc2] sm:$0xff]  ;;  %v3776_v52 = vld [vmem:[#allocation2 + $0x1ba] sm:$0xff] }
 0x158   : > { %6523 = vmatmul.mubr.msk.bf16.gmra.mrb[32].mxu1 %vm413_vm3, %v8135_v47  ;;  %v3339_v47 = vld [vmem:[#allocation2 + $0x109] sm:$0xff] }
 0x159   : > { %6749 = vmatmul.mubr.msk.bf16.gmra.mrb[8].mxu0 %vm413_vm3, %v3374_v9  ;;  %6526 = vmatprep.mubr.msk.bf16.mxu1 %vm413_vm3, %v8147_v1  ;;  %v3340_v1 = vld [vmem:[#allocation2 + $0x111] sm:$0xff]  ;;  %v3752_v9 = vld [vmem:[#allocation2 + $0x9a] sm:$0xff] }
 0x15a   : > { %6752 = vmatprep.mubr.msk.bf16.mxu0 %vm413_vm3, %v3375_v2  ;;  %v3378_v49 = vpack.c.bf16 %v3340_v1, %v3339_v47  ;;  %v3795_v32 = vpack.c.bf16 %v3752_v9, %v3751_v8  ;;  %v3760_v47 = vld [vmem:[#allocation2 + $0xfa] sm:$0xff]  ;;  %v2099_v8 = vld [vmem:[#allocation2 + $0x231] sm:$0xff]  ;;  %v3787_v9 = vld [vmem:[#allocation2 + $0x242] sm:$0xff] }
 0x160   : > { %6527 = vmatmul.mubr.msk.bf16.gmra.mrb[36].mxu1 %vm413_vm3, %v8151_v5  ;;  %v3343_v5 = vld [vmem:[#allocation2 + $0x139] sm:$0xff] }
 0x161   : > { %6753 = vmatmul.mubr.msk.bf16.gmra.mrb[12].mxu0 %vm413_vm3, %v3376_v24  ;;  %6530 = vmatprep.mubr.msk.bf16.mxu1 %vm413_vm3, %v8163_v22  ;;  %v3344_v22 = vld [vmem:[#allocation2 + $0x141] sm:$0xff]  ;;  %v3797_v24 = vpack.c.bf16 %v3756_v62, %v3755_v44 }
 0x162   : > { %6756 = vmatprep.mubr.msk.bf16.mxu0 %vm413_vm3, %v3377_v26  ;;  %v8366_v25 = vpack.c.bf16 %v3344_v22, %v3343_v5  ;;  %v3759_v26 = vld [vmem:[#allocation2 + $0xf2] sm:$0xff]  ;;  %v3789_v62 = vld [vmem:[#allocation2 + $0x25a] sm:$0xff] }
 0x163   : > { %v3799_v36 = vpack.c.bf16 %v3760_v47, %v3759_v26  ;;  %v3767_v22 = vld [vmem:[#allocation2 + $0x152] sm:$0xff] }
 0x168   : > { %6531 = vmatmul.mubr.msk.bf16.gmra.mrb[40].mxu1 %vm413_vm3, %v8167_v23  ;;  %v3347_v23 = vld [vmem:[#allocation2 + $0x169] sm:$0xff] }
 0x169   : > { %6757 = vmatmul.mubr.msk.bf16.gmra.mrb[16].mxu0 %vm413_vm3, %v3378_v49  ;;  %6534 = vmatprep.mubr.msk.bf16.mxu1 %vm413_vm3, %v8179_v41  ;;  %v3348_v41 = vld [vmem:[#allocation2 + $0x171] sm:$0xff] }
 0x16a   : > { %6760 = vmatprep.mubr.msk.bf16.mxu0 %vm413_vm3, %v3379_v51  ;;  %v8378_v0 = vpack.c.bf16 %v3348_v41, %v3347_v23  ;;  %v3764_v49 = vld [vmem:[#allocation2 + $0x12a] sm:$0xff]  ;;  %v3803_v23 = vpack.c.bf16 %v3768_v61, %v3767_v22  ;;  %v3771_v41 = vld [vmem:[#allocation2 + $0x182] sm:$0xff] }
 0x16b   : > { %v3801_v5 = vpack.c.bf16 %v3764_v49, %v3763_v38 }
 0x170   : > { %6535 = vmatmul.mubr.msk.bf16.gmra.mrb[44].mxu1 %vm413_vm3, %v8183_v48  ;;  %v3352_v48 = vld [vmem:[#allocation2 + $0x1a1] sm:$0xff] }
 0x171   : > { %6761 = vmatmul.mubr.msk.bf16.gmra.mrb[20].mxu0 %vm413_vm3, %v8366_v25  ;;  %6540 = vmatprep.mubr.msk.bf16.mxu1 %vm413_vm3, %v8104_v28  ;;  %v3351_v28 = vld [vmem:[#allocation2 + $0x199] sm:$0xff] }
 0x172   : > { %6764 = vmatprep.mubr.msk.bf16.mxu0 %vm413_vm3, %v8368_v30  ;;  %v8391_v54 = vpack.c.bf16 %v3352_v48, %v3351_v28  ;;  %v3805_v28 = vpack.c.bf16 %v3772_v34, %v3771_v41  ;;  %v3775_v48 = vld [vmem:[#allocation2 + $0x1b2] sm:$0xff] }
 0x178   : > { %6541 = vmatmul.mubr.msk.bf16.vlgmr.msra.gmra.mrb[0].mxu1 %vm413_vm3, %v8110_v31  ;;  %v3356_v31 = vld [vmem:[#allocation2 + $0x1d1] sm:$0xff] }
 0x179   : > { %6839 = vmatpush3.bf16.msra.mxu1 %v7891_v4  ;;  %6765 = vmatmul.mubr.msk.bf16.gmra.mrb[24].mxu0 %vm413_vm3, %v8378_v0  ;;  %v3355_v4 = vld [vmem:[#allocation2 + $0x1c9] sm:$0xff] }
 0x17a   : > { %6544 = vmatprep.mubr.msk.bf16.mxu1 %vm413_vm3, %v8129_v43  ;;  %6768 = vmatprep.mubr.msk.bf16.mxu0 %vm413_vm3, %v8380_v16  ;;  %v8403_v43 = vpack.c.bf16 %v3356_v31, %v3355_v4  ;;  %v3807_v4 = vpack.c.bf16 %v3776_v52, %v3775_v48  ;;  %v3779_v31 = vld [vmem:[#allocation2 + $0x1e2] sm:$0xff] }
 0x180   : > { %6545 = vmatmul.mubr.msk.bf16.gmra.mrb[4].mxu1 %vm413_vm3, %v8133_v45  ;;  %v3365_v45 = vld [vmem:[#allocation2 + $0x241] sm:$0xff] }
 0x181   : > { %6769 = vmatmul.mubr.msk.bf16.gmra.mrb[28].mxu0 %vm413_vm3, %v8391_v54  ;;  %6548 = vmatprep.mubr.msk.bf16.mxu1 %vm413_vm3, %v8145_v59  ;;  %v3366_v59 = vld [vmem:[#allocation2 + $0x249] sm:$0xff] }
 0x182   : > { %6772 = vmatprep.mubr.msk.bf16.mxu0 %vm413_vm3, %v8393_v57 }
 0x188   : > { %6549 = vmatmul.mubr.msk.bf16.gmra.mrb[8].mxu1 %vm413_vm3, %v8149_v3  ;;  %v8421_v3 = vpack.c.bf16 %v3366_v59, %v3365_v45  ;;  %v3780_v45 = vld [vmem:[#allocation2 + $0x1ea] sm:$0xff] }
 0x189   : > { %6773 = vmatmul.mubr.msk.bf16.gmra.mrb[32].mxu0 %vm413_vm3, %v8403_v43  ;;  %6552 = vmatprep.mubr.msk.bf16.mxu1 %vm413_vm3, %v8161_v21  ;;  %v3743_v21 = vld [vmem:[#allocation2 + $0x32] sm:$0xff] }
 0x18a   : > { %6776 = vmatprep.mubr.msk.bf16.mxu0 %vm413_vm3, %v8064_v50  ;;  %v3367_v50 = vld [vmem:[#allocation2 + $0x259] sm:$0xff] }
 0x190   : > { %6553 = vmatmul.mubr.msk.bf16.gmra.mrb[12].mxu1 %vm413_vm3, %v8165_v12 }
 0x191   : > { %6777 = vmatmul.mubr.msk.bf16.gmra.mrb[36].mxu0 %vm413_vm3, %v8075_v60  ;;  %6556 = vmatprep.mubr.msk.bf16.mxu1 %vm413_vm3, %v8177_v40  ;;  %v3368_v60 = vld [vmem:[#allocation2 + $0x261] sm:$0xff] }
 0x192   : > { %6780 = vmatprep.mubr.msk.bf16.mxu0 %vm413_vm3, %v8079_v63  ;;  %v3744_v63 = vld [vmem:[#allocation2 + $0x3a] sm:$0xff]  ;;  %v3392_v12 = vpack.c.bf16 %v3368_v60, %v3367_v50  ;;  %v3809_v50 = vpack.c.bf16 %v3780_v45, %v3779_v31  ;;  %v2093_v60 = vld [vmem:[#allocation2 + $0x1e9] sm:$0xff] }
 0x193   : > { %v3791_v40 = vpack.c.bf16 %v3744_v63, %v3743_v21  ;;  %v3781_v21 = vld [vmem:[#allocation2 + $0x1fa] sm:$0xff] }
 0x194   : > { %v2094_v63 = vld [vmem:[#allocation2 + $0x1f9] sm:$0xff] }
 0x198   : > { %6557 = vmatmul.mubr.msk.bf16.gmra.mrb[16].mxu1 %vm413_vm3, %v8181_v42  ;;  %v3746_v42 = vld [vmem:[#allocation2 + $0x52] sm:$0xff] }
 0x199   : > { %6781 = vmatmul.mubr.msk.bf16.gmra.mrb[40].mxu0 %vm413_vm3, %v8091_v14  ;;  %6560 = vmatprep.mubr.msk.bf16.mxu1 %vm413_vm3, %v8193_v58  ;;  %v3745_v14 = vld [vmem:[#allocation2 + $0x4a] sm:$0xff]  ;;  %v3747_v58 = vld [vmem:[#allocation2 + $0x62] sm:$0xff] }
 0x19a   : > { %6784 = vmatprep.mubr.msk.bf16.mxu0 %vm413_vm3, %v8421_v3  ;;  %v3792_v29 = vpack.c.bf16 %v3746_v42, %v3745_v14  ;;  %v3793_v27 = vpack.c.bf16 %v3748_v18, %v3747_v58  ;;  %v3784_v14 = vld [vmem:[#allocation2 + $0x21a] sm:$0xff] }
 0x1a0   : > { %6561 = vmatmul.mubr.msk.bf16.gmra.mrb[20].mxu1 %vm413_vm3, %v8195_v7  ;;  %v3749_v7 = vld [vmem:[#allocation2 + $0x7a] sm:$0xff] }
 0x1a1   : > { %6785 = vmatmul.mubr.msk.bf16.gmra.mrb[44].mxu0 %vm413_vm3, %v3392_v12  ;;  %6564 = vmatprep.mubr.msk.bf16.mxu1 %vm413_vm3, %v8204_v19  ;;  %v3750_v19 = vld [vmem:[#allocation2 + $0x82] sm:$0xff] }
 0x1a2   : > { %6790 = vmatprep.mubr.msk.bf16.mxu0 %vm413_vm3, %v3791_v40  ;;  %v3794_v2 = vpack.c.bf16 %v3750_v19, %v3749_v7  ;;  %v2095_v12 = vld [vmem:[#allocation2 + $0x201] sm:$0xff]  ;;  %v3783_v40 = vld [vmem:[#allocation2 + $0x212] sm:$0xff]  ;;  %v2098_v19 = vld [vmem:[#allocation2 + $0x229] sm:$0xff] }
 0x1a3   : > { %v2122_v18 = vpack.c.bf16 %v2095_v12, %v2094_v63  ;;  %v3786_v7 = vld [vmem:[#allocation2 + $0x232] sm:$0xff] }
 0x1a8   : > { %6565 = vmatmul.mubr.msk.bf16.gmra.mrb[24].mxu1 %vm413_vm3, %v8206_v20  ;;  %v3753_v20 = vld [vmem:[#allocation2 + $0xaa] sm:$0xff] }
 0x1a9   : > { %6791 = vmatmul.mubr.msk.bf16.vlgmr.msra.gmra.mrb[0].mxu0 %vm413_vm3, %v3792_v29  ;;  %6568 = vmatprep.mubr.msk.bf16.mxu1 %vm413_vm3, %v8225_v37  ;;  %v3754_v37 = vld [vmem:[#allocation2 + $0xb2] sm:$0xff]  ;;  %v3811_v29 = vpack.c.bf16 %v3784_v14, %v3783_v40 }
 0x1aa   : > { %6794 = vmatprep.mubr.msk.bf16.mxu0 %vm413_vm3, %v3793_v27  ;;  %v3796_v13 = vpack.c.bf16 %v3754_v37, %v3753_v20  ;;  %v3785_v27 = vld [vmem:[#allocation2 + $0x22a] sm:$0xff]  ;;  %v2124_v37 = vpack.c.bf16 %v2099_v8, %v2098_v19 }
 0x1ab   : > { %v3812_v20 = vpack.c.bf16 %v3786_v7, %v3785_v27 }
 0x1b0   : > { %6569 = vmatmul.mubr.msk.bf16.gmra.mrb[28].mxu1 %vm413_vm3, %v8227_v46  ;;  %v3757_v46 = vld [vmem:[#allocation2 + $0xda] sm:$0xff] }
 0x1b1   : > { %6795 = vmatmul.mubr.msk.bf16.gmra.mrb[4].mxu0 %vm413_vm3, %v3794_v2  ;;  %6572 = vmatprep.mubr.msk.bf16.mxu1 %vm413_vm3, %v8237_v55  ;;  %v3758_v55 = vld [vmem:[#allocation2 + $0xe2] sm:$0xff]  ;;  %v3788_v2 = vld [vmem:[#allocation2 + $0x24a] sm:$0xff] }
 0x1b2   : > { %6798 = vmatprep.mubr.msk.bf16.mxu0 %vm413_vm3, %v3795_v32  ;;  %v3798_v1 = vpack.c.bf16 %v3758_v55, %v3757_v46  ;;  %v3813_v44 = vpack.c.bf16 %v3788_v2, %v3787_v9  ;;  %v4422_v46 = vstv %s4421_s13 }
 0x1b3   : > { %7313 = vrcp.f32 %v4422_v46 }
 0x1b8   : > { %6573 = vmatmul.mubr.msk.bf16.gmra.mrb[32].mxu1 %vm413_vm3, %v8239_v56  ;;  %v3761_v56 = vld [vmem:[#allocation2 + $0x10a] sm:$0xff] }
 0x1b9   : > { %6799 = vmatmul.mubr.msk.bf16.gmra.mrb[8].mxu0 %vm413_vm3, %v3796_v13  ;;  %6576 = vmatprep.mubr.msk.bf16.mxu1 %vm413_vm3, %v8249_v11  ;;  %v3762_v11 = vld [vmem:[#allocation2 + $0x112] sm:$0xff]  ;;  %v3790_v13 = vld [vmem:[#allocation2 + $0x262] sm:$0xff] }
 0x1ba   : > { %6802 = vmatprep.mubr.msk.bf16.mxu0 %vm413_vm3, %v3797_v24  ;;  %v3800_v51 = vpack.c.bf16 %v3762_v11, %v3761_v56  ;;  %v3814_v24 = vpack.c.bf16 %v3790_v13, %v3789_v62 }
 0x1bd   : > { %v7314_v55 = vpop.eup %7313 }
 0x1be   : > { %7236 = vpush %v7314_v55 }
 0x1c0   : > { %6577 = vmatmul.mubr.msk.bf16.gmra.mrb[36].mxu1 %vm413_vm3, %v8251_v17  ;;  %v3765_v17 = vld [vmem:[#allocation2 + $0x13a] sm:$0xff] }
 0x1c1   : > { %6803 = vmatmul.mubr.msk.bf16.gmra.mrb[12].mxu0 %vm413_vm3, %v3798_v1  ;;  %6580 = vmatprep.mubr.msk.bf16.mxu1 %vm413_vm3, %v8261_v35  ;;  %v3766_v35 = vld [vmem:[#allocation2 + $0x142] sm:$0xff] }
 0x1c2   : > { %6806 = vmatprep.mubr.msk.bf16.mxu0 %vm413_vm3, %v3799_v36  ;;  %v3802_v33 = vpack.c.bf16 %v3766_v35, %v3765_v17 }
 0x1c8   : > { %6581 = vmatmul.mubr.msk.bf16.gmra.mrb[40].mxu1 %vm413_vm3, %v8263_v39  ;;  %v3769_v39 = vld [vmem:[#allocation2 + $0x16a] sm:$0xff] }
 0x1c9   : > { %6807 = vmatmul.mubr.msk.bf16.gmra.mrb[16].mxu0 %vm413_vm3, %v3800_v51  ;;  %6584 = vmatprep.mubr.msk.bf16.mxu1 %vm413_vm3, %v8273_v6  ;;  %v3770_v6 = vld [vmem:[#allocation2 + $0x172] sm:$0xff] }
 0x1ca   : > { %6810 = vmatprep.mubr.msk.bf16.mxu0 %vm413_vm3, %v3801_v5  ;;  %v3804_v15 = vpack.c.bf16 %v3770_v6, %v3769_v39 }
 0x1d0   : > { %6585 = vmatmul.mubr.msk.bf16.gmra.mrb[44].mxu1 %vm413_vm3, %v8318_v10  ;;  %v3773_v10 = vld [vmem:[#allocation2 + $0x19a] sm:$0xff] }
 0x1d1   : > { %6811 = vmatmul.mubr.msk.bf16.gmra.mrb[20].mxu0 %vm413_vm3, %v3802_v33  ;;  %6614 = vmatprep.mubr.msk.bf16.mxu1 %vm413_vm3, %v8366_v25  ;;  %v3774_v25 = vld [vmem:[#allocation2 + $0x1a2] sm:$0xff] }
 0x1d2   : > { %6814 = vmatprep.mubr.msk.bf16.mxu0 %vm413_vm3, %v3803_v23  ;;  %v3806_v53 = vpack.c.bf16 %v3774_v25, %v3773_v10 }
 0x1d8   : > { %6615 = vmatmul.mubr.msk.bf16.vlgmr.msra.gmra.mrb[24].mxu1 %vm413_vm3, %v8368_v30  ;;  %v3777_v30 = vld [vmem:[#allocation2 + $0x1ca] sm:$0xff] }
 0x1d9   : > { %6815 = vmatmul.mubr.msk.bf16.gmra.mrb[24].mxu0 %vm413_vm3, %v3804_v15  ;;  %6618 = vmatprep.mubr.msk.bf16.mxu1 %vm413_vm3, %v8378_v0  ;;  %v3778_v0 = vld [vmem:[#allocation2 + $0x1d2] sm:$0xff] }
 0x1da   : > { %6818 = vmatprep.mubr.msk.bf16.mxu0 %vm413_vm3, %v3805_v28  ;;  %v3808_v59 = vpack.c.bf16 %v3778_v0, %v3777_v30 }
 0x1e0   : > { %6619 = vmatmul.mubr.msk.bf16.gmra.mrb[28].mxu1 %vm413_vm3, %v8380_v16  ;;  %v2092_v16 = vld [vmem:[#allocation2 + $0x1e1] sm:$0xff] }
 0x1e1   : > { %6819 = vmatmul.mubr.msk.bf16.gmra.mrb[28].mxu0 %vm413_vm3, %v3806_v53  ;;  %6622 = vmatprep.mubr.msk.bf16.mxu1 %vm413_vm3, %v8391_v54  ;;  %v3782_v54 = vld [vmem:[#allocation2 + $0x202] sm:$0xff]  ;;  %v2121_v42 = vpack.c.bf16 %v2093_v60, %v2092_v16 }
 0x1e2   : > { %6822 = vmatprep.mubr.msk.bf16.mxu0 %vm413_vm3, %v3807_v4  ;;  %v3810_v58 = vpack.c.bf16 %v3782_v54, %v3781_v21 }
 0x1e8   : > { %6623 = vmatmul.mubr.msk.bf16.gmra.mrb[32].mxu1 %vm413_vm3, %v8393_v57  ;;  %v2096_v57 = vld [vmem:[#allocation2 + $0x211] sm:$0xff] }
 0x1e9   : > { %6823 = vmatmul.mubr.msk.bf16.gmra.mrb[32].mxu0 %vm413_vm3, %v3808_v59  ;;  %6626 = vmatprep.mubr.msk.bf16.mxu1 %vm413_vm3, %v8403_v43  ;;  %v2097_v43 = vld [vmem:[#allocation2 + $0x219] sm:$0xff] }
 0x1ea   : > { %6826 = vmatprep.mubr.msk.bf16.mxu0 %vm413_vm3, %v3809_v50  ;;  %v2123_v32 = vpack.c.bf16 %v2097_v43, %v2096_v57 }
 0x1ef   : > { %s7237_s23 = spop %7236 }
 0x1f0   : > { %6627 = vmatmul.mubr.msk.bf16.gmra.mrb[36].mxu1 %vm413_vm3, %v2121_v42  ;;  %s4436_s5 = smul.f32 %s7237_s23, %s4432_s30 }
 0x1f1   : > { %6827 = vmatmul.mubr.msk.bf16.gmra.mrb[36].mxu0 %vm413_vm3, %v3810_v58  ;;  %6630 = vmatprep.mubr.msk.bf16.mxu1 %vm413_vm3, %v2122_v18 }
 0x1f2   : > { %6830 = vmatprep.mubr.msk.bf16.mxu0 %vm413_vm3, %v3811_v29 }
 0x1f8   : > { %6631 = vmatmul.mubr.msk.bf16.gmra.mrb[40].mxu1 %vm413_vm3, %v2123_v32 }
 0x1f9   : > { %6831 = vmatmul.mubr.msk.bf16.gmra.mrb[40].mxu0 %vm413_vm3, %v3812_v20  ;;  %6634 = vmatprep.mubr.msk.bf16.mxu1 %vm413_vm3, %v2124_v37 }
 0x1fa   : > { %6834 = vmatprep.mubr.msk.bf16.mxu0 %vm413_vm3, %v3813_v44 }
 0x200   : > { %6635 = vmatmul.mubr.msk.bf16.gmra.mrb[44].mxu1 %vm413_vm3, %v8421_v3 }
 0x201   : > { %6835 = vmatmul.mubr.msk.bf16.gmra.mrb[44].mxu0 %vm413_vm3, %v3814_v24 }
 0x24b   : > { %v6542_v26 = vpop.f32.mrb[0].mxu1 }
 0x24c   : > { %v1815_v47 = vpop.f32.mrb[1].mxu1 }
 0x24d   : > { %v6543_v1 = vpop.f32.mrb[2].mxu1 }
 0x24e   : > { %v1818_v36 = vpop.f32.mrb[3].mxu1 }
 0x253   : > { %v6546_v56 = vpop.f32.mrb[4].mxu1 }
 0x254   : > { %v1831_v11 = vpop.f32.mrb[5].mxu1 }
 0x255   : > { %v6547_v38 = vpop.f32.mrb[6].mxu1 }
 0x256   : > { %v1834_v49 = vpop.f32.mrb[7].mxu1 }
 0x25b   : > { %v6550_v51 = vpop.f32.mrb[8].mxu1 }
 0x25c   : > { %v1847_v3 = vpop.f32.mrb[9].mxu1 }
 0x25d   : > { %v6551_v5 = vpop.f32.mrb[10].mxu1 }
 0x25e   : > { %v1850_v17 = vpop.f32.mrb[11].mxu1 }
 0x263   : > { %v6554_v35 = vpop.f32.mrb[12].mxu1 }
 0x264   : > { %v1863_v22 = vpop.f32.mrb[13].mxu1 }
 0x265   : > { %v8505_v61 = vpop.f32.mrb[14].mxu1 }
 0x266   : > { %v8507_v33 = vpop.f32.mrb[15].mxu1 }
 0x26b   : > { %v8509_v23 = vpop.f32.mrb[16].mxu1 }
 0x26c   : > { %v8511_v39 = vpop.f32.mrb[17].mxu1 }
 0x26d   : > { %v8513_v6 = vpop.f32.mrb[18].mxu1 }
 0x26e   : > { %v8515_v41 = vpop.f32.mrb[19].mxu1 }
 0x273   : > { %v8517_v34 = vpop.f32.mrb[20].mxu1 }
 0x274   : > { %v8519_v15 = vpop.f32.mrb[21].mxu1 }
 0x275   : > { %v8521_v28 = vpop.f32.mrb[22].mxu1 }
 0x276   : > { %v8523_v10 = vpop.f32.mrb[23].mxu1 }
 0x27c   : > { %v6792_v25 = vpop.f32.mrb[0].mxu0 }
 0x27d   : > { %v8526_v48 = vadd.f32 %v6792_v25, %v6542_v26  ;;  %v3926_v52 = vpop.f32.mrb[1].mxu0 }
 0x27e   : > { %v8528_v53 = vadd.f32 %v3926_v52, %v1815_v47  ;;  %v6793_v4 = vpop.f32.mrb[2].mxu0 }
 0x27f   : > { %4169 = vst [vmem:[%s8530_s27 + $0x10] sm:$0xff] %v8526_v48  ;;  %v8534_v30 = vadd.f32 %v6793_v4, %v6543_v1  ;;  %v3929_v0 = vpop.f32.mrb[3].mxu0 }
 0x280   : > { %4167 = vst [vmem:[%s8530_s27] sm:$0xff] %v8528_v53  ;;  %v8538_v31 = vadd.f32 %v3929_v0, %v1818_v36 }
 0x281   : > { %4170 = vst [vmem:[%s8530_s27 + $0x18] sm:$0xff] %v8534_v30 }
 0x282   : > { %4168 = vst [vmem:[%s8530_s27 + $0x8] sm:$0xff] %v8538_v31  ;;  %v4215_v45 = vadd.f32 %v8538_v31, %v8528_v53 }
 0x284   : > { %v4216_v59 = vadd.f32 %v8526_v48, %v4215_v45  ;;  %v6796_v50 = vpop.f32.mrb[4].mxu0 }
 0x285   : > { %v8547_v16 = vadd.f32 %v6796_v50, %v6546_v56  ;;  %v3942_v60 = vpop.f32.mrb[5].mxu0 }
 0x286   : > { %v8549_v21 = vadd.f32 %v3942_v60, %v1831_v11  ;;  %v4217_v54 = vadd.f32 %v8534_v30, %v4216_v59  ;;  %v6797_v63 = vpop.f32.mrb[6].mxu0 }
 0x287   : > { %4173 = vst [vmem:[%s8530_s27 + $0x30] sm:$0xff] %v8547_v16  ;;  %v8554_v12 = vadd.f32 %v6797_v63, %v6547_v38  ;;  %v3945_v40 = vpop.f32.mrb[7].mxu0 }
 0x288   : > { %4171 = vst [vmem:[%s8530_s27 + $0x20] sm:$0xff] %v8549_v21  ;;  %v4218_v14 = vadd.f32 %v8549_v21, %v4217_v54  ;;  %v8559_v42 = vadd.f32 %v3945_v40, %v1834_v49 }
 0x289   : > { %4174 = vst [vmem:[%s8530_s27 + $0x38] sm:$0xff] %v8554_v12 }
 0x28a   : > { %4172 = vst [vmem:[%s8530_s27 + $0x28] sm:$0xff] %v8559_v42  ;;  %v4219_v58 = vadd.f32 %v8559_v42, %v4218_v14 }
 0x28c   : > { %v4220_v18 = vadd.f32 %v8547_v16, %v4219_v58  ;;  %v6800_v29 = vpop.f32.mrb[8].mxu0 }
 0x28d   : > { %v8567_v57 = vadd.f32 %v6800_v29, %v6550_v51  ;;  %v3958_v43 = vpop.f32.mrb[9].mxu0 }
 0x28e   : > { %v8569_v27 = vadd.f32 %v3958_v43, %v1847_v3  ;;  %v4221_v7 = vadd.f32 %v8554_v12, %v4220_v18  ;;  %v6801_v19 = vpop.f32.mrb[10].mxu0 }
 0x28f   : > { %4177 = vst [vmem:[%s8530_s27 + $0x50] sm:$0xff] %v8567_v57  ;;  %v8574_v8 = vadd.f32 %v6801_v19, %v6551_v5  ;;  %v3961_v9 = vpop.f32.mrb[11].mxu0 }
 0x290   : > { %4175 = vst [vmem:[%s8530_s27 + $0x40] sm:$0xff] %v8569_v27  ;;  %v4222_v2 = vadd.f32 %v8569_v27, %v4221_v7  ;;  %v8579_v32 = vadd.f32 %v3961_v9, %v1850_v17 }
 0x291   : > { %4178 = vst [vmem:[%s8530_s27 + $0x58] sm:$0xff] %v8574_v8 }
 0x292   : > { %4176 = vst [vmem:[%s8530_s27 + $0x48] sm:$0xff] %v8579_v32  ;;  %v4223_v20 = vadd.f32 %v8579_v32, %v4222_v2 }
 0x294   : > { %v4224_v37 = vadd.f32 %v8567_v57, %v4223_v20  ;;  %v6804_v44 = vpop.f32.mrb[12].mxu0 }
 0x295   : > { %v8587_v62 = vadd.f32 %v6804_v44, %v6554_v35  ;;  %v3974_v13 = vpop.f32.mrb[13].mxu0 }
 0x296   : > { %v8589_v24 = vadd.f32 %v3974_v13, %v1863_v22  ;;  %v4225_v46 = vadd.f32 %v8574_v8, %v4224_v37  ;;  %v6805_v55 = vpop.f32.mrb[14].mxu0 }
 0x297   : > { %4181 = vst [vmem:[%s8530_s27 + $0x70] sm:$0xff] %v8587_v62  ;;  %v8595_v26 = vadd.f32 %v6805_v55, %v8505_v61  ;;  %v3977_v47 = vpop.f32.mrb[15].mxu0 }
 0x298   : > { %4179 = vst [vmem:[%s8530_s27 + $0x60] sm:$0xff] %v8589_v24  ;;  %v4226_v1 = vadd.f32 %v8589_v24, %v4225_v46  ;;  %v8601_v36 = vadd.f32 %v3977_v47, %v8507_v33 }
 0x299   : > { %4182 = vst [vmem:[%s8530_s27 + $0x78] sm:$0xff] %v8595_v26 }
 0x29a   : > { %4180 = vst [vmem:[%s8530_s27 + $0x68] sm:$0xff] %v8601_v36  ;;  %v4227_v56 = vadd.f32 %v8601_v36, %v4226_v1 }
 0x29c   : > { %v4228_v11 = vadd.f32 %v8587_v62, %v4227_v56  ;;  %v6808_v38 = vpop.f32.mrb[16].mxu0 }
 0x29d   : > { %v8610_v49 = vadd.f32 %v6808_v38, %v8509_v23  ;;  %v3990_v51 = vpop.f32.mrb[17].mxu0 }
 0x29e   : > { %v8613_v3 = vadd.f32 %v3990_v51, %v8511_v39  ;;  %v4229_v5 = vadd.f32 %v8595_v26, %v4228_v11  ;;  %v6809_v17 = vpop.f32.mrb[18].mxu0 }
 0x29f   : > { %4185 = vst [vmem:[%s8530_s27 + $0x90] sm:$0xff] %v8610_v49  ;;  %v8619_v35 = vadd.f32 %v6809_v17, %v8513_v6  ;;  %v3993_v22 = vpop.f32.mrb[19].mxu0 }
 0x2a0   : > { %4183 = vst [vmem:[%s8530_s27 + $0x80] sm:$0xff] %v8613_v3  ;;  %v4230_v61 = vadd.f32 %v8613_v3, %v4229_v5  ;;  %v8625_v33 = vadd.f32 %v3993_v22, %v8515_v41 }
 0x2a1   : > { %4186 = vst [vmem:[%s8530_s27 + $0x98] sm:$0xff] %v8619_v35 }
 0x2a2   : > { %4184 = vst [vmem:[%s8530_s27 + $0x88] sm:$0xff] %v8625_v33  ;;  %v4231_v23 = vadd.f32 %v8625_v33, %v4230_v61 }
 0x2a4   : > { %v4232_v39 = vadd.f32 %v8610_v49, %v4231_v23  ;;  %v6812_v6 = vpop.f32.mrb[20].mxu0 }
 0x2a5   : > { %v8634_v25 = vadd.f32 %v6812_v6, %v8517_v34  ;;  %v4006_v52 = vpop.f32.mrb[21].mxu0 }
 0x2a6   : > { %v8637_v4 = vadd.f32 %v4006_v52, %v8519_v15  ;;  %v4233_v41 = vadd.f32 %v8619_v35, %v4232_v39  ;;  %v6813_v0 = vpop.f32.mrb[22].mxu0 }
 0x2a7   : > { %4189 = vst [vmem:[%s8530_s27 + $0xb0] sm:$0xff] %v8634_v25  ;;  %v8643_v45 = vadd.f32 %v6813_v0, %v8521_v28  ;;  %v4009_v59 = vpop.f32.mrb[23].mxu0 }
 0x2a8   : > { %4187 = vst [vmem:[%s8530_s27 + $0xa0] sm:$0xff] %v8637_v4  ;;  %v4234_v50 = vadd.f32 %v8637_v4, %v4233_v41  ;;  %v8649_v34 = vadd.f32 %v4009_v59, %v8523_v10 }
 0x2a9   : > { %4190 = vst [vmem:[%s8530_s27 + $0xb8] sm:$0xff] %v8643_v45 }
 0x2aa   : > { %4188 = vst [vmem:[%s8530_s27 + $0xa8] sm:$0xff] %v8649_v34  ;;  %v4235_v15 = vadd.f32 %v8649_v34, %v4234_v50 }
 0x2ab   : > { %v6616_v60 = vpop.f32.mrb[24].mxu1 }
 0x2ac   : > { %v4236_v28 = vadd.f32 %v8634_v25, %v4235_v15  ;;  %v2333_v54 = vpop.f32.mrb[25].mxu1  ;;  %v6816_v63 = vpop.f32.mrb[24].mxu0 }
 0x2ad   : > { %v8657_v40 = vadd.f32 %v6816_v63, %v6616_v60  ;;  %v6617_v14 = vpop.f32.mrb[26].mxu1  ;;  %v4022_v58 = vpop.f32.mrb[25].mxu0 }
 0x2ae   : > { %v8659_v10 = vadd.f32 %v4022_v58, %v2333_v54  ;;  %v4237_v18 = vadd.f32 %v8643_v45, %v4236_v28  ;;  %v2336_v29 = vpop.f32.mrb[27].mxu1  ;;  %v6817_v43 = vpop.f32.mrb[26].mxu0 }
 0x2af   : > { %4193 = vst [vmem:[%s8530_s27 + $0xd0] sm:$0xff] %v8657_v40  ;;  %v8664_v7 = vadd.f32 %v6817_v43, %v6617_v14  ;;  %v4025_v19 = vpop.f32.mrb[27].mxu0 }
 0x2b0   : > { %4191 = vst [vmem:[%s8530_s27 + $0xc0] sm:$0xff] %v8659_v10  ;;  %v4238_v9 = vadd.f32 %v8659_v10, %v4237_v18  ;;  %v8669_v2 = vadd.f32 %v4025_v19, %v2336_v29 }
 0x2b1   : > { %9562 = vst [vmem:[#allocation9_spill] sm:$0xff] %v8664_v7  ;;  %4194 = vst [vmem:[%s8530_s27 + $0xd8] sm:$0xff] %v8664_v7 }
 0x2b2   : > { %4192 = vst [vmem:[%s8530_s27 + $0xc8] sm:$0xff] %v8669_v2  ;;  %v4239_v20 = vadd.f32 %v8669_v2, %v4238_v9 }
 0x2b3   : > { %v6620_v37 = vpop.f32.mrb[28].mxu1 }
 0x2b4   : > { %v4240_v44 = vadd.f32 %v8657_v40, %v4239_v20  ;;  %v2349_v13 = vpop.f32.mrb[29].mxu1  ;;  %v6820_v46 = vpop.f32.mrb[28].mxu0 }
 0x2b5   : > { %v8677_v55 = vadd.f32 %v6820_v46, %v6620_v37  ;;  %v6621_v47 = vpop.f32.mrb[30].mxu1  ;;  %v4038_v1 = vpop.f32.mrb[29].mxu0 }
 0x2b6   : > { %v8679_v56 = vadd.f32 %v4038_v1, %v2349_v13  ;;  %v4241_v11 = vadd.f32 %v8664_v7, %v4240_v44  ;;  %v2352_v38 = vpop.f32.mrb[31].mxu1  ;;  %v6821_v51 = vpop.f32.mrb[30].mxu0 }
 0x2b7   : > { %4197 = vst [vmem:[%s8530_s27 + $0xf0] sm:$0xff] %v8677_v55  ;;  %v8684_v5 = vadd.f32 %v6821_v51, %v6621_v47  ;;  %v4041_v17 = vpop.f32.mrb[31].mxu0 }
 0x2b8   : > { %4195 = vst [vmem:[%s8530_s27 + $0xe0] sm:$0xff] %v8679_v56  ;;  %v4242_v22 = vadd.f32 %v8679_v56, %v4241_v11  ;;  %v8689_v61 = vadd.f32 %v4041_v17, %v2352_v38 }
 0x2b9   : > { %4198 = vst [vmem:[%s8530_s27 + $0xf8] sm:$0xff] %v8684_v5 }
 0x2ba   : > { %4196 = vst [vmem:[%s8530_s27 + $0xe8] sm:$0xff] %v8689_v61  ;;  %v4243_v23 = vadd.f32 %v8689_v61, %v4242_v22 }
 0x2bb   : > { %v6624_v39 = vpop.f32.mrb[32].mxu1 }
 0x2bc   : > { %v4244_v6 = vadd.f32 %v8677_v55, %v4243_v23  ;;  %v2365_v52 = vpop.f32.mrb[33].mxu1  ;;  %v6824_v41 = vpop.f32.mrb[32].mxu0 }
 0x2bd   : > { %v8697_v0 = vadd.f32 %v6824_v41, %v6624_v39  ;;  %v6625_v59 = vpop.f32.mrb[34].mxu1  ;;  %v4054_v50 = vpop.f32.mrb[33].mxu0 }
 0x2be   : > { %v8699_v15 = vadd.f32 %v4054_v50, %v2365_v52  ;;  %v4245_v60 = vadd.f32 %v8684_v5, %v4244_v6  ;;  %v2368_v28 = vpop.f32.mrb[35].mxu1  ;;  %v6825_v54 = vpop.f32.mrb[34].mxu0 }
 0x2bf   : > { %4201 = vst [vmem:[%s8530_s27 + $0x110] sm:$0xff] %v8697_v0  ;;  %v8704_v63 = vadd.f32 %v6825_v54, %v6625_v59  ;;  %v4057_v14 = vpop.f32.mrb[35].mxu0 }
 0x2c0   : > { %4199 = vst [vmem:[%s8530_s27 + $0x100] sm:$0xff] %v8699_v15  ;;  %v4246_v58 = vadd.f32 %v8699_v15, %v4245_v60  ;;  %v8709_v18 = vadd.f32 %v4057_v14, %v2368_v28 }
 0x2c1   : > { %4202 = vst [vmem:[%s8530_s27 + $0x118] sm:$0xff] %v8704_v63 }
 0x2c2   : > { %4200 = vst [vmem:[%s8530_s27 + $0x108] sm:$0xff] %v8709_v18  ;;  %v4247_v29 = vadd.f32 %v8709_v18, %v4246_v58 }
 0x2c3   : > { %v6628_v43 = vpop.f32.mrb[36].mxu1 }
 0x2c4   : > { %v4248_v19 = vadd.f32 %v8697_v0, %v4247_v29  ;;  %v2381_v9 = vpop.f32.mrb[37].mxu1  ;;  %v6828_v20 = vpop.f32.mrb[36].mxu0 }
 0x2c5   : > { %v8717_v37 = vadd.f32 %v6828_v20, %v6628_v43  ;;  %v6629_v44 = vpop.f32.mrb[38].mxu1  ;;  %v4070_v13 = vpop.f32.mrb[37].mxu0 }
 0x2c6   : > { %v8719_v46 = vadd.f32 %v4070_v13, %v2381_v9  ;;  %v4249_v47 = vadd.f32 %v8704_v63, %v4248_v19  ;;  %v2384_v1 = vpop.f32.mrb[39].mxu1  ;;  %v6829_v11 = vpop.f32.mrb[38].mxu0 }
 0x2c7   : > { %4205 = vst [vmem:[%s8530_s27 + $0x130] sm:$0xff] %v8717_v37  ;;  %v8724_v38 = vadd.f32 %v6829_v11, %v6629_v44  ;;  %v4073_v51 = vpop.f32.mrb[39].mxu0 }
 0x2c8   : > { %4203 = vst [vmem:[%s8530_s27 + $0x120] sm:$0xff] %v8719_v46  ;;  %v4250_v17 = vadd.f32 %v8719_v46, %v4249_v47  ;;  %v6879_v22 = vadd.f32 %v4073_v51, %v2384_v1 }
 0x2c9   : > { %4206 = vst [vmem:[%s8530_s27 + $0x138] sm:$0xff] %v8724_v38 }
 0x2ca   : > { %4204 = vst [vmem:[%s8530_s27 + $0x128] sm:$0xff] %v6879_v22  ;;  %v4251_v23 = vadd.f32 %v6879_v22, %v4250_v17 }
 0x2cb   : > { %v6632_v39 = vpop.f32.mrb[40].mxu1 }
 0x2cc   : > { %v4252_v6 = vadd.f32 %v8717_v37, %v4251_v23  ;;  %v2397_v52 = vpop.f32.mrb[41].mxu1  ;;  %v6832_v41 = vpop.f32.mrb[40].mxu0 }
 0x2cd   : > { %v6880_v59 = vadd.f32 %v6832_v41, %v6632_v39  ;;  %v6633_v50 = vpop.f32.mrb[42].mxu1  ;;  %v4086_v60 = vpop.f32.mrb[41].mxu0 }
 0x2ce   : > { %v6881_v28 = vadd.f32 %v4086_v60, %v2397_v52  ;;  %v4253_v54 = vadd.f32 %v8724_v38, %v4252_v6  ;;  %v2400_v14 = vpop.f32.mrb[43].mxu1  ;;  %v6833_v58 = vpop.f32.mrb[42].mxu0 }
 0x2cf   : > { %4209 = vst [vmem:[%s8530_s27 + $0x150] sm:$0xff] %v6880_v59  ;;  %v6882_v29 = vadd.f32 %v6833_v58, %v6633_v50  ;;  %v4089_v43 = vpop.f32.mrb[43].mxu0 }
 0x2d0   : > { %4207 = vst [vmem:[%s8530_s27 + $0x140] sm:$0xff] %v6881_v28  ;;  %v4254_v19 = vadd.f32 %v6881_v28, %v4253_v54  ;;  %v6883_v9 = vadd.f32 %v4089_v43, %v2400_v14 }
 0x2d1   : > { %4210 = vst [vmem:[%s8530_s27 + $0x158] sm:$0xff] %v6882_v29 }
 0x2d2   : > { %4208 = vst [vmem:[%s8530_s27 + $0x148] sm:$0xff] %v6883_v9  ;;  %v4255_v20 = vadd.f32 %v6883_v9, %v4254_v19 }
 0x2d3   : > { %v6636_v44 = vpop.f32.mrb[44].mxu1 }
 0x2d4   : > { %v4256_v13 = vadd.f32 %v6880_v59, %v4255_v20  ;;  %v2413_v47 = vpop.f32.mrb[45].mxu1  ;;  %v6836_v1 = vpop.f32.mrb[44].mxu0 }
 0x2d5   : > { %v6884_v11 = vadd.f32 %v6836_v1, %v6636_v44  ;;  %v6637_v51 = vpop.f32.mrb[46].mxu1  ;;  %v4102_v17 = vpop.f32.mrb[45].mxu0 }
 0x2d6   : > { %v6885_v23 = vadd.f32 %v4102_v17, %v2413_v47  ;;  %v4257_v39 = vadd.f32 %v6882_v29, %v4256_v13  ;;  %v2416_v6 = vpop.f32.mrb[47].mxu1  ;;  %v6837_v52 = vpop.f32.mrb[46].mxu0 }
 0x2d7   : > { %4213 = vst [vmem:[%s8530_s27 + $0x170] sm:$0xff] %v6884_v11  ;;  %v6886_v41 = vadd.f32 %v6837_v52, %v6637_v51  ;;  %v4105_v50 = vpop.f32.mrb[47].mxu0 }
 0x2d8   : > { %4211 = vst [vmem:[%s8530_s27 + $0x160] sm:$0xff] %v6885_v23  ;;  %v4258_v60 = vadd.f32 %v6885_v23, %v4257_v39  ;;  %v6887_v54 = vadd.f32 %v4105_v50, %v2416_v6 }
 0x2d9   : > { %4214 = vst [vmem:[%s8530_s27 + $0x178] sm:$0xff] %v6886_v41 }
 0x2da   : > { %4212 = vst [vmem:[%s8530_s27 + $0x168] sm:$0xff] %v6887_v54  ;;  %v4259_v14 = vadd.f32 %v6887_v54, %v4258_v60 }
 0x2dc   : > { %v4260_v58 = vadd.f32 %v6884_v11, %v4259_v14 }
 0x2de   : > { %v4261_v43 = vadd.f32 %v6886_v41, %v4260_v58 }
 0x2e0   : > { %v4262_v19 = vrot.slane %v4261_v43, 4 }
 0x2e2   : > { %v4263_v20 = vadd.f32 %v4262_v19, %v4261_v43  ;;  %v4437_v19 = vstv %s4436_s5 }
 0x2e4   : > { %v4264_v44 = vrot.slane %v4263_v20, 2 }
 0x2e6   : > { %v4265_v1 = vadd.f32 %v4264_v44, %v4263_v20 }
 0x2e8   : > { %v4266_v7 = vrot.slane %v4265_v1, 1 }
 0x2ea   : > { %v4267_v47 = vadd.f32 %v4266_v7, %v4265_v1 }
 0x2ec   : > { %v8742_v13 = vmul.f32 0.0026041667, %v4267_v47 }
 0x2ee   : > { %v8746_v51 = vsub.f32 %v8679_v56, %v8742_v13  ;;  %v8750_v17 = vsub.f32 %v8689_v61, %v8742_v13  ;;  %v8754_v39 = vsub.f32 %v8677_v55, %v8742_v13  ;;  %v8758_v6 = vsub.f32 %v8684_v5, %v8742_v13 }
 0x2ef   : > { %v8762_v7 = vsub.f32 %v8699_v15, %v8742_v13  ;;  %v8766_v56 = vsub.f32 %v8709_v18, %v8742_v13  ;;  %v8770_v61 = vsub.f32 %v8697_v0, %v8742_v13  ;;  %v8774_v55 = vsub.f32 %v8704_v63, %v8742_v13 }
 0x2f0   : > { %v8778_v5 = vsub.f32 %v8719_v46, %v8742_v13  ;;  %v8781_v15 = vsub.f32 %v6879_v22, %v8742_v13  ;;  %v8785_v18 = vsub.f32 %v8717_v37, %v8742_v13  ;;  %v8789_v0 = vsub.f32 %v8724_v38, %v8742_v13 }
 0x2f1   : > { %v8792_v52 = vsub.f32 %v6881_v28, %v8742_v13  ;;  %v8795_v63 = vsub.f32 %v6883_v9, %v8742_v13  ;;  %v8798_v46 = vsub.f32 %v6880_v59, %v8742_v13  ;;  %v8801_v22 = vsub.f32 %v6882_v29, %v8742_v13 }
 0x2f2   : > { %v8804_v50 = vsub.f32 %v6885_v23, %v8742_v13  ;;  %v8807_v37 = vsub.f32 %v6887_v54, %v8742_v13  ;;  %v8810_v38 = vsub.f32 %v6884_v11, %v8742_v13  ;;  %v8813_v28 = vsub.f32 %v6886_v41, %v8742_v13  ;;  %v4419_v54 = vld [vmem:[#allocation4] sm:$0x1] }
 0x2f3   : > { %v4269_v9 = vsub.f32 %v8528_v53, %v8742_v13  ;;  %v4270_v59 = vsub.f32 %v8538_v31, %v8742_v13  ;;  %v4271_v29 = vsub.f32 %v8526_v48, %v8742_v13  ;;  %v4272_v11 = vsub.f32 %v8534_v30, %v8742_v13 }
 0x2f4   : > { %9563 = vst [vmem:[#allocation10_spill] sm:$0xff] %v8813_v28  ;;  %v4425_v41 = vstv %s7237_s23  ;;  %v4273_v53 = vsub.f32 %v8549_v21, %v8742_v13  ;;  %v4420_v31 = vsub.f32 %v8742_v13, %v4419_v54  ;;  %v4274_v43 = vsub.f32 %v8559_v42, %v8742_v13 }
 0x2f5   : > { %v4317_v23 = vmul.f32 %v4269_v9, %v4269_v9  ;;  %v4318_v60 = vmul.f32 %v4270_v59, %v4270_v59  ;;  %v4319_v14 = vmul.f32 %v4271_v29, %v4271_v29  ;;  %v4320_v48 = vmul.f32 %v4272_v11, %v4272_v11 }
 0x2f6   : > { %v4426_v44 = vmul.f32 %v4425_v41, %v4420_v31  ;;  %v4431_v1 = vmul.f32 %v4420_v31, %v4420_v31  ;;  %v4275_v47 = vsub.f32 %v8547_v16, %v8742_v13  ;;  %v4321_v30 = vmul.f32 %v4273_v53, %v4273_v53 }
 0x2f7   : > { %v4365_v58 = vadd.f32 %v4318_v60, %v4317_v23  ;;  %v4276_v21 = vsub.f32 %v8554_v12, %v8742_v13  ;;  %v4322_v29 = vmul.f32 %v4274_v43, %v4274_v43  ;;  %v4277_v42 = vsub.f32 %v8569_v27, %v8742_v13 }
 0x2f8   : > { %v4427_v59 = vadd.f32 %v4426_v44, %v4419_v54  ;;  %v8832_v28 = vmul.f32 %v4437_v19, %v4431_v1  ;;  %v4323_v60 = vmul.f32 %v4275_v47, %v4275_v47  ;;  %v4278_v41 = vsub.f32 %v8579_v32, %v8742_v13 }
 0x2f9   : > { %v4366_v20 = vadd.f32 %v4365_v58, %v4319_v14  ;;  %v4324_v16 = vmul.f32 %v4276_v21, %v4276_v21  ;;  %v4279_v54 = vsub.f32 %v8567_v57, %v8742_v13  ;;  %v4325_v14 = vmul.f32 %v4277_v42, %v4277_v42 }
 0x2fa   : > { %4428 = vst [vmem:[#allocation4] sm:$0x1] %v4427_v59  ;;  %v4280_v12 = vsub.f32 %v8574_v8, %v8742_v13  ;;  %v4326_v31 = vmul.f32 %v4278_v41, %v4278_v41  ;;  %v4281_v27 = vsub.f32 %v8589_v24, %v8742_v13  ;;  %v4282_v32 = vsub.f32 %v8601_v36, %v8742_v13 }
 0x2fb   : > { %v4367_v9 = vadd.f32 %v4366_v20, %v4320_v48  ;;  %v4327_v19 = vmul.f32 %v4279_v54, %v4279_v54  ;;  %v4283_v57 = vsub.f32 %v8587_v62, %v8742_v13  ;;  %v4284_v8 = vsub.f32 %v8595_v26, %v8742_v13 }
 0x2fc   : > { %v4328_v20 = vmul.f32 %v4280_v12, %v4280_v12  ;;  %v4329_v1 = vmul.f32 %v4281_v27, %v4281_v27  ;;  %v4285_v24 = vsub.f32 %v8613_v3, %v8742_v13  ;;  %v4286_v36 = vsub.f32 %v8625_v33, %v8742_v13 }
 0x2fd   : > { %v4368_v23 = vadd.f32 %v4367_v9, %v4321_v30  ;;  %v4330_v30 = vmul.f32 %v4282_v32, %v4282_v32  ;;  %v4331_v59 = vmul.f32 %v4283_v57, %v4283_v57  ;;  %v4287_v62 = vsub.f32 %v8610_v49, %v8742_v13  ;;  %v9564_v57 = vld [vmem:[#allocation9_spill] sm:$0xff] }
 0x2fe   : > { %v4333_v42 = vmul.f32 %v4285_v24, %v4285_v24  ;;  %v4288_v26 = vsub.f32 %v8619_v35, %v8742_v13  ;;  %v4289_v3 = vsub.f32 %v8637_v4, %v8742_v13  ;;  %v4290_v33 = vsub.f32 %v8649_v34, %v8742_v13 }
 0x2ff   : > { %v4369_v11 = vadd.f32 %v4368_v23, %v4322_v29  ;;  %v4332_v29 = vmul.f32 %v4284_v8, %v4284_v8  ;;  %v4291_v49 = vsub.f32 %v8634_v25, %v8742_v13  ;;  %v4292_v35 = vsub.f32 %v8643_v45, %v8742_v13 }
 0x300   : > { %v4336_v54 = vmul.f32 %v4288_v26, %v4288_v26  ;;  %v4293_v4 = vsub.f32 %v8659_v10, %v8742_v13  ;;  %v4294_v34 = vsub.f32 %v8669_v2, %v8742_v13  ;;  %v4295_v25 = vsub.f32 %v8657_v40, %v8742_v13 }
 0x301   : > { %v4370_v53 = vadd.f32 %v4369_v11, %v4323_v60  ;;  %v4334_v11 = vmul.f32 %v4286_v36, %v4286_v36  ;;  %v4339_v27 = vmul.f32 %v4291_v49, %v4291_v49  ;;  %v4296_v45 = vsub.f32 %v9564_v57, %v8742_v13 }
 0x302   : > { %v4343_v8 = vmul.f32 %v4295_v25, %v4295_v25  ;;  %v4345_v24 = vmul.f32 %v8746_v51, %v8746_v51  ;;  %v4347_v40 = vmul.f32 %v8754_v39, %v8754_v39  ;;  %v4348_v13 = vmul.f32 %v8758_v6, %v8758_v6 }
 0x303   : > { %v4371_v58 = vadd.f32 %v4370_v53, %v4324_v16  ;;  %v4335_v16 = vmul.f32 %v4287_v62, %v4287_v62  ;;  %v4344_v10 = vmul.f32 %v4296_v45, %v4296_v45  ;;  %v4350_v51 = vmul.f32 %v8766_v56, %v8766_v56 }
 0x304   : > { %v4352_v39 = vmul.f32 %v8774_v55, %v8774_v55  ;;  %v4353_v6 = vmul.f32 %v8778_v5, %v8778_v5  ;;  %v4355_v56 = vmul.f32 %v8785_v18, %v8785_v18  ;;  %v4357_v55 = vmul.f32 %v8792_v52, %v8792_v52 }
 0x305   : > { %v4372_v43 = vadd.f32 %v4371_v58, %v4325_v14  ;;  %v4337_v58 = vmul.f32 %v4289_v3, %v4289_v3  ;;  %v4358_v5 = vmul.f32 %v8795_v63, %v8795_v63  ;;  %v4360_v18 = vmul.f32 %v8801_v22, %v8801_v22 }
 0x306   : > { %v4362_v52 = vmul.f32 %v8807_v37, %v8807_v37  ;;  %v4363_v63 = vmul.f32 %v8810_v38, %v8810_v38 }
 0x307   : > { %v4373_v48 = vadd.f32 %v4372_v43, %v4326_v31  ;;  %v4338_v31 = vmul.f32 %v4290_v33, %v4290_v33 }
 0x309   : > { %v4374_v44 = vadd.f32 %v4373_v48, %v4327_v19  ;;  %v4340_v48 = vmul.f32 %v4292_v35, %v4292_v35  ;;  %v9565_v35 = vld [vmem:[#allocation10_spill] sm:$0xff] }
 0x30b   : > { %v4375_v47 = vadd.f32 %v4374_v44, %v4328_v20  ;;  %v4341_v20 = vmul.f32 %v4293_v4, %v4293_v4 }
 0x30d   : > { %v4376_v9 = vadd.f32 %v4375_v47, %v4329_v1  ;;  %v4342_v1 = vmul.f32 %v4294_v34, %v4294_v34 }
 0x30f   : > { %v4377_v21 = vadd.f32 %v4376_v9, %v4330_v30 }
 0x311   : > { %v4378_v23 = vadd.f32 %v4377_v21, %v4331_v59  ;;  %v4346_v59 = vmul.f32 %v8750_v17, %v8750_v17  ;;  %v4351_v17 = vmul.f32 %v8770_v61, %v8770_v61  ;;  %v4356_v61 = vmul.f32 %v8789_v0, %v8789_v0 }
 0x312   : > { %v4361_v0 = vmul.f32 %v8804_v50, %v8804_v50  ;;  %v4429_v50 = vld [vmem:[#allocation5] sm:$0x1] }
 0x313   : > { %v4379_v60 = vadd.f32 %v4378_v23, %v4332_v29  ;;  %v4349_v23 = vmul.f32 %v8762_v7, %v8762_v7  ;;  %v4354_v7 = vmul.f32 %v8781_v15, %v8781_v15  ;;  %v4359_v15 = vmul.f32 %v8798_v46, %v8798_v46 }
 0x314   : > { %v4364_v46 = vmul.f32 %v9565_v35, %v9565_v35 }
 0x315   : > { %v4380_v41 = vadd.f32 %v4379_v60, %v4333_v42 }
 0x317   : > { %v4381_v53 = vadd.f32 %v4380_v41, %v4334_v11 }
 0x319   : > { %v4382_v14 = vadd.f32 %v4381_v53, %v4335_v16 }
 0x31b   : > { %v4383_v12 = vadd.f32 %v4382_v14, %v4336_v54 }
 0x31d   : > { %v4384_v43 = vadd.f32 %v4383_v12, %v4337_v58 }
 0x31f   : > { %v4385_v19 = vadd.f32 %v4384_v43, %v4338_v31 }
 0x321   : > { %v4386_v32 = vadd.f32 %v4385_v19, %v4339_v27 }
 0x323   : > { %v4387_v44 = vadd.f32 %v4386_v32, %v4340_v48 }
 0x325   : > { %v4388_v47 = vadd.f32 %v4387_v44, %v4341_v20 }
 0x327   : > { %v4389_v30 = vadd.f32 %v4388_v47, %v4342_v1 }
 0x329   : > { %v4390_v9 = vadd.f32 %v4389_v30, %v4343_v8 }
 0x32b   : > { %v4391_v2 = vadd.f32 %v4390_v9, %v4344_v10 }
 0x32d   : > { %v4392_v21 = vadd.f32 %v4391_v2, %v4345_v24 }
 0x32f   : > { %v4393_v36 = vadd.f32 %v4392_v21, %v4346_v59 }
 0x331   : > { %v4394_v29 = vadd.f32 %v4393_v36, %v4347_v40 }
 0x333   : > { %v4395_v62 = vadd.f32 %v4394_v29, %v4348_v13 }
 0x335   : > { %v4396_v42 = vadd.f32 %v4395_v62, %v4349_v23 }
 0x337   : > { %v4397_v60 = vadd.f32 %v4396_v42, %v4350_v51 }
 0x339   : > { %v4398_v26 = vadd.f32 %v4397_v60, %v4351_v17 }
 0x33b   : > { %v4399_v11 = vadd.f32 %v4398_v26, %v4352_v39 }
 0x33d   : > { %v4400_v41 = vadd.f32 %v4399_v11, %v4353_v6 }
 0x33f   : > { %v4401_v3 = vadd.f32 %v4400_v41, %v4354_v7 }
 0x341   : > { %v4402_v16 = vadd.f32 %v4401_v3, %v4355_v56 }
 0x343   : > { %v4403_v53 = vadd.f32 %v4402_v16, %v4356_v61 }
 0x345   : > { %v4404_v33 = vadd.f32 %v4403_v53, %v4357_v55 }
 0x347   : > { %v4405_v54 = vadd.f32 %v4404_v33, %v4358_v5 }
 0x349   : > { %v4406_v14 = vadd.f32 %v4405_v54, %v4359_v15 }
 0x34b   : > { %v4407_v49 = vadd.f32 %v4406_v14, %v4360_v18 }
 0x34d   : > { %v4408_v58 = vadd.f32 %v4407_v49, %v4361_v0 }
 0x34f   : > { %v4409_v12 = vadd.f32 %v4408_v58, %v4362_v52 }
 0x351   : > { %v4410_v31 = vadd.f32 %v4409_v12, %v4363_v63 }
 0x353   : > { %v4411_v43 = vadd.f32 %v4410_v31, %v4364_v46 }
 0x355   : > { %v4412_v4 = vrot.slane %v4411_v43, 4 }
 0x357   : > { %v4413_v22 = vadd.f32 %v4412_v4, %v4411_v43 }
 0x359   : > { %v4414_v27 = vrot.slane %v4413_v22, 2 }
 0x35b   : > { %v4415_v19 = vadd.f32 %v4414_v27, %v4413_v22 }
 0x35d   : > { %v4416_v34 = vrot.slane %v4415_v19, 1 }
 0x35f   : > { %v4417_v48 = vadd.f32 %v4416_v34, %v4415_v19 }
 0x361   : > { %v4430_v32 = vadd.f32 %v4429_v50, %v4417_v48 }
 0x363   : > { %v4439_v37 = vadd.f32 %v8832_v28, %v4430_v32 }
 0x365   : > { %4440 = vst [vmem:[#allocation5] sm:$0x1] %v4439_v37 }
 0x366 PF: > { %p5753_p1 = scmp.ne.s32.totalorder %s7591_s19, 1 }
 0x367   : > { %v4506_v44 = vlaneseq (!%p5753_p1)  ;;  %s4455_s6 = smul.u32 (!%p5753_p1), 384, %s7587_s18  ;;  %v4447_v45 = vld [vmem:[%s9556_s2] sm:$0x1] (!%p5753_p1)  ;;  %v4452_v28 = vld [vmem:[#allocation4] sm:$0x1] (!%p5753_p1) }
 0x368   : > { %4444 = sbr.rel (%p5753_p1) target bundleno = 1091 (0x443), region = 48  ;;  %v4451_v30 = vld [vmem:[%s9557_s3] sm:$0x1] (!%p5753_p1) }
 0x369   : > { %v4507_v57 = vshrl.u32 (!%p5753_p1), %v4506_v44, 7  ;;  %s8925_s13 = scalar_lea.vmem (!%p5753_p1), [#allocation3], %s4455_s6 }
 0x36a   : > { %v4457_v10 = vld [vmem:[%s8925_s13] sm:$0xff] (!%p5753_p1)  ;;  %v4458_v9 = vld [vmem:[%s8925_s13 + $0x8] sm:$0xff] (!%p5753_p1)  ;;  %v4459_v24 = vld [vmem:[%s8925_s13 + $0x10] sm:$0xff] (!%p5753_p1) }
 0x36b   : > { %v4508_v1 = vsub.s32 (!%p5753_p1), 0, %v4507_v57  ;;  %v4460_v21 = vld [vmem:[%s8925_s13 + $0x18] sm:$0xff] (!%p5753_p1)  ;;  %v4461_v40 = vld [vmem:[%s8925_s13 + $0x20] sm:$0xff] (!%p5753_p1)  ;;  %v4462_v36 = vld [vmem:[%s8925_s13 + $0x28] sm:$0xff] (!%p5753_p1) }
 0x36c   : > { %v4445_v38 = vld [vmem:[#allocation5] sm:$0x1] (!%p5753_p1)  ;;  %v4464_v42 = vld [vmem:[%s8925_s13 + $0x38] sm:$0xff] (!%p5753_p1)  ;;  %v4465_v7 = vld [vmem:[%s8925_s13 + $0x40] sm:$0xff] (!%p5753_p1) }
 0x36d   : > { %v4446_v25 = vmul.f32 (!%p5753_p1), 0.0013020834, %v4445_v38  ;;  %v4463_v13 = vld [vmem:[%s8925_s13 + $0x30] sm:$0xff] (!%p5753_p1)  ;;  %v4466_v16 = vld [vmem:[%s8925_s13 + $0x48] sm:$0xff] (!%p5753_p1)  ;;  %v4468_v14 = vld [vmem:[%s8925_s13 + $0x58] sm:$0xff] (!%p5753_p1) }
 0x36e   : > { %v4467_v18 = vld [vmem:[%s8925_s13 + $0x50] sm:$0xff] (!%p5753_p1)  ;;  %v4469_v63 = vld [vmem:[%s8925_s13 + $0x60] sm:$0xff] (!%p5753_p1)  ;;  %v4470_v32 = vld [vmem:[%s8925_s13 + $0x68] sm:$0xff] (!%p5753_p1) }
 0x36f   : > { %v4448_v20 = vadd.f32 1e-05, %v4446_v25 }
 0x371   : > { %7315 = vrsqrt.f32 %v4448_v20 }
 0x37b   : > { %v7316_v47 = vpop.eup %7315 }
 0x37c   : > { %v4450_v8 = vmul.f32 %v7316_v47, %v4447_v45 }
 0x37e   : > { %v4453_v2 = vmul.f32 %v4452_v28, %v4450_v8  ;;  %v8930_v59 = vrot.slane %v4450_v8, %v4508_v1 }
 0x380   : > { %v4454_v29 = vsub.f32 %v4451_v30, %v4453_v2  ;;  %v4511_v23 = vmul.f32 %v8930_v59, %v4457_v10  ;;  %v4512_v62 = vmul.f32 %v8930_v59, %v4458_v9  ;;  %v4513_v51 = vmul.f32 %v8930_v59, %v4459_v24  ;;  %v4471_v10 = vld [vmem:[%s8925_s13 + $0x70] sm:$0xff]  ;;  %v4472_v2 = vld [vmem:[%s8925_s13 + $0x78] sm:$0xff] }
 0x381   : > { %v4514_v17 = vmul.f32 %v8930_v59, %v4460_v21  ;;  %v4515_v60 = vmul.f32 %v8930_v59, %v4461_v40  ;;  %v4516_v39 = vmul.f32 %v8930_v59, %v4462_v36  ;;  %v4517_v6 = vmul.f32 %v8930_v59, %v4463_v13 }
 0x382   : > { %v8943_v26 = vrot.slane %v4454_v29, %v4508_v1  ;;  %v4518_v11 = vmul.f32 %v8930_v59, %v4464_v42  ;;  %v4519_v54 = vmul.f32 %v8930_v59, %v4465_v7  ;;  %v4520_v58 = vmul.f32 %v8930_v59, %v4466_v16  ;;  %v4473_v42 = vld [vmem:[%s8925_s13 + $0x80] sm:$0xff] }
 0x383   : > { %v4521_v22 = vmul.f32 %v8930_v59, %v4467_v18  ;;  %v4522_v27 = vmul.f32 %v8930_v59, %v4468_v14  ;;  %v4523_v37 = vmul.f32 %v8930_v59, %v4469_v63  ;;  %v4524_v28 = vmul.f32 %v8930_v59, %v4470_v32 }
 0x384   : > { %v8949_v41 = vadd.f32 %v8943_v26, %v4511_v23  ;;  %v8952_v56 = vadd.f32 %v8943_v26, %v4512_v62  ;;  %v8955_v3 = vadd.f32 %v8943_v26, %v4513_v51  ;;  %v8958_v61 = vadd.f32 %v8943_v26, %v4514_v17 }
 0x385   : > { %v8962_v55 = vadd.f32 %v8943_v26, %v4515_v60  ;;  %v8965_v53 = vadd.f32 %v8943_v26, %v4516_v39  ;;  %v8970_v15 = vadd.f32 %v8943_v26, %v4517_v6  ;;  %v8978_v52 = vadd.f32 %v8943_v26, %v4518_v11  ;;  %v4474_v6 = vld [vmem:[%s8925_s13 + $0x88] sm:$0xff] }
 0x386   : > { %v4613_v5 = vmin.f32 %v8949_v41, 20.0  ;;  %v4614_v33 = vmin.f32 %v8952_v56, 20.0  ;;  %v4615_v0 = vmin.f32 %v8955_v3, 20.0  ;;  %v4616_v49 = vmin.f32 %v8958_v61, 20.0 }
 0x387   : > { %v4617_v46 = vmin.f32 %v8962_v55, 20.0  ;;  %v4618_v31 = vmin.f32 %v8965_v53, 20.0  ;;  %v4619_v34 = vmin.f32 %v8970_v15, 20.0  ;;  %v4620_v48 = vmin.f32 %v8978_v52, 20.0 }
 0x388   : > { %v4661_v12 = vmul.f32 1.442695, %v4613_v5  ;;  %v4663_v35 = vmul.f32 1.442695, %v4614_v33  ;;  %v4665_v43 = vmul.f32 1.442695, %v4615_v0  ;;  %v8991_v25 = vadd.f32 %v8943_v26, %v4519_v54 }
 0x389   : > { %v4667_v4 = vmul.f32 1.442695, %v4616_v49  ;;  %v4669_v19 = vmul.f32 1.442695, %v4617_v46  ;;  %v4671_v50 = vmul.f32 1.442695, %v4618_v31  ;;  %v8994_v20 = vadd.f32 %v8943_v26, %v4520_v58 }
 0x38a   : > { %7317 = vpow2.f32 %v4661_v12  ;;  %v4673_v38 = vmul.f32 1.442695, %v4619_v34  ;;  %v4675_v44 = vmul.f32 1.442695, %v4620_v48  ;;  %v8997_v57 = vadd.f32 %v8943_v26, %v4521_v22 }
 0x38b   : > { %7319 = vpow2.f32 %v4663_v35  ;;  %v9000_v45 = vadd.f32 %v8943_v26, %v4522_v27  ;;  %v4621_v1 = vmin.f32 %v8991_v25, 20.0  ;;  %v4622_v47 = vmin.f32 %v8994_v20, 20.0 }
 0x38c   : > { %7321 = vpow2.f32 %v4665_v43  ;;  %v4623_v8 = vmin.f32 %v8997_v57, 20.0  ;;  %v9010_v36 = vadd.f32 %v8943_v26, %v4523_v37  ;;  %v9013_v13 = vadd.f32 %v8943_v26, %v4524_v28 }
 0x38d   : > { %7323 = vpow2.f32 %v4667_v4  ;;  %v4624_v30 = vmin.f32 %v9000_v45, 20.0  ;;  %v4677_v9 = vmul.f32 1.442695, %v4621_v1  ;;  %v4679_v24 = vmul.f32 1.442695, %v4622_v47 }
 0x38e   : > { %7325 = vpow2.f32 %v4669_v19  ;;  %v4681_v21 = vmul.f32 1.442695, %v4623_v8  ;;  %v4525_v29 = vmul.f32 %v8930_v59, %v4471_v10  ;;  %v4526_v23 = vmul.f32 %v8930_v59, %v4472_v2 }
 0x38f   : > { %7327 = vpow2.f32 %v4671_v50  ;;  %v4683_v40 = vmul.f32 1.442695, %v4624_v30  ;;  %v4625_v51 = vmin.f32 %v9010_v36, 20.0  ;;  %v4626_v39 = vmin.f32 %v9013_v13, 20.0 }
 0x390   : > { %7329 = vpow2.f32 %v4673_v38  ;;  %v9022_v5 = vadd.f32 %v8943_v26, %v4525_v29  ;;  %v9025_v14 = vadd.f32 %v8943_v26, %v4526_v23  ;;  %v9028_v0 = vmul.f32 %v8930_v59, %v4473_v42 }
 0x391   : > { %7331 = vpow2.f32 %v4675_v44  ;;  %v4685_v16 = vmul.f32 1.442695, %v4625_v51  ;;  %v9031_v12 = vmul.f32 %v8930_v59, %v4474_v6  ;;  %v9033_v4 = vmul.f32 1.442695, %v4626_v39 }
 0x392   : > { %7333 = vpow2.f32 %v4677_v9  ;;  %v4627_v50 = vmin.f32 %v9022_v5, 20.0  ;;  %v4628_v38 = vmin.f32 %v9025_v14, 20.0  ;;  %vm5045_vm4 = vcmp.gt.f32.partialorder %v8949_v41, 20.0 }
 0x393   : > { %7335 = vpow2.f32 %v4679_v24  ;;  %vm5046_vm5 = vcmp.gt.f32.partialorder %v8952_v56, 20.0  ;;  %vm5047_vm6 = vcmp.gt.f32.partialorder %v8955_v3, 20.0  ;;  %vm5048_vm7 = vcmp.gt.f32.partialorder %v8958_v61, 20.0 }
 0x394   : > { %v7318_v62 = vpop.eup %7317  ;;  %7337 = vpow2.f32 %v4681_v21  ;;  %vm5049_vm8 = vcmp.gt.f32.partialorder %v8962_v55, 20.0  ;;  %vm5050_vm9 = vcmp.gt.f32.partialorder %v8965_v53, 20.0  ;;  %vm5051_vm10 = vcmp.gt.f32.partialorder %v8970_v15, 20.0 }
 0x395   : > { %v7320_v17 = vpop.eup %7319  ;;  %v4757_v60 = vadd.f32 1.0, %v7318_v62  ;;  %7339 = vpow2.f32 %v4683_v40  ;;  %vm5052_vm11 = vcmp.gt.f32.partialorder %v8978_v52, 20.0  ;;  %vm5053_vm12 = vcmp.gt.f32.partialorder %v8991_v25, 20.0 }
 0x396   : > { %v7322_v11 = vpop.eup %7321  ;;  %v4758_v7 = vadd.f32 1.0, %v7320_v17  ;;  %7341 = vpow2.f32 %v4685_v16  ;;  %vm5054_vm13 = vcmp.gt.f32.partialorder %v8994_v20, 20.0  ;;  %vm5055_vm14 = vcmp.gt.f32.partialorder %v8997_v57, 20.0 }
 0x397   : > { %v7324_v33 = vpop.eup %7323  ;;  %v4805_v54 = vmul.f32 %v4757_v60, %v4757_v60  ;;  %v4759_v18 = vadd.f32 1.0, %v7322_v11  ;;  %vm5056_vm15 = vcmp.gt.f32.partialorder %v9000_v45, 20.0  ;;  %vm5057_vm0 = vcmp.gt.f32.partialorder %v9010_v36, 20.0 }
 0x398   : > { %v7326_v49 = vpop.eup %7325  ;;  %v4806_v58 = vmul.f32 %v4758_v7, %v4758_v7  ;;  %v4760_v63 = vadd.f32 1.0, %v7324_v33  ;;  %vm5058_vm1 = vcmp.gt.f32.partialorder %v9013_v13, 20.0  ;;  %vm5059_vm2 = vcmp.gt.f32.partialorder %v9022_v5, 20.0 }
 0x399   : > { %v7328_v35 = vpop.eup %7327  ;;  %v4901_v46 = vadd.f32 1.0, %v4805_v54  ;;  %v4807_v31 = vmul.f32 %v4759_v18, %v4759_v18  ;;  %v4761_v43 = vadd.f32 1.0, %v7326_v49  ;;  %v5754_v1 = vadd.f32 -1.0, %v4805_v54 }
 0x39a   : > { %v7330_v22 = vpop.eup %7329  ;;  %v4902_v27 = vadd.f32 1.0, %v4806_v58  ;;  %v4808_v19 = vmul.f32 %v4760_v63, %v4760_v63  ;;  %v4762_v34 = vadd.f32 1.0, %v7328_v35  ;;  %v5755_v30 = vadd.f32 -1.0, %v4806_v58 }
 0x39b   : > { %v7332_v48 = vpop.eup %7331  ;;  %7343 = vrcp.f32 %v4901_v46  ;;  %v4903_v32 = vadd.f32 1.0, %v4807_v31  ;;  %v4809_v37 = vmul.f32 %v4761_v43, %v4761_v43  ;;  %v4763_v9 = vadd.f32 1.0, %v7330_v22 }
 0x39c   : > { %v7334_v44 = vpop.eup %7333  ;;  %7345 = vrcp.f32 %v4902_v27  ;;  %v4904_v47 = vadd.f32 1.0, %v4808_v19  ;;  %v4810_v28 = vmul.f32 %v4762_v34, %v4762_v34  ;;  %v5756_v2 = vadd.f32 -1.0, %v4807_v31 }
 0x39d   : > { %v7336_v8 = vpop.eup %7335  ;;  %7347 = vrcp.f32 %v4903_v32  ;;  %v4905_v10 = vadd.f32 1.0, %v4809_v37  ;;  %v4764_v40 = vadd.f32 1.0, %v7332_v48  ;;  %v4811_v23 = vmul.f32 %v4763_v9, %v4763_v9 }
 0x39e   : > { %v7338_v24 = vpop.eup %7337  ;;  %7349 = vrcp.f32 %v4904_v47  ;;  %v4906_v21 = vadd.f32 1.0, %v4810_v28  ;;  %v4765_v62 = vadd.f32 1.0, %v7334_v44  ;;  %v4766_v51 = vadd.f32 1.0, %v7336_v8 }
 0x39f   : > { %v7340_v29 = vpop.eup %7339  ;;  %7351 = vrcp.f32 %v4905_v10  ;;  %v4812_v42 = vmul.f32 %v4764_v40, %v4764_v40  ;;  %v4767_v17 = vadd.f32 1.0, %v7338_v24  ;;  %v5757_v39 = vadd.f32 -1.0, %v4808_v19 }
 0x3a0   : > { %7353 = vrcp.f32 %v4906_v21  ;;  %v4768_v60 = vadd.f32 1.0, %v7340_v29  ;;  %v4907_v6 = vadd.f32 1.0, %v4811_v23  ;;  %v4813_v11 = vmul.f32 %v4765_v62, %v4765_v62  ;;  %v7342_v16 = vpop.eup %7341 }
 0x3a1   : > { %v4814_v7 = vmul.f32 %v4766_v51, %v4766_v51  ;;  %v5758_v33 = vadd.f32 -1.0, %v4809_v37  ;;  %v4908_v54 = vadd.f32 1.0, %v4812_v42  ;;  %v4815_v18 = vmul.f32 %v4767_v17, %v4767_v17 }
 0x3a2   : > { %v9041_v49 = vmul.f32 %v4768_v60, %v4768_v60  ;;  %v5759_v58 = vadd.f32 -1.0, %v4810_v28  ;;  %v5760_v63 = vadd.f32 -1.0, %v4811_v23  ;;  %7355 = vrcp.f32 %v4907_v6 }
 0x3a3   : > { %v4909_v35 = vadd.f32 1.0, %v4813_v11  ;;  %v5761_v46 = vadd.f32 -1.0, %v4812_v42  ;;  %7357 = vrcp.f32 %v4908_v54  ;;  %v9045_v31 = vadd.f32 -1.0, %v4813_v11 }
 0x3a4   : > { %v4910_v43 = vadd.f32 1.0, %v4814_v7  ;;  %v4911_v27 = vadd.f32 1.0, %v4815_v18  ;;  %v4912_v19 = vadd.f32 1.0, %v9041_v49  ;;  %v4769_v34 = vadd.f32 1.0, %v7342_v16 }
 0x3a5   : > { %v7344_v22 = vpop.eup %7343  ;;  %7359 = vrcp.f32 %v4909_v35  ;;  %v5763_v37 = vadd.f32 -1.0, %v4814_v7  ;;  %v9048_v44 = vadd.f32 -1.0, %v4815_v18  ;;  %v4689_v10 = vmul.f32 1.442695, %v4627_v50 }
 0x3a6   : > { %v7346_v48 = vpop.eup %7345  ;;  %v4997_v32 = vmul.f32 %v7344_v22, %v5754_v1  ;;  %7361 = vrcp.f32 %v4910_v43  ;;  %v4817_v8 = vmul.f32 %v4769_v34, %v4769_v34  ;;  %v4691_v1 = vmul.f32 1.442695, %v4628_v38 }
 0x3a7   : > { %v7348_v47 = vpop.eup %7347  ;;  %v4998_v28 = vmul.f32 %v7346_v48, %v5755_v30  ;;  %7363 = vrcp.f32 %v4911_v27  ;;  %v9062_v50 = vadd.f32 %v8943_v26, %v9028_v0  ;;  %v9085_v11 = vadd.f32 %v8943_v26, %v9031_v12 }
 0x3a8   : > { %v7350_v9 = vpop.eup %7349  ;;  %v5093_v24 = vmul.f32 %v4997_v32, %v8949_v41  ;;  %v4999_v21 = vmul.f32 %v7348_v47, %v5756_v2  ;;  %7365 = vrcp.f32 %v4912_v19  ;;  %v4913_v51 = vadd.f32 1.0, %v4817_v8 }
 0x3a9   : > { %v7352_v40 = vpop.eup %7351  ;;  %v5094_v30 = vmul.f32 %v4998_v28, %v8952_v56  ;;  %v5000_v29 = vmul.f32 %v7350_v9, %v5757_v39  ;;  %7367 = vpow2.f32 %v9033_v4  ;;  %v4629_v54 = vmin.f32 %v9062_v50, 20.0 }
 0x3aa   : > { %v7354_v23 = vpop.eup %7353  ;;  %v5141_v2 = vsel %vm5045_vm4, %v8949_v41, %v5093_v24  ;;  %v5095_v62 = vmul.f32 %v4999_v21, %v8955_v3  ;;  %v5001_v38 = vmul.f32 %v7352_v40, %v5758_v33  ;;  %7369 = vpow2.f32 %v4689_v10  ;;  %v4475_v10 = vld [vmem:[%s8925_s13 + $0x90] sm:$0xff] }
 0x3ab   : > { %v5142_v42 = vsel %vm5046_vm5, %v8952_v56, %v5094_v30  ;;  %v5096_v4 = vmul.f32 %v5000_v29, %v8958_v61  ;;  %v5002_v0 = vmul.f32 %v7354_v23, %v5759_v58  ;;  %7371 = vrcp.f32 %v4913_v51 }
 0x3ac   : > { %v6000_v17 = vpack.c.bf16 %v5142_v42, %v5141_v2  ;;  %v5143_v41 = vsel %vm5047_vm6, %v8955_v3, %v5095_v62  ;;  %v5097_v60 = vmul.f32 %v5001_v38, %v8962_v55  ;;  %v7356_v39 = vpop.eup %7355  ;;  %7373 = vpow2.f32 %v4691_v1 }
 0x3ad   : > { %v5144_v56 = vsel %vm5048_vm7, %v8958_v61, %v5096_v4  ;;  %v5098_v6 = vmul.f32 %v5002_v0, %v8965_v53  ;;  %v7358_v7 = vpop.eup %7357  ;;  %v5003_v33 = vmul.f32 %v7356_v39, %v5760_v63  ;;  %v5765_v12 = vadd.f32 -1.0, %v9041_v49 }
 0x3ae   : > { %6001 = vst [vmem:[%s7715_s24] sm:$0xff] %v6000_v17   ;;  %v6005_v3 = vpack.c.bf16 %v5144_v56, %v5143_v41  ;;  %v5145_v16 = vsel %vm5049_vm8, %v8962_v55, %v5097_v60  ;;  %v5004_v58 = vmul.f32 %v7358_v7, %v5761_v46  ;;  %v4630_v35 = vmin.f32 %v9085_v11, 20.0  ;;  %v4477_v7 = vld [vmem:[%s8925_s13 + $0xa0] sm:$0xff] }
 0x3af   : > { %v7360_v18 = vpop.eup %7359  ;;  %v5146_v61 = vsel %vm5050_vm9, %v8965_v53, %v5098_v6  ;;  %v5099_v55 = vmul.f32 %v5003_v33, %v8970_v15  ;;  %v4693_v27 = vmul.f32 1.442695, %v4629_v54  ;;  %v5766_v48 = vadd.f32 -1.0, %v4817_v8 }
 0x3b0   : > { %v7362_v43 = vpop.eup %7361  ;;  %6140 = vst [vmem:[%s7715_s24 + $0x8] sm:$0xff] %v6005_v3   ;;  %v6010_v22 = vpack.c.bf16 %v5146_v61, %v5145_v16  ;;  %v5005_v63 = vmul.f32 %v7360_v18, %v9045_v31  ;;  %v5100_v34 = vmul.f32 %v5004_v58, %v8978_v52  ;;  %v4695_v46 = vmul.f32 1.442695, %v4630_v35  ;;  %v4476_v31 = vld [vmem:[%s8925_s13 + $0x98] sm:$0xff]  ;;  %v4478_v3 = vld [vmem:[%s8925_s13 + $0xa8] sm:$0xff]  ;;  %v4479_v16 = vld [vmem:[%s8925_s13 + $0xb0] sm:$0xff] }
 0x3b1   : > { %v7364_v19 = vpop.eup %7363  ;;  %v5006_v53 = vmul.f32 %v7362_v43, %v5763_v37  ;;  %v5147_v49 = vsel %vm5051_vm10, %v8970_v15, %v5099_v55  ;;  %7375 = vpow2.f32 %v4693_v27  ;;  %v4529_v29 = vmul.f32 %v8930_v59, %v4475_v10  ;;  %v4480_v18 = vld [vmem:[%s8925_s13 + $0xb8] sm:$0xff] }
 0x3b2   : > { %v7366_v32 = vpop.eup %7365  ;;  %6141 = vst [vmem:[%s7715_s24 + $0x10] sm:$0xff] %v6010_v22   ;;  %v5101_v47 = vmul.f32 %v5005_v63, %v8991_v25  ;;  %v5007_v28 = vmul.f32 %v7364_v19, %v9048_v44  ;;  %v5148_v37 = vsel %vm5052_vm11, %v8978_v52, %v5100_v34  ;;  %7377 = vpow2.f32 %v4695_v46 }
 0x3b3   : > { %v7368_v9 = vpop.eup %7367  ;;  %v5102_v8 = vmul.f32 %v5006_v53, %v8994_v20  ;;  %v5008_v24 = vmul.f32 %v7366_v32, %v5765_v12  ;;  %v6015_v21 = vpack.c.bf16 %v5148_v37, %v5147_v49  ;;  %v4530_v23 = vmul.f32 %v8930_v59, %v4476_v31 }
 0x3b4   : > { %v5149_v15 = vsel %vm5053_vm12, %v8991_v25, %v5101_v47  ;;  %v5103_v44 = vmul.f32 %v5007_v28, %v8997_v57  ;;  %v4770_v1 = vadd.f32 1.0, %v7368_v9  ;;  %v7370_v40 = vpop.eup %7369  ;;  %v9131_v4 = vadd.f32 %v8943_v26, %v4529_v29  ;;  %v4481_v9 = vld [vmem:[%s8925_s13 + $0xc0] sm:$0xff] }
 0x3b5   : > { %v5150_v30 = vsel %vm5054_vm13, %v8994_v20, %v5102_v8  ;;  %v5104_v52 = vmul.f32 %v5008_v24, %v9000_v45  ;;  %v7372_v2 = vpop.eup %7371  ;;  %6142 = vst [vmem:[%s7715_s24 + $0x18] sm:$0xff] %v6015_v21   ;;  %v4771_v51 = vadd.f32 1.0, %v7370_v40  ;;  %v9134_v0 = vadd.f32 %v8943_v26, %v4530_v23  ;;  %v4483_v23 = vld [vmem:[%s8925_s13 + $0xd0] sm:$0xff] }
 0x3b6   : > { %v6020_v62 = vpack.c.bf16 %v5150_v30, %v5149_v15  ;;  %v5151_v25 = vsel %vm5055_vm14, %v8997_v57, %v5103_v44  ;;  %v4818_v38 = vmul.f32 %v4770_v1, %v4770_v1  ;;  %v7374_v42 = vpop.eup %7373  ;;  %v5009_v41 = vmul.f32 %v7372_v2, %v5766_v48  ;;  %v4482_v15 = vld [vmem:[%s8925_s13 + $0xc8] sm:$0xff] }
 0x3b7   : > { %v5152_v20 = vsel %vm5056_vm15, %v9000_v45, %v5104_v52  ;;  %v4772_v60 = vadd.f32 1.0, %v7374_v42  ;;  %v4819_v39 = vmul.f32 %v4771_v51, %v4771_v51  ;;  %v4631_v56 = vmin.f32 %v9131_v4, 20.0 }
 0x3b8   : > { %6143 = vst [vmem:[%s7715_s24 + $0x20] sm:$0xff] %v6020_v62   ;;  %v6025_v17 = vpack.c.bf16 %v5152_v20, %v5151_v25  ;;  %v4914_v57 = vadd.f32 1.0, %v4818_v38  ;;  %v4632_v6 = vmin.f32 %v9134_v0, 20.0  ;;  %v5105_v58 = vmul.f32 %v5009_v41, %v9010_v36 }
 0x3b9   : > { %v4820_v45 = vmul.f32 %v4772_v60, %v4772_v60  ;;  %v4915_v33 = vadd.f32 1.0, %v4819_v39  ;;  %v4697_v54 = vmul.f32 1.442695, %v4631_v56  ;;  %v4531_v43 = vmul.f32 %v8930_v59, %v4477_v7 }
 0x3ba   : > { %6144 = vst [vmem:[%s7715_s24 + $0x28] sm:$0xff] %v6025_v17   ;;  %7379 = vrcp.f32 %v4914_v57  ;;  %v4699_v35 = vmul.f32 1.442695, %v4632_v6  ;;  %v4532_v63 = vmul.f32 %v8930_v59, %v4478_v3  ;;  %v4533_v27 = vmul.f32 %v8930_v59, %v4479_v16 }
 0x3bb   : > { %v7376_v61 = vpop.eup %7375  ;;  %v4916_v12 = vadd.f32 1.0, %v4820_v45  ;;  %7381 = vrcp.f32 %v4915_v33  ;;  %v9150_v34 = vadd.f32 %v8943_v26, %v4531_v43  ;;  %v4534_v53 = vmul.f32 %v8930_v59, %v4480_v18 }
 0x3bc   : > { %v7378_v22 = vpop.eup %7377  ;;  %v4773_v55 = vadd.f32 1.0, %v7376_v61  ;;  %v9154_v46 = vadd.f32 %v8943_v26, %v4532_v63  ;;  %v9157_v32 = vadd.f32 %v8943_v26, %v4533_v27  ;;  %v5767_v28 = vadd.f32 -1.0, %v4818_v38  ;;  %v4484_v38 = vld [vmem:[%s8925_s13 + $0xd8] sm:$0xff] }
 0x3bd   : > { %7383 = vrcp.f32 %v4916_v12  ;;  %v4774_v19 = vadd.f32 1.0, %v7378_v22  ;;  %v4633_v47 = vmin.f32 %v9150_v34, 20.0  ;;  %v5153_v37 = vsel %vm5057_vm0, %v9010_v36, %v5105_v58 }
 0x3be   : > { %v4821_v48 = vmul.f32 %v4773_v55, %v4773_v55  ;;  %7385 = vpow2.f32 %v4697_v54  ;;  %v4634_v31 = vmin.f32 %v9154_v46, 20.0  ;;  %vm5060_vm3 = vcmp.gt.f32.partialorder %v9025_v14, 20.0 }
 0x3bf   : > { %v4822_v49 = vmul.f32 %v4774_v19, %v4774_v19  ;;  %7387 = vpow2.f32 %v4699_v35  ;;  %v4701_v24 = vmul.f32 1.442695, %v4633_v47  ;;  %v9169_v21 = vadd.f32 %v8943_v26, %v4534_v53 }
 0x3c0   : > { %v4917_v10 = vadd.f32 1.0, %v4821_v48  ;;  %v5768_v44 = vadd.f32 -1.0, %v4819_v39  ;;  %v4703_v1 = vmul.f32 1.442695, %v4634_v31  ;;  %v4635_v40 = vmin.f32 %v9157_v32, 20.0 }
 0x3c1   : > { %v4918_v8 = vadd.f32 1.0, %v4822_v49  ;;  %v5769_v52 = vadd.f32 -1.0, %v4820_v45  ;;  %v4636_v29 = vmin.f32 %v9169_v21, 20.0  ;;  %v4535_v36 = vmul.f32 %v8930_v59, %v4481_v9 }
 0x3c2   : > { %7389 = vrcp.f32 %v4917_v10  ;;  %v4705_v62 = vmul.f32 1.442695, %v4635_v40  ;;  %v4536_v25 = vmul.f32 %v8930_v59, %v4482_v15  ;;  %v5770_v51 = vadd.f32 -1.0, %v4821_v48 }
 0x3c3   : > { %7391 = vrcp.f32 %v4918_v8  ;;  %v4707_v42 = vmul.f32 1.442695, %v4636_v29  ;;  %v9179_v20 = vadd.f32 %v8943_v26, %v4535_v36  ;;  %v4537_v60 = vmul.f32 %v8930_v59, %v4483_v23 }
 0x3c4   : > { %v7380_v30 = vpop.eup %7379  ;;  %7393 = vpow2.f32 %v4701_v24  ;;  %v9183_v41 = vadd.f32 %v8943_v26, %v4536_v25  ;;  %v4538_v7 = vmul.f32 %v8930_v59, %v4484_v38  ;;  %v5771_v33 = vadd.f32 -1.0, %v4822_v49 }
 0x3c5   : > { %v5010_v2 = vmul.f32 %v7380_v30, %v5767_v28  ;;  %7395 = vpow2.f32 %v4703_v1  ;;  %v7382_v17 = vpop.eup %7381  ;;  %v4637_v6 = vmin.f32 %v9179_v20, 20.0  ;;  %v9195_v63 = vadd.f32 %v8943_v26, %v4537_v60 }
 0x3c6   : > { %7397 = vpow2.f32 %v4705_v62  ;;  %v5011_v56 = vmul.f32 %v7382_v17, %v5768_v44  ;;  %v4638_v54 = vmin.f32 %v9183_v41, 20.0  ;;  %v9202_v19 = vadd.f32 %v8943_v26, %v4538_v7 }
 0x3c7   : > { %v5106_v57 = vmul.f32 %v5010_v2, %v9013_v13  ;;  %v7384_v39 = vpop.eup %7383  ;;  %7399 = vpow2.f32 %v4707_v42  ;;  %v4709_v35 = vmul.f32 1.442695, %v4637_v6  ;;  %v4639_v47 = vmin.f32 %v9195_v63, 20.0  ;;  %v4486_v6 = vld [vmem:[%s8925_s13 + $0xe8] sm:$0xff] }
 0x3c8   : > { %v7386_v45 = vpop.eup %7385  ;;  %v5012_v16 = vmul.f32 %v7384_v39, %v5769_v52  ;;  %v5107_v58 = vmul.f32 %v5011_v56, %v9022_v5  ;;  %v4711_v55 = vmul.f32 1.442695, %v4638_v54  ;;  %vm5061_vm4 = vcmp.gt.f32.partialorder %v9062_v50, 20.0  ;;  %v4485_v56 = vld [vmem:[%s8925_s13 + $0xe0] sm:$0xff] }
 0x3c9   : > { %v5154_v3 = vsel %vm5058_vm1, %v9013_v13, %v5106_v57  ;;  %v7388_v18 = vpop.eup %7387  ;;  %v4775_v12 = vadd.f32 1.0, %v7386_v45  ;;  %7401 = vpow2.f32 %v4709_v35  ;;  %vm5062_vm5 = vcmp.gt.f32.partialorder %v9085_v11, 20.0  ;;  %v4487_v35 = vld [vmem:[%s8925_s13 + $0xf0] sm:$0xff] }
 0x3ca   : > { %v6030_v61 = vpack.c.bf16 %v5154_v3, %v5153_v37  ;;  %v5108_v43 = vmul.f32 %v5012_v16, %v9025_v14  ;;  %v4776_v22 = vadd.f32 1.0, %v7388_v18  ;;  %v5155_v13 = vsel %vm5059_vm2, %v9022_v5, %v5107_v58 }
 0x3cb   : > { %v4823_v27 = vmul.f32 %v4775_v12, %v4775_v12  ;;  %7403 = vpow2.f32 %v4711_v55  ;;  %v4640_v24 = vmin.f32 %v9202_v19, 20.0  ;;  %v4713_v1 = vmul.f32 1.442695, %v4639_v47 }
 0x3cc   : > { %6145 = vst [vmem:[%s7715_s24 + $0x30] sm:$0xff] %v6030_v61   ;;  %v7390_v53 = vpop.eup %7389  ;;  %v5156_v48 = vsel %vm5060_vm3, %v9025_v14, %v5108_v43  ;;  %v4824_v49 = vmul.f32 %v4776_v22, %v4776_v22  ;;  %vm5063_vm6 = vcmp.gt.f32.partialorder %v9131_v4, 20.0  ;;  %v4539_v18 = vmul.f32 %v8930_v59, %v4485_v56 }
 0x3cd   : > { %v7392_v28 = vpop.eup %7391  ;;  %v6035_v10 = vpack.c.bf16 %v5156_v48, %v5155_v13  ;;  %v5013_v31 = vmul.f32 %v7390_v53, %v5770_v51  ;;  %v4919_v5 = vadd.f32 1.0, %v4823_v27  ;;  %v4715_v29 = vmul.f32 1.442695, %v4640_v24 }
 0x3ce   : > { %v7394_v9 = vpop.eup %7393  ;;  %v5014_v37 = vmul.f32 %v7392_v28, %v5771_v33  ;;  %v4920_v8 = vadd.f32 1.0, %v4824_v49  ;;  %v4540_v61 = vmul.f32 %v8930_v59, %v4486_v6  ;;  %vm5064_vm7 = vcmp.gt.f32.partialorder %v9134_v0, 20.0 }
 0x3cf   : > { %v7396_v15 = vpop.eup %7395  ;;  %6146 = vst [vmem:[%s7715_s24 + $0x38] sm:$0xff] %v6035_v10   ;;  %v5109_v14 = vmul.f32 %v5013_v31, %v9062_v50  ;;  %7405 = vrcp.f32 %v4919_v5  ;;  %v4777_v44 = vadd.f32 1.0, %v7394_v9  ;;  %vm5065_vm8 = vcmp.gt.f32.partialorder %v9150_v34, 20.0 }
 0x3d0   : > { %v7398_v40 = vpop.eup %7397  ;;  %v5110_v30 = vmul.f32 %v5014_v37, %v9085_v11  ;;  %7407 = vrcp.f32 %v4920_v8  ;;  %v4778_v52 = vadd.f32 1.0, %v7396_v15  ;;  %v9230_v13 = vadd.f32 %v8943_v26, %v4539_v18  ;;  %v4488_v37 = vld [vmem:[%s8925_s13 + $0xf8] sm:$0xff] }
 0x3d1   : > { %v7400_v36 = vpop.eup %7399  ;;  %v5157_v23 = vsel %vm5061_vm4, %v9062_v50, %v5109_v14  ;;  %v4825_v2 = vmul.f32 %v4777_v44, %v4777_v44  ;;  %v4779_v62 = vadd.f32 1.0, %v7398_v40  ;;  %7409 = vpow2.f32 %v4713_v1 }
 0x3d2   : > { %v5158_v25 = vsel %vm5062_vm5, %v9085_v11, %v5110_v30  ;;  %v4826_v38 = vmul.f32 %v4778_v52, %v4778_v52  ;;  %v4780_v51 = vadd.f32 1.0, %v7400_v36  ;;  %7411 = vpow2.f32 %v4715_v29  ;;  %v4489_v52 = vld [vmem:[%s8925_s13 + $0x100] sm:$0xff] }
 0x3d3   : > { %v6040_v42 = vpack.c.bf16 %v5158_v25, %v5157_v23  ;;  %v4921_v17 = vadd.f32 1.0, %v4825_v2  ;;  %v4827_v57 = vmul.f32 %v4779_v62, %v4779_v62  ;;  %v7402_v7 = vpop.eup %7401  ;;  %v5772_v50 = vadd.f32 -1.0, %v4823_v27 }
 0x3d4   : > { %v4922_v60 = vadd.f32 1.0, %v4826_v38  ;;  %v4828_v39 = vmul.f32 %v4780_v51, %v4780_v51  ;;  %v5773_v11 = vadd.f32 -1.0, %v4824_v49  ;;  %v4781_v33 = vadd.f32 1.0, %v7402_v7 }
 0x3d5   : > { %6147 = vst [vmem:[%s7715_s24 + $0x40] sm:$0xff] %v6040_v42   ;;  %7413 = vrcp.f32 %v4921_v17  ;;  %v4923_v45 = vadd.f32 1.0, %v4827_v57  ;;  %v7404_v3 = vpop.eup %7403  ;;  %v5774_v58 = vadd.f32 -1.0, %v4825_v2  ;;  %v5775_v22 = vadd.f32 -1.0, %v4826_v38 }
 0x3d6   : > { %7415 = vrcp.f32 %v4922_v60  ;;  %v4924_v16 = vadd.f32 1.0, %v4828_v39  ;;  %v4782_v54 = vadd.f32 1.0, %v7404_v3  ;;  %v4829_v12 = vmul.f32 %v4781_v33, %v4781_v33 }
 0x3d7   : > { %7417 = vrcp.f32 %v4923_v45  ;;  %v9233_v27 = vadd.f32 %v8943_v26, %v4540_v61  ;;  %vm5066_vm9 = vcmp.gt.f32.partialorder %v9154_v46, 20.0  ;;  %v5776_v49 = vadd.f32 -1.0, %v4827_v57 }
 0x3d8   : > { %7419 = vrcp.f32 %v4924_v16  ;;  %v4830_v55 = vmul.f32 %v4782_v54, %v4782_v54  ;;  %v5777_v47 = vadd.f32 -1.0, %v4828_v39  ;;  %v4925_v28 = vadd.f32 1.0, %v4829_v12  ;;  %v4490_v54 = vld [vmem:[%s8925_s13 + $0x108] sm:$0xff] }
 0x3d9   : > { %v7406_v43 = vpop.eup %7405  ;;  %vm5067_vm10 = vcmp.gt.f32.partialorder %v9157_v32, 20.0  ;;  %v4641_v9 = vmin.f32 %v9230_v13, 20.0  ;;  %v4541_v8 = vmul.f32 %v8930_v59, %v4487_v35  ;;  %vm5068_vm11 = vcmp.gt.f32.partialorder %v9169_v21, 20.0 }
 0x3da   : > { %v7408_v53 = vpop.eup %7407  ;;  %v5015_v48 = vmul.f32 %v7406_v43, %v5772_v50  ;;  %v4926_v5 = vadd.f32 1.0, %v4830_v55  ;;  %7421 = vrcp.f32 %v4925_v28  ;;  %v4642_v44 = vmin.f32 %v9233_v27, 20.0 }
 0x3db   : > { %v7410_v10 = vpop.eup %7409  ;;  %v5016_v31 = vmul.f32 %v7408_v53, %v5773_v11  ;;  %v4717_v30 = vmul.f32 1.442695, %v4641_v9  ;;  %v4542_v2 = vmul.f32 %v8930_v59, %v4488_v37  ;;  %v9253_v51 = vadd.f32 %v8943_v26, %v4541_v8  ;;  %v4492_v37 = vld [vmem:[%s8925_s13 + $0x118] sm:$0xff] }
 0x3dc   : > { %v7412_v24 = vpop.eup %7411  ;;  %v5111_v15 = vmul.f32 %v5015_v48, %v9131_v4  ;;  %v4783_v14 = vadd.f32 1.0, %v7410_v10  ;;  %7423 = vrcp.f32 %v4926_v5  ;;  %v4719_v23 = vmul.f32 1.442695, %v4642_v44 }
 0x3dd   : > { %v5112_v1 = vmul.f32 %v5016_v31, %v9134_v0  ;;  %v4784_v40 = vadd.f32 1.0, %v7412_v24  ;;  %7425 = vpow2.f32 %v4717_v30  ;;  %vm5069_vm12 = vcmp.gt.f32.partialorder %v9179_v20, 20.0 }
 0x3de   : > { %v5159_v29 = vsel %vm5063_vm6, %v9131_v4, %v5111_v15  ;;  %v4831_v36 = vmul.f32 %v4783_v14, %v4783_v14  ;;  %v4543_v60 = vmul.f32 %v8930_v59, %v4489_v52  ;;  %v5778_v6 = vadd.f32 -1.0, %v4829_v12 }
 0x3df   : > { %v7414_v62 = vpop.eup %7413  ;;  %v5160_v25 = vsel %vm5064_vm7, %v9134_v0, %v5112_v1  ;;  %v4832_v38 = vmul.f32 %v4784_v40, %v4784_v40  ;;  %7427 = vpow2.f32 %v4719_v23  ;;  %v9260_v3 = vadd.f32 %v8943_v26, %v4542_v2 }
 0x3e0   : > { %v7416_v42 = vpop.eup %7415  ;;  %v6045_v17 = vpack.c.bf16 %v5160_v25, %v5159_v29  ;;  %v5017_v57 = vmul.f32 %v7414_v62, %v5774_v58  ;;  %v4927_v4 = vadd.f32 1.0, %v4831_v36  ;;  %v4643_v33 = vmin.f32 %v9253_v51, 20.0 }
 0x3e1   : > { %v7418_v39 = vpop.eup %7417  ;;  %v5018_v56 = vmul.f32 %v7416_v42, %v5775_v22  ;;  %v4928_v7 = vadd.f32 1.0, %v4832_v38  ;;  %v5779_v58 = vadd.f32 -1.0, %v4830_v55  ;;  %v4644_v12 = vmin.f32 %v9260_v3, 20.0 }
 0x3e2   : > { %v7420_v0 = vpop.eup %7419  ;;  %6148 = vst [vmem:[%s7715_s24 + $0x48] sm:$0xff] %v6045_v17   ;;  %v5113_v50 = vmul.f32 %v5017_v57, %v9150_v34  ;;  %v5019_v45 = vmul.f32 %v7418_v39, %v5776_v49  ;;  %7429 = vrcp.f32 %v4927_v4  ;;  %vm5070_vm13 = vcmp.gt.f32.partialorder %v9183_v41, 20.0 }
 0x3e3   : > { %v5114_v11 = vmul.f32 %v5018_v56, %v9154_v46  ;;  %v5020_v16 = vmul.f32 %v7420_v0, %v5777_v47  ;;  %7431 = vrcp.f32 %v4928_v7  ;;  %v4721_v22 = vmul.f32 1.442695, %v4643_v33  ;;  %v4491_v47 = vld [vmem:[%s8925_s13 + $0x110] sm:$0xff] }
 0x3e4   : > { %v5161_v18 = vsel %vm5065_vm8, %v9150_v34, %v5113_v50  ;;  %v5115_v61 = vmul.f32 %v5019_v45, %v9157_v32  ;;  %v7422_v53 = vpop.eup %7421  ;;  %vm5071_vm14 = vcmp.gt.f32.partialorder %v9195_v63, 20.0  ;;  %v4723_v55 = vmul.f32 1.442695, %v4644_v12 }
 0x3e5   : > { %v5162_v35 = vsel %vm5066_vm9, %v9154_v46, %v5114_v11  ;;  %v5116_v43 = vmul.f32 %v5020_v16, %v9169_v21  ;;  %v4544_v49 = vmul.f32 %v8930_v59, %v4490_v54  ;;  %v5021_v10 = vmul.f32 %v7422_v53, %v5778_v6  ;;  %v4493_v11 = vld [vmem:[%s8925_s13 + $0x120] sm:$0xff] }
 0x3e6   : > { %v6050_v48 = vpack.c.bf16 %v5162_v35, %v5161_v18  ;;  %v5163_v34 = vsel %vm5067_vm10, %v9157_v32, %v5115_v61  ;;  %v7424_v46 = vpop.eup %7423  ;;  %7433 = vpow2.f32 %v4721_v22  ;;  %v9285_v31 = vadd.f32 %v8943_v26, %v4543_v60  ;;  %v4494_v61 = vld [vmem:[%s8925_s13 + $0x128] sm:$0xff]  ;;  %v4496_v22 = vld [vmem:[%s8925_s13 + $0x138] sm:$0xff] }
 0x3e7   : > { %v5164_v28 = vsel %vm5068_vm11, %v9169_v21, %v5116_v43  ;;  %v5022_v32 = vmul.f32 %v7424_v46, %v5779_v58  ;;  %7435 = vpow2.f32 %v4723_v55  ;;  %v9289_v9 = vadd.f32 %v8943_v26, %v4544_v49  ;;  %v7426_v8 = vpop.eup %7425  ;;  %v4495_v58 = vld [vmem:[%s8925_s13 + $0x130] sm:$0xff] }
 0x3e8   : > { %6149 = vst [vmem:[%s7715_s24 + $0x50] sm:$0xff] %v6050_v48   ;;  %v6055_v5 = vpack.c.bf16 %v5164_v28, %v5163_v34  ;;  %v5117_v24 = vmul.f32 %v5021_v10, %v9179_v20  ;;  %v5780_v15 = vadd.f32 -1.0, %v4831_v36  ;;  %v4645_v14 = vmin.f32 %v9285_v31, 20.0 }
 0x3e9   : > { %v4545_v21 = vmul.f32 %v8930_v59, %v4491_v47  ;;  %v5118_v44 = vmul.f32 %v5022_v32, %v9183_v41  ;;  %v5781_v1 = vadd.f32 -1.0, %v4832_v38  ;;  %v4785_v40 = vadd.f32 1.0, %v7426_v8  ;;  %v7428_v52 = vpop.eup %7427 }
 0x3ea   : > { %6150 = vst [vmem:[%s7715_s24 + $0x58] sm:$0xff] %v6055_v5   ;;  %v4646_v30 = vmin.f32 %v9289_v9, 20.0  ;;  %v5165_v29 = vsel %vm5069_vm12, %v9179_v20, %v5117_v24  ;;  %v4725_v23 = vmul.f32 1.442695, %v4645_v14  ;;  %v4546_v2 = vmul.f32 %v8930_v59, %v4492_v37 }
 0x3eb   : > { %v9303_v36 = vadd.f32 %v8943_v26, %v4545_v21  ;;  %v5166_v25 = vsel %vm5070_vm13, %v9183_v41, %v5118_v44  ;;  %v4786_v38 = vadd.f32 1.0, %v7428_v52  ;;  %v4833_v42 = vmul.f32 %v4785_v40, %v4785_v40  ;;  %v4497_v52 = vld [vmem:[%s8925_s13 + $0x140] sm:$0xff] }
 0x3ec   : > { %v7430_v62 = vpop.eup %7429  ;;  %v4727_v17 = vmul.f32 1.442695, %v4646_v30  ;;  %v6060_v4 = vpack.c.bf16 %v5166_v25, %v5165_v29  ;;  %7437 = vpow2.f32 %v4725_v23  ;;  %v9309_v20 = vadd.f32 %v8943_v26, %v4546_v2 }
 0x3ed   : > { %v7432_v57 = vpop.eup %7431  ;;  %v5023_v60 = vmul.f32 %v7430_v62, %v5780_v15  ;;  %vm5072_vm15 = vcmp.gt.f32.partialorder %v9202_v19, 20.0  ;;  %v4834_v56 = vmul.f32 %v4786_v38, %v4786_v38  ;;  %v4929_v6 = vadd.f32 1.0, %v4833_v42 }
 0x3ee   : > { %v5024_v39 = vmul.f32 %v7432_v57, %v5781_v1  ;;  %6151 = vst [vmem:[%s7715_s24 + $0x60] sm:$0xff] %v6060_v4   ;;  %7439 = vpow2.f32 %v4727_v17  ;;  %v4647_v7 = vmin.f32 %v9303_v36, 20.0  ;;  %v4648_v0 = vmin.f32 %v9309_v20, 20.0 }
 0x3ef   : > { %v5119_v41 = vmul.f32 %v5023_v60, %v9195_v63  ;;  %v4930_v45 = vadd.f32 1.0, %v4834_v56  ;;  %7441 = vrcp.f32 %v4929_v6  ;;  %v4547_v34 = vmul.f32 %v8930_v59, %v4493_v11 }
 0x3f0   : > { %v5120_v50 = vmul.f32 %v5024_v39, %v9202_v19  ;;  %v7434_v16 = vpop.eup %7433  ;;  %v4729_v54 = vmul.f32 1.442695, %v4647_v7  ;;  %v4731_v18 = vmul.f32 1.442695, %v4648_v0  ;;  %v4549_v49 = vmul.f32 %v8930_v59, %v4495_v58  ;;  %v4498_v7 = vld [vmem:[%s8925_s13 + $0x148] sm:$0xff] }
 0x3f1   : > { %v5167_v33 = vsel %vm5071_vm14, %v9195_v63, %v5119_v41  ;;  %v7436_v12 = vpop.eup %7435  ;;  %7443 = vrcp.f32 %v4930_v45  ;;  %v4787_v43 = vadd.f32 1.0, %v7434_v16  ;;  %v4548_v63 = vmul.f32 %v8930_v59, %v4494_v61 }
 0x3f2   : > { %v5168_v35 = vsel %vm5072_vm15, %v9202_v19, %v5120_v50  ;;  %v4788_v48 = vadd.f32 1.0, %v7436_v12  ;;  %7445 = vpow2.f32 %v4729_v54  ;;  %v9332_v46 = vadd.f32 %v8943_v26, %v4547_v34  ;;  %v4499_v34 = vld [vmem:[%s8925_s13 + $0x150] sm:$0xff] }
 0x3f3   : > { %v6065_v53 = vpack.c.bf16 %v5168_v35, %v5167_v33  ;;  %v4835_v55 = vmul.f32 %v4787_v43, %v4787_v43  ;;  %7447 = vpow2.f32 %v4731_v18  ;;  %v4550_v19 = vmul.f32 %v8930_v59, %v4496_v22 }
 0x3f4   : > { %v4836_v47 = vmul.f32 %v4788_v48, %v4788_v48  ;;  %v9336_v10 = vadd.f32 %v8943_v26, %v4548_v63  ;;  %v9339_v5 = vadd.f32 %v8943_v26, %v4549_v49  ;;  %v5782_v37 = vadd.f32 -1.0, %v4833_v42 }
 0x3f5   : > { %6152 = vst [vmem:[%s7715_s24 + $0x68] sm:$0xff] %v6065_v53   ;;  %v4931_v28 = vadd.f32 1.0, %v4835_v55  ;;  %vm5073_vm0 = vcmp.gt.f32.partialorder %v9230_v13, 20.0  ;;  %v4649_v24 = vmin.f32 %v9332_v46, 20.0  ;;  %v5783_v15 = vadd.f32 -1.0, %v4834_v56 }
 0x3f6   : > { %v7438_v32 = vpop.eup %7437  ;;  %v4932_v8 = vadd.f32 1.0, %v4836_v47  ;;  %v4650_v21 = vmin.f32 %v9336_v10, 20.0  ;;  %v9345_v40 = vadd.f32 %v8943_v26, %v4550_v19  ;;  %v4651_v30 = vmin.f32 %v9339_v5, 20.0 }
 0x3f7   : > { %7449 = vrcp.f32 %v4931_v28  ;;  %v4789_v14 = vadd.f32 1.0, %v7438_v32  ;;  %v4733_v1 = vmul.f32 1.442695, %v4649_v24  ;;  %vm5074_vm1 = vcmp.gt.f32.partialorder %v9233_v27, 20.0 }
 0x3f8   : > { %v7440_v44 = vpop.eup %7439  ;;  %7451 = vrcp.f32 %v4932_v8  ;;  %v4735_v62 = vmul.f32 1.442695, %v4650_v21  ;;  %v4652_v38 = vmin.f32 %v9345_v40, 20.0  ;;  %v4737_v42 = vmul.f32 1.442695, %v4651_v30 }
 0x3f9   : > { %v7442_v29 = vpop.eup %7441  ;;  %v4790_v23 = vadd.f32 1.0, %v7440_v44  ;;  %v4837_v2 = vmul.f32 %v4789_v14, %v4789_v14  ;;  %7453 = vpow2.f32 %v4733_v1  ;;  %v4551_v60 = vmul.f32 %v8930_v59, %v4497_v52 }
 0x3fa   : > { %v5025_v25 = vmul.f32 %v7442_v29, %v5782_v37  ;;  %7455 = vpow2.f32 %v4735_v62  ;;  %v4739_v41 = vmul.f32 1.442695, %v4652_v38  ;;  %v5784_v50 = vadd.f32 -1.0, %v4835_v55 }
 0x3fb   : > { %v7444_v17 = vpop.eup %7443  ;;  %v4838_v57 = vmul.f32 %v4790_v23, %v4790_v23  ;;  %v4933_v4 = vadd.f32 1.0, %v4837_v2  ;;  %7457 = vpow2.f32 %v4737_v42  ;;  %v5785_v18 = vadd.f32 -1.0, %v4836_v47  ;;  %v4500_v47 = vld [vmem:[%s8925_s13 + $0x158] sm:$0xff] }
 0x3fc   : > { %v7446_v39 = vpop.eup %7445  ;;  %v5026_v56 = vmul.f32 %v7444_v17, %v5783_v15  ;;  %v5121_v6 = vmul.f32 %v5025_v25, %v9230_v13  ;;  %v4552_v58 = vmul.f32 %v8930_v59, %v4498_v7  ;;  %vm5075_vm2 = vcmp.gt.f32.partialorder %v9253_v51, 20.0 }
 0x3fd   : > { %v7448_v0 = vpop.eup %7447  ;;  %v4934_v45 = vadd.f32 1.0, %v4838_v57  ;;  %7459 = vrcp.f32 %v4933_v4  ;;  %v4791_v11 = vadd.f32 1.0, %v7446_v39  ;;  %v9364_v43 = vadd.f32 %v8943_v26, %v4551_v60 }
 0x3fe   : > { %v5122_v16 = vmul.f32 %v5026_v56, %v9233_v27  ;;  %v5169_v33 = vsel %vm5073_vm0, %v9230_v13, %v5121_v6  ;;  %v4792_v54 = vadd.f32 1.0, %v7448_v0  ;;  %7461 = vpow2.f32 %v4739_v41 }
 0x3ff   : > { %7463 = vrcp.f32 %v4934_v45  ;;  %v4839_v61 = vmul.f32 %v4791_v11, %v4791_v11  ;;  %vm5076_vm3 = vcmp.gt.f32.partialorder %v9260_v3, 20.0  ;;  %v9368_v48 = vadd.f32 %v8943_v26, %v4552_v58 }
 0x400   : > { %v5170_v12 = vsel %vm5074_vm1, %v9233_v27, %v5122_v16  ;;  %v4840_v35 = vmul.f32 %v4792_v54, %v4792_v54  ;;  %vm5077_vm4 = vcmp.gt.f32.partialorder %v9285_v31, 20.0  ;;  %v4653_v49 = vmin.f32 %v9364_v43, 20.0 }
 0x401   : > { %v7450_v13 = vpop.eup %7449  ;;  %v6070_v22 = vpack.c.bf16 %v5170_v12, %v5169_v33  ;;  %v4935_v53 = vadd.f32 1.0, %v4839_v61  ;;  %v5786_v28 = vadd.f32 -1.0, %v4837_v2  ;;  %vm5078_vm5 = vcmp.gt.f32.partialorder %v9289_v9, 20.0 }
 0x402   : > { %v7452_v55 = vpop.eup %7451  ;;  %v5027_v63 = vmul.f32 %v7450_v13, %v5784_v50  ;;  %v4936_v27 = vadd.f32 1.0, %v4840_v35  ;;  %v4654_v32 = vmin.f32 %v9368_v48, 20.0  ;;  %v4741_v24 = vmul.f32 1.442695, %v4653_v49 }
 0x403   : > { %6153 = vst [vmem:[%s7715_s24 + $0x70] sm:$0xff] %v6070_v22   ;;  %v5028_v19 = vmul.f32 %v7452_v55, %v5785_v18  ;;  %7465 = vrcp.f32 %v4935_v53  ;;  %v7454_v37 = vpop.eup %7453  ;;  %v4553_v15 = vmul.f32 %v8930_v59, %v4499_v34  ;;  %v4554_v30 = vmul.f32 %v8930_v59, %v4500_v47 }
 0x404   : > { %v5123_v8 = vmul.f32 %v5027_v63, %v9253_v51  ;;  %7467 = vrcp.f32 %v4936_v27  ;;  %v7456_v14 = vpop.eup %7455  ;;  %v4793_v44 = vadd.f32 1.0, %v7454_v37  ;;  %v4743_v1 = vmul.f32 1.442695, %v4654_v32  ;;  %v4502_v63 = vld [vmem:[%s8925_s13 + $0x168] sm:$0xff] }
 0x405   : > { %v5124_v21 = vmul.f32 %v5028_v19, %v9260_v3  ;;  %v7458_v52 = vpop.eup %7457  ;;  %v5787_v23 = vadd.f32 -1.0, %v4838_v57  ;;  %v4794_v2 = vadd.f32 1.0, %v7456_v14  ;;  %7469 = vpow2.f32 %v4741_v24 }
 0x406   : > { %v5171_v29 = vsel %vm5075_vm2, %v9253_v51, %v5123_v8  ;;  %vm5079_vm6 = vcmp.gt.f32.partialorder %v9303_v36, 20.0  ;;  %v4841_v38 = vmul.f32 %v4793_v44, %v4793_v44  ;;  %v4795_v42 = vadd.f32 1.0, %v7458_v52 }
 0x407   : > { %v7460_v62 = vpop.eup %7459  ;;  %v5172_v25 = vsel %vm5076_vm3, %v9260_v3, %v5124_v21  ;;  %7471 = vpow2.f32 %v4743_v1  ;;  %v4842_v39 = vmul.f32 %v4794_v2, %v4794_v2  ;;  %v9389_v51 = vadd.f32 %v8943_v26, %v4553_v15  ;;  %v4504_v21 = vld [vmem:[%s8925_s13 + $0x178] sm:$0xff] }
 0x408   : > { %v7462_v17 = vpop.eup %7461  ;;  %v6075_v4 = vpack.c.bf16 %v5172_v25, %v5171_v29  ;;  %v5029_v60 = vmul.f32 %v7460_v62, %v5786_v28  ;;  %v4937_v56 = vadd.f32 1.0, %v4841_v38  ;;  %v4843_v41 = vmul.f32 %v4795_v42, %v4795_v42 }
 0x409   : > { %v7464_v57 = vpop.eup %7463  ;;  %v4796_v6 = vadd.f32 1.0, %v7462_v17  ;;  %v9392_v7 = vadd.f32 %v8943_v26, %v4554_v30  ;;  %v5788_v50 = vadd.f32 -1.0, %v4839_v61  ;;  %v4938_v45 = vadd.f32 1.0, %v4842_v39 }
 0x40a   : > { %6154 = vst [vmem:[%s7715_s24 + $0x78] sm:$0xff] %v6075_v4   ;;  %v5030_v3 = vmul.f32 %v7464_v57, %v5787_v23  ;;  %v5125_v0 = vmul.f32 %v5029_v60, %v9285_v31  ;;  %v5789_v11 = vadd.f32 -1.0, %v4840_v35  ;;  %7473 = vrcp.f32 %v4937_v56  ;;  %v4501_v35 = vld [vmem:[%s8925_s13 + $0x160] sm:$0xff] }
 0x40b   : > { %v4844_v16 = vmul.f32 %v4796_v6, %v4796_v6  ;;  %v4939_v33 = vadd.f32 1.0, %v4843_v41  ;;  %7475 = vrcp.f32 %v4938_v45  ;;  %v4655_v58 = vmin.f32 %v9389_v51, 20.0 }
 0x40c   : > { %v5126_v54 = vmul.f32 %v5030_v3, %v9289_v9  ;;  %v5173_v18 = vsel %vm5077_vm4, %v9285_v31, %v5125_v0  ;;  %vm5080_vm7 = vcmp.gt.f32.partialorder %v9309_v20, 20.0  ;;  %v4656_v61 = vmin.f32 %v9392_v7, 20.0 }
 0x40d   : > { %v7466_v12 = vpop.eup %7465  ;;  %v4940_v13 = vadd.f32 1.0, %v4844_v16  ;;  %7477 = vrcp.f32 %v4939_v33  ;;  %v5790_v31 = vadd.f32 -1.0, %v4841_v38  ;;  %v4745_v55 = vmul.f32 1.442695, %v4655_v58 }
 0x40e   : > { %v7468_v22 = vpop.eup %7467  ;;  %v5174_v53 = vsel %vm5078_vm5, %v9289_v9, %v5126_v54  ;;  %v5031_v34 = vmul.f32 %v7466_v12, %v5788_v50  ;;  %vm5081_vm8 = vcmp.gt.f32.partialorder %v9332_v46, 20.0  ;;  %v4747_v47 = vmul.f32 1.442695, %v4656_v61  ;;  %v4503_v9 = vld [vmem:[%s8925_s13 + $0x170] sm:$0xff] }
 0x40f   : > { %v6080_v27 = vpack.c.bf16 %v5174_v53, %v5173_v18  ;;  %v5032_v49 = vmul.f32 %v7468_v22, %v5789_v11  ;;  %7479 = vrcp.f32 %v4940_v13  ;;  %v7470_v19 = vpop.eup %7469  ;;  %v5791_v32 = vadd.f32 -1.0, %v4842_v39 }
 0x410   : > { %v5127_v28 = vmul.f32 %v5031_v34, %v9303_v36  ;;  %7481 = vpow2.f32 %v4745_v55  ;;  %v4555_v37 = vmul.f32 %v8930_v59, %v4501_v35  ;;  %v4797_v15 = vadd.f32 1.0, %v7470_v19 }
 0x411   : > { %v7472_v8 = vpop.eup %7471  ;;  %6155 = vst [vmem:[%s7715_s24 + $0x80] sm:$0xff] %v6080_v27   ;;  %v5128_v24 = vmul.f32 %v5032_v49, %v9309_v20  ;;  %7483 = vpow2.f32 %v4747_v47  ;;  %v4556_v14 = vmul.f32 %v8930_v59, %v4502_v63  ;;  %v5792_v1 = vadd.f32 -1.0, %v4843_v41 }
 0x412   : > { %v5175_v44 = vsel %vm5079_vm6, %v9303_v36, %v5127_v28  ;;  %v4798_v30 = vadd.f32 1.0, %v7472_v8  ;;  %v9420_v52 = vadd.f32 %v8943_v26, %v4555_v37  ;;  %v4845_v23 = vmul.f32 %v4797_v15, %v4797_v15 }
 0x413   : > { %v5176_v29 = vsel %vm5080_vm7, %v9309_v20, %v5128_v24  ;;  %v9426_v2 = vadd.f32 %v8943_v26, %v4556_v14  ;;  %v4557_v62 = vmul.f32 %v8930_v59, %v4503_v9  ;;  %v4558_v42 = vmul.f32 %v8930_v59, %v4504_v21 }
 0x414   : > { %v6085_v25 = vpack.c.bf16 %v5176_v29, %v5175_v44  ;;  %v4846_v38 = vmul.f32 %v4798_v30, %v4798_v30  ;;  %v4657_v36 = vmin.f32 %v9420_v52, 20.0  ;;  %v7474_v17 = vpop.eup %7473  ;;  %vm5082_vm9 = vcmp.gt.f32.partialorder %v9336_v10, 20.0 }
 0x415   : > { %vm5083_vm10 = vcmp.gt.f32.partialorder %v9339_v5, 20.0  ;;  %v4941_v4 = vadd.f32 1.0, %v4845_v23  ;;  %v4658_v20 = vmin.f32 %v9426_v2, 20.0  ;;  %v7476_v60 = vpop.eup %7475  ;;  %v5033_v39 = vmul.f32 %v7474_v17, %v5790_v31 }
 0x416   : > { %6156 = vst [vmem:[%s7715_s24 + $0x88] sm:$0xff] %v6085_v25   ;;  %v5793_v57 = vadd.f32 -1.0, %v4844_v16  ;;  %v4942_v56 = vadd.f32 1.0, %v4846_v38  ;;  %v4749_v6 = vmul.f32 1.442695, %v4657_v36  ;;  %v5034_v3 = vmul.f32 %v7476_v60, %v5791_v32 }
 0x417   : > { %v7478_v41 = vpop.eup %7477  ;;  %7485 = vrcp.f32 %v4941_v4  ;;  %v4751_v0 = vmul.f32 1.442695, %v4658_v20  ;;  %v9436_v59 = vadd.f32 %v8943_v26, %v4557_v62  ;;  %v5129_v50 = vmul.f32 %v5033_v39, %v9332_v46 }
 0x418   : > { %v5035_v45 = vmul.f32 %v7478_v41, %v5792_v1  ;;  %7487 = vrcp.f32 %v4942_v56  ;;  %v9440_v11 = vadd.f32 %v8943_v26, %v4558_v42  ;;  %v5130_v54 = vmul.f32 %v5034_v3, %v9336_v10 }
 0x419   : > { %v7480_v33 = vpop.eup %7479  ;;  %vm5084_vm11 = vcmp.gt.f32.partialorder %v9345_v40, 20.0  ;;  %7489 = vpow2.f32 %v4749_v6  ;;  %v4659_v16 = vmin.f32 %v9436_v59, 20.0  ;;  %v5177_v58 = vsel %vm5081_vm8, %v9332_v46, %v5129_v50 }
 0x41a   : > { %v7482_v18 = vpop.eup %7481  ;;  %v5036_v12 = vmul.f32 %v7480_v33, %v5793_v57  ;;  %v5131_v13 = vmul.f32 %v5035_v45, %v9339_v5  ;;  %7491 = vpow2.f32 %v4751_v0  ;;  %v5178_v61 = vsel %vm5082_vm9, %v9336_v10, %v5130_v54 }
 0x41b   : > { %v7484_v26 = vpop.eup %7483  ;;  %v4799_v35 = vadd.f32 1.0, %v7482_v18  ;;  %v4660_v22 = vmin.f32 %v9440_v11, 20.0  ;;  %v4753_v53 = vmul.f32 1.442695, %v4659_v16  ;;  %v6090_v34 = vpack.c.bf16 %v5178_v61, %v5177_v58 }
 0x41c   : > { %v5132_v31 = vmul.f32 %v5036_v12, %v9345_v40  ;;  %v5179_v46 = vsel %vm5083_vm10, %v9339_v5, %v5131_v13  ;;  %v4800_v55 = vadd.f32 1.0, %v7484_v26  ;;  %v5794_v49 = vadd.f32 -1.0, %v4845_v23 }
 0x41d   : > { %v4847_v63 = vmul.f32 %v4799_v35, %v4799_v35  ;;  %7493 = vpow2.f32 %v4753_v53  ;;  %v4755_v27 = vmul.f32 1.442695, %v4660_v22  ;;  %6157 = vst [vmem:[%s7715_s24 + $0x90] sm:$0xff] %v6090_v34   ;;  %v5795_v28 = vadd.f32 -1.0, %v4846_v38 }
 0x41e   : > { %v5180_v10 = vsel %vm5084_vm11, %v9345_v40, %v5132_v31  ;;  %v4848_v47 = vmul.f32 %v4800_v55, %v4800_v55  ;;  %vm5085_vm12 = vcmp.gt.f32.partialorder %v9364_v43, 20.0  ;;  %vm5086_vm13 = vcmp.gt.f32.partialorder %v9368_v48, 20.0 }
 0x41f   : > { %v6095_v19 = vpack.c.bf16 %v5180_v10, %v5179_v46  ;;  %v4943_v32 = vadd.f32 1.0, %v4847_v63  ;;  %7495 = vpow2.f32 %v4755_v27  ;;  %v5796_v36 = vadd.f32 -1.0, %v4847_v63 }
 0x420   : > { %v4944_v37 = vadd.f32 1.0, %v4848_v47  ;;  %v5797_v20 = vadd.f32 -1.0, %v4848_v47  ;;  %vm5087_vm14 = vcmp.gt.f32.partialorder %v9389_v51, 20.0  ;;  %vm5088_vm15 = vcmp.gt.f32.partialorder %v9392_v7, 20.0 }
 0x421   : > { %v7486_v9 = vpop.eup %7485  ;;  %6158 = vst [vmem:[%s7715_s24 + $0x98] sm:$0xff] %v6095_v19   ;;  %7497 = vrcp.f32 %v4943_v32  ;;  %vm5089_vm0 = vcmp.gt.f32.partialorder %v9420_v52, 20.0  ;;  %vm5090_vm1 = vcmp.gt.f32.partialorder %v9426_v2, 20.0  ;;  %vm5091_vm2 = vcmp.gt.f32.partialorder %v9436_v59, 20.0 }
 0x422   : > { %v7488_v5 = vpop.eup %7487  ;;  %v5037_v8 = vmul.f32 %v7486_v9, %v5794_v49  ;;  %7499 = vrcp.f32 %v4944_v37  ;;  %vm5092_vm3 = vcmp.gt.f32.partialorder %v9440_v11, 20.0 }
 0x423   : > { %v7490_v24 = vpop.eup %7489  ;;  %v5038_v15 = vmul.f32 %v7488_v5, %v5795_v28 }
 0x424   : > { %v7492_v14 = vpop.eup %7491  ;;  %v5133_v40 = vmul.f32 %v5037_v8, %v9364_v43  ;;  %v4801_v21 = vadd.f32 1.0, %v7490_v24 }
 0x425   : > { %v5134_v44 = vmul.f32 %v5038_v15, %v9368_v48  ;;  %v4802_v1 = vadd.f32 1.0, %v7492_v14 }
 0x426   : > { %v5181_v30 = vsel %vm5085_vm12, %v9364_v43, %v5133_v40  ;;  %v4849_v29 = vmul.f32 %v4801_v21, %v4801_v21 }
 0x427   : > { %v7494_v23 = vpop.eup %7493  ;;  %v5182_v62 = vsel %vm5086_vm13, %v9368_v48, %v5134_v44  ;;  %v4850_v25 = vmul.f32 %v4802_v1, %v4802_v1 }
 0x428   : > { %v6100_v38 = vpack.c.bf16 %v5182_v62, %v5181_v30  ;;  %v4945_v42 = vadd.f32 1.0, %v4849_v29  ;;  %v4803_v17 = vadd.f32 1.0, %v7494_v23  ;;  %v5798_v16 = vadd.f32 -1.0, %v4849_v29 }
 0x429   : > { %v7496_v4 = vpop.eup %7495  ;;  %v4946_v60 = vadd.f32 1.0, %v4850_v25  ;;  %v5799_v58 = vadd.f32 -1.0, %v4850_v25 }
 0x42a   : > { %6159 = vst [vmem:[%s7715_s24 + $0xa0] sm:$0xff] %v6100_v38   ;;  %7501 = vrcp.f32 %v4945_v42  ;;  %v4804_v39 = vadd.f32 1.0, %v7496_v4  ;;  %v4851_v57 = vmul.f32 %v4803_v17, %v4803_v17 }
 0x42b   : > { %v7498_v56 = vpop.eup %7497  ;;  %7503 = vrcp.f32 %v4946_v60 }
 0x42c   : > { %v7500_v6 = vpop.eup %7499  ;;  %v5039_v43 = vmul.f32 %v7498_v56, %v5796_v36  ;;  %v4852_v41 = vmul.f32 %v4804_v39, %v4804_v39  ;;  %v4947_v3 = vadd.f32 1.0, %v4851_v57  ;;  %v5800_v61 = vadd.f32 -1.0, %v4851_v57 }
 0x42d   : > { %v5040_v48 = vmul.f32 %v7500_v6, %v5797_v20 }
 0x42e   : > { %v5135_v0 = vmul.f32 %v5039_v43, %v9389_v51  ;;  %v4948_v50 = vadd.f32 1.0, %v4852_v41  ;;  %7505 = vrcp.f32 %v4947_v3 }
 0x42f   : > { %v5136_v45 = vmul.f32 %v5040_v48, %v9392_v7 }
 0x430   : > { %v5183_v33 = vsel %vm5087_vm14, %v9389_v51, %v5135_v0  ;;  %7507 = vrcp.f32 %v4948_v50  ;;  %v5801_v51 = vadd.f32 -1.0, %v4852_v41 }
 0x431   : > { %v5184_v54 = vsel %vm5088_vm15, %v9392_v7, %v5136_v45 }
 0x432   : > { %v6105_v18 = vpack.c.bf16 %v5184_v54, %v5183_v33 }
 0x434   : > { %v7502_v12 = vpop.eup %7501  ;;  %6160 = vst [vmem:[%s7715_s24 + $0xa8] sm:$0xff] %v6105_v18  }
 0x435   : > { %v7504_v13 = vpop.eup %7503  ;;  %v5041_v26 = vmul.f32 %v7502_v12, %v5798_v16 }
 0x436   : > { %v5042_v35 = vmul.f32 %v7504_v13, %v5799_v58 }
 0x437   : > { %v5137_v22 = vmul.f32 %v5041_v26, %v9420_v52 }
 0x438   : > { %v7506_v53 = vpop.eup %7505  ;;  %v5138_v7 = vmul.f32 %v5042_v35, %v9426_v2 }
 0x439   : > { %v5185_v34 = vsel %vm5089_vm0, %v9420_v52, %v5137_v22  ;;  %v5043_v31 = vmul.f32 %v7506_v53, %v5800_v61 }
 0x43a   : > { %v7508_v46 = vpop.eup %7507  ;;  %v5186_v55 = vsel %vm5090_vm1, %v9426_v2, %v5138_v7 }
 0x43b   : > { %v6110_v63 = vpack.c.bf16 %v5186_v55, %v5185_v34  ;;  %v5044_v27 = vmul.f32 %v7508_v46, %v5801_v51  ;;  %v5139_v10 = vmul.f32 %v5043_v31, %v9436_v59 }
 0x43d   : > { %6161 = vst [vmem:[%s7715_s24 + $0xb0] sm:$0xff] %v6110_v63   ;;  %v5140_v49 = vmul.f32 %v5044_v27, %v9440_v11  ;;  %v5187_v47 = vsel %vm5091_vm2, %v9436_v59, %v5139_v10 }
 0x43f   : > { %v5188_v19 = vsel %vm5092_vm3, %v9440_v11, %v5140_v49 }
 0x440   : > { %v6115_v52 = vpack.c.bf16 %v5188_v19, %v5187_v47 }
 0x442   : > { %6162 = vst [vmem:[%s7715_s24 + $0xb8] sm:$0xff] %v6115_v52  }
 0x443 PF: > { %s5437_s14 = smul.u32 %s7587_s18, %s7591_s19  ;;  %s5444_s27 = sshll.u32 %s7715_s24, 4  ;;  %s9493_s27 = int_to_ptr.vmem [resolvable:$true] %s5444_s27 }
 0x444   : > { %s9502_s9 = scalar_lea.sflag [#allocation7], %s212_s8  ;;  %s7509_s10 = scalar_lea.vmem %s9493_s27, 3072 }
 0x445   : > { %s7238_s30 = smul.u32 3072, %s5437_s14  ;;  %p7510_p2 = scmp.ne.s32.totalorder %s9493_s27, %s7509_s10 }
 0x446   : > { %s7606_s18 = smov [#allocation6]  }
 0x447   : > { %s9498_s6 = scalar_lea.hbm %s9558_s4, %s7238_s30  ;;  %p7511_p3 = pnand %p7510_p2, %p7687_p6 }
 0x448   : > { %s7513_s19 = sshll.u32 %s7606_s18, 4  ;;  %s7514_s19 = int_to_ptr.vmem [resolvable:$false] %s7513_s19 }
 0x449   : > { %p7512_p4 = pneg %p7511_p3  ;;  %s7515_s24 = scalar_lea.vmem %s7514_s19, 6144 }
 0x44a   : > { %p7516_p5 = scmp.lt.s32.totalorder %s9493_s27, %s7514_s19  ;;  %p7517_p7 = scmp.lt.s32.totalorder %s7515_s24, %s7509_s10 }
 0x44c   : > { %p7518_p9 = por %p7517_p7, %p7516_p5 }
 0x44e   : > { %p7519_p10 = pnand %p7518_p9, %p7512_p4 }
 0x450   : > { %7522 = shalt.err (!%p7519_p10)
}
 0x451   : > { %s7523_s8 = scalar_lea.hbm %s9498_s6, 3072  ;;  %s7527_s13 = scalar_lea.hbm %s9558_s4, 6144 }
 0x452   : > { %p7524_p11 = scmp.ne.s32.totalorder %s9498_s6, %s7523_s8  ;;  %p7528_p0 = scmp.lt.u32.totalorder %s9498_s6, %s9558_s4 }
 0x453   : > { %p7529_p1 = scmp.lt.u32.totalorder %s7527_s13, %s7523_s8  ;;  %p7531_p3 = scmp.lt.u32.totalorder %s7523_s8, %s9498_s6 }
 0x454   : > { %p7525_p12 = pnand %p7524_p11, %p7687_p6 }
 0x455   : > { %p7530_p2 = por %p7529_p1, %p7528_p0 }
 0x456   : > { %p7526_p13 = pneg %p7525_p12 }
 0x457   : > { %p7532_p4 = por %p7531_p3, %p7530_p2 }
 0x459   : > { %p7533_p5 = pnand %p7532_p4, %p7526_p13 }
 0x45b   : > { %7536 = shalt.err (!%p7533_p5)
}
 0x45c   : > { %s7607_s23 = smov 64   ;;  %s7608_s5 = smov 4  }
 0x45d   : > { %7239 = dma.vmem_to_hbm [thread:$0]  (%p7687_p6), %s9493_s27, 3072, %s9498_s6, %s9502_s9, %s7607_s23, %s7607_s23, %s7608_s5  }
 0x45e PF: > { %p7245_p7 = scmp.ge.s32.totalorder %s7603_s22, 2  ;;  %s5459_s10 = sand.u32 1, %s7575_s15  }
 0x45f   : > { %s5460_s18 = scalar_lea.sflag [#allocation7], %s5459_s10 }
 0x460   : > { %p7242_p9 = pnand %p7245_p7, %p7694_p8 }
 0x462   : > { %7570 = dma.done.wait (!%p7242_p9), %s5460_s18, 3072  }
 0x463   : > { %7572 = vsyncadd (!%p7242_p9), %s5460_s18, 4294964224  ;;  %s17_s22 = sadd.s32 1, %s7603_s22   ;;  %s9566_s15 = smov %s7579_s16 }
 0x464   : > { %p14_p10 = scmp.ge.s32.totalorder %s17_s22, 6   ;;  %s9567_s16 = smov %s7583_s17 }
 0x465   : > { %s9568_s17 = smov %s7703_s7  ;;  %s9569_s18 = smov %s7595_s20 }
 0x466   : > { %s9570_s19 = smov %s7599_s21  ;;  %s9571_s20 = smov %s9574_s25 }
 0x467   : > { %s9572_s21 = smov %s9578_s26  ;;  %16 = sbr.rel (!%p14_p10) target bundleno = 5 (0x5), region = 95 }
 0x46e   :  { %5465 = vsyncpa [#allocation7], 1 }
 0x46f   :  { %5467 = vsyncpa [#allocation7 + $0x1], 1 }

</bundles_post_ra>
